<compile_context>
chip_gen: v6e
topology: v6e:2x2x1
jax: 0.10.0
libtpu: 0.0.40
codegen_flags: <defaults>
</compile_context>

<pallas_src>
import math

import jax
import jax.numpy as jnp
from jax.experimental import pallas as pl
from jax.experimental.pallas import tpu as pltpu

# ----------------------------- small hyper-params -----------------------------
B = 2                     # batch
IN_CHANS = 1              # Conv3d in_channels = 1 (hard-coded in the module)
D, H, W = 8, 16, 16       # input volume (depth, height, width)
PD, PH, PW = 8, 8, 8      # 3-D patch size (kernel == stride)
EMBED = 32                # embed_dim
HEADS = 4                 # num_heads
HEAD_DIM = EMBED // HEADS
DEPTH = 2                 # transformer depth
MLP_HIDDEN = EMBED * 4    # mlp_ratio = 4.0
NUM_CLASSES = 10
C_PAD = 128               # lane-dense (padded) head-output width
N_PATCH = (D // PD) * (H // PH) * (W // PW)   # = 4 patches per image
N_TOK = N_PATCH + 1                           # + cls token
BN = B * N_TOK                                # flattened token count
PATCH_DIM = IN_CHANS * PD * PH * PW           # = 512
EPS = 1e-6                                    # LayerNorm eps (partial(nn.LayerNorm, eps=1e-6))


# ----------------------------- in-kernel helpers ------------------------------
def _layer_norm(v, w, b):
    mu = jnp.mean(v, axis=-1, keepdims=True)
    var = jnp.mean(jnp.square(v - mu), axis=-1, keepdims=True)
    return (v - mu) * jax.lax.rsqrt(var + EPS) * w + b


def _gelu(x):
    # tanh-approximate GELU (EUP tanh); torch.nn.GELU() default is exact erf,
    # max abs deviation of this approximation is ~1e-3.
    c = math.sqrt(2.0 / math.pi)
    return 0.5 * x * (1.0 + jnp.tanh(c * (x + 0.044715 * x * x * x)))


# ------------------------------ fused ViT kernel --------------------------------
def _vit_kernel(xp_ref, pw_ref, pb_ref, clspos_ref, pospatch_ref,
                ln1w_ref, ln1b_ref, qw_ref, qb_ref, kw_ref, kb_ref,
                vw_ref, vb_ref, projw_ref, projb_ref,
                ln2w_ref, ln2b_ref, fc1w_ref, fc1b_ref, fc2w_ref, fc2b_ref,
                nw_ref, nb_ref, hw_ref, hb_ref,
                o_ref, tok_ref):
    # ---- patch embed + cls token + pos embed (all batches at once) ----
    pe = jnp.dot(xp_ref[...], pw_ref[...],
                 preferred_element_type=jnp.float32) + pb_ref[...]      # (B*N_PATCH, E)
    cls_pos = clspos_ref[...]                                            # (1, E) = cls + pos[0]
    pos_patch = pospatch_ref[...]                                        # (N_PATCH, E)
    for b in range(B):
        tok_ref[pl.ds(b * N_TOK, 1), :] = cls_pos
        tok_ref[pl.ds(b * N_TOK + 1, N_PATCH), :] = (
            pe[b * N_PATCH:(b + 1) * N_PATCH, :] + pos_patch)
    x = tok_ref[...]                                                     # (BN, E)

    # Block-diagonal additive mask so flattened-batch attention never mixes batches.
    ri = jax.lax.broadcasted_iota(jnp.int32, (BN, BN), 0)
    ci = jax.lax.broadcasted_iota(jnp.int32, (BN, BN), 1)
    same = None
    for b in range(B):
        rb = (ri >= b * N_TOK) & (ri < (b + 1) * N_TOK)
        cb = (ci >= b * N_TOK) & (ci < (b + 1) * N_TOK)
        blk = rb & cb
        same = blk if same is None else (same | blk)
    neg_mask = jnp.where(same, 0.0, -1e30).astype(jnp.float32)           # (BN, BN)

    scale = 1.0 / math.sqrt(HEAD_DIM)

    for d in range(DEPTH):
        # ---- x = x + Attention(norm1(x)) ----
        h = _layer_norm(x, ln1w_ref[d], ln1b_ref[d])
        q = jnp.dot(h, qw_ref[d], preferred_element_type=jnp.float32) + qb_ref[d]
        k = jnp.dot(h, kw_ref[d], preferred_element_type=jnp.float32) + kb_ref[d]
        v = jnp.dot(h, vw_ref[d], preferred_element_type=jnp.float32) + vb_ref[d]
        projw = projw_ref[d]
        attn = jnp.zeros((BN, EMBED), jnp.float32)
        for hh in range(HEADS):
            sl = slice(hh * HEAD_DIM, (hh + 1) * HEAD_DIM)
            qh, kh, vh = q[:, sl], k[:, sl], v[:, sl]                    # (BN, hd)
            s = jax.lax.dot_general(qh, kh, (((1,), (1,)), ((), ())),
                                    preferred_element_type=jnp.float32)  # (BN, BN)
            s = s * scale + neg_mask
            s = s - jnp.max(s, axis=-1, keepdims=True)
            p = jnp.exp(s)
            p = p * pl.reciprocal(jnp.sum(p, axis=-1, keepdims=True), approx=True)
            oh = jnp.dot(p, vh, preferred_element_type=jnp.float32)      # (BN, hd)
            # accumulate straight into the projection output (no head concat)
            attn = attn + jnp.dot(oh, projw[sl, :],
                                  preferred_element_type=jnp.float32)    # (BN, E)
        x = x + attn + projb_ref[d]

        # ---- x = x + MLP(norm2(x)) ----
        h2 = _layer_norm(x, ln2w_ref[d], ln2b_ref[d])
        m = jnp.dot(h2, fc1w_ref[d], preferred_element_type=jnp.float32) + fc1b_ref[d]
        m = _gelu(m)
        m = jnp.dot(m, fc2w_ref[d], preferred_element_type=jnp.float32) + fc2b_ref[d]
        x = x + m

    # ---- final LayerNorm (per-token) + classifier head, lane-dense (C_PAD) output ----
    xn = _layer_norm(x, nw_ref[...], nb_ref[...])
    logits = jnp.dot(xn, hw_ref[...],
                     preferred_element_type=jnp.float32) + hb_ref[...]   # (BN, C_PAD)
    for b in range(B):                                                   # keep cls rows only
        o_ref[pl.ds(b, 1), :] = logits[b * N_TOK:b * N_TOK + 1, :]


# ------------------------------ pallas wrapper ----------------------------------
PARAM_ORDER = ("patch_w", "patch_b", "cls_pos", "pos_patch",
               "ln1_w", "ln1_b", "q_w", "q_b", "k_w", "k_b", "v_w", "v_b",
               "proj_w", "proj_b", "ln2_w", "ln2_b",
               "fc1_w", "fc1_b", "fc2_w", "fc2_b",
               "norm_w", "norm_b", "head_w", "head_b")


def _full_spec(shape):
    nd = len(shape)

    def index_map(i):
        return (0,) * nd

    return pl.BlockSpec(tuple(shape), index_map)


def vit_forward(x, params):
    assert x.shape == (B, IN_CHANS, D, H, W)
    # Strided Conv3d (kernel == stride, padding 0) == patch extraction + matmul.
    xp = x.reshape(B, IN_CHANS, D // PD, PD, H // PH, PH, W // PW, PW)
    xp = xp.transpose(0, 2, 4, 6, 1, 3, 5, 7).reshape(B * N_PATCH, PATCH_DIM)
    # TODO(synk): fold this patch-extraction transpose into the kernel via a manual DMA gather.

    inputs = (xp,) + tuple(params[k] for k in PARAM_ORDER)
    logits_pad = pl.pallas_call(
        _vit_kernel,
        out_shape=jax.ShapeDtypeStruct((B, C_PAD), jnp.float32),
        grid=(1,),
        in_specs=[_full_spec(a.shape) for a in inputs],
        out_specs=pl.BlockSpec((B, C_PAD), lambda i: (0, 0)),
        scratch_shapes=[pltpu.VMEM((BN, EMBED), jnp.float32)],
    )(*inputs)
    return logits_pad[:, :NUM_CLASSES]


# ------------------------------- parameters ------------------------------------
def init_params(key):
    keys = jax.random.split(key, 64)
    it = iter(keys)

    def tn(shape, std=0.02):
        # timm trunc_normal_: normal truncated to +-2 std
        return std * jax.random.truncated_normal(next(it), -2.0, 2.0, shape, jnp.float32)

    def stack(fn):
        return jnp.stack([fn() for _ in range(DEPTH)], axis=0)

    p = {}
    # Conv3d(1 -> EMBED, kernel=stride=(PD,PH,PW)) weight flattened for the matmul kernel.
    conv_w = 0.02 * jax.random.normal(next(it), (EMBED, IN_CHANS, PD, PH, PW), jnp.float32)
    p["patch_w"] = conv_w.reshape(EMBED, PATCH_DIM).T                    # (PATCH_DIM, E)
    p["patch_b"] = jnp.zeros((1, EMBED), jnp.float32)

    cls_tok = tn((1, EMBED))                                             # cls_token
    pos = tn((N_TOK, EMBED))                                             # pos_embed
    p["cls_pos"] = cls_tok + pos[0:1, :]                                 # cls + its pos row
    p["pos_patch"] = pos[1:, :]                                          # (N_PATCH, E)

    p["ln1_w"] = jnp.ones((DEPTH, 1, EMBED), jnp.float32)
    p["ln1_b"] = jnp.zeros((DEPTH, 1, EMBED), jnp.float32)
    p["q_w"] = stack(lambda: tn((EMBED, EMBED)))                         # qkv split into 3
    p["q_b"] = jnp.zeros((DEPTH, 1, EMBED), jnp.float32)                 # qkv_bias=True
    p["k_w"] = stack(lambda: tn((EMBED, EMBED)))
    p["k_b"] = jnp.zeros((DEPTH, 1, EMBED), jnp.float32)
    p["v_w"] = stack(lambda: tn((EMBED, EMBED)))
    p["v_b"] = jnp.zeros((DEPTH, 1, EMBED), jnp.float32)
    p["proj_w"] = stack(lambda: tn((EMBED, EMBED)))
    p["proj_b"] = jnp.zeros((DEPTH, 1, EMBED), jnp.float32)
    p["ln2_w"] = jnp.ones((DEPTH, 1, EMBED), jnp.float32)
    p["ln2_b"] = jnp.zeros((DEPTH, 1, EMBED), jnp.float32)
    p["fc1_w"] = stack(lambda: tn((EMBED, MLP_HIDDEN)))
    p["fc1_b"] = jnp.zeros((DEPTH, 1, MLP_HIDDEN), jnp.float32)
    p["fc2_w"] = stack(lambda: tn((MLP_HIDDEN, EMBED)))
    p["fc2_b"] = jnp.zeros((DEPTH, 1, EMBED), jnp.float32)

    p["norm_w"] = jnp.ones((1, EMBED), jnp.float32)
    p["norm_b"] = jnp.zeros((1, EMBED), jnp.float32)
    hw = tn((EMBED, NUM_CLASSES))
    p["head_w"] = jnp.zeros((EMBED, C_PAD), jnp.float32).at[:, :NUM_CLASSES].set(hw)
    p["head_b"] = jnp.zeros((1, C_PAD), jnp.float32)
    return p


# ---------------------------------- main ----------------------------------------
if __name__ == "__main__":
    key = jax.random.PRNGKey(0)
    k_param, k_data = jax.random.split(key)
    params = init_params(k_param)
    x = jax.random.normal(k_data, (B, IN_CHANS, D, H, W), jnp.float32)

    logits = jax.jit(vit_forward)(x, params)
    logits = jax.block_until_ready(logits)
    assert logits.shape == (B, NUM_CLASSES)
    print("KERNEL_OK")
</pallas_src>

<mosaic_0001>
module attributes {stable_mosaic.version = 11 : i64} {
  func.func @_vit_kernel(%arg0: i32, %arg1: memref<8x512xf32, #tpu.memory_space<vmem>>, %arg2: memref<512x32xf32, #tpu.memory_space<vmem>>, %arg3: memref<1x32xf32, #tpu.memory_space<vmem>>, %arg4: memref<1x32xf32, #tpu.memory_space<vmem>>, %arg5: memref<4x32xf32, #tpu.memory_space<vmem>>, %arg6: memref<2x1x32xf32, #tpu.memory_space<vmem>>, %arg7: memref<2x1x32xf32, #tpu.memory_space<vmem>>, %arg8: memref<2x32x32xf32, #tpu.memory_space<vmem>>, %arg9: memref<2x1x32xf32, #tpu.memory_space<vmem>>, %arg10: memref<2x32x32xf32, #tpu.memory_space<vmem>>, %arg11: memref<2x1x32xf32, #tpu.memory_space<vmem>>, %arg12: memref<2x32x32xf32, #tpu.memory_space<vmem>>, %arg13: memref<2x1x32xf32, #tpu.memory_space<vmem>>, %arg14: memref<2x32x32xf32, #tpu.memory_space<vmem>>, %arg15: memref<2x1x32xf32, #tpu.memory_space<vmem>>, %arg16: memref<2x1x32xf32, #tpu.memory_space<vmem>>, %arg17: memref<2x1x32xf32, #tpu.memory_space<vmem>>, %arg18: memref<2x32x128xf32, #tpu.memory_space<vmem>>, %arg19: memref<2x1x128xf32, #tpu.memory_space<vmem>>, %arg20: memref<2x128x32xf32, #tpu.memory_space<vmem>>, %arg21: memref<2x1x32xf32, #tpu.memory_space<vmem>>, %arg22: memref<1x32xf32, #tpu.memory_space<vmem>>, %arg23: memref<1x32xf32, #tpu.memory_space<vmem>>, %arg24: memref<32x128xf32, #tpu.memory_space<vmem>>, %arg25: memref<1x128xf32, #tpu.memory_space<vmem>>, %arg26: memref<2x128xf32, #tpu.memory_space<vmem>>, %arg27: memref<10x32xf32, #tpu.memory_space<vmem>>) attributes {dimension_semantics = [#tpu.dimension_semantics<arbitrary>], iteration_bounds = array<i64: 1>, scalar_prefetch = 0 : i64, scratch_operands = 1 : i64, tpu.core_type = #tpu.core_type<tc>, window_params = [{pipeline_mode = #tpu.pipeline_mode<synchronous>, transform_indices = @transform_0, window_bounds = array<i64: 8, 512>}, {pipeline_mode = #tpu.pipeline_mode<synchronous>, transform_indices = @transform_1, window_bounds = array<i64: 512, 32>}, {pipeline_mode = #tpu.pipeline_mode<synchronous>, transform_indices = @transform_2, window_bounds = array<i64: 1, 32>}, {pipeline_mode = #tpu.pipeline_mode<synchronous>, transform_indices = @transform_3, window_bounds = array<i64: 1, 32>}, {pipeline_mode = #tpu.pipeline_mode<synchronous>, transform_indices = @transform_4, window_bounds = array<i64: 4, 32>}, {pipeline_mode = #tpu.pipeline_mode<synchronous>, transform_indices = @transform_5, window_bounds = array<i64: 2, 1, 32>}, {pipeline_mode = #tpu.pipeline_mode<synchronous>, transform_indices = @transform_6, window_bounds = array<i64: 2, 1, 32>}, {pipeline_mode = #tpu.pipeline_mode<synchronous>, transform_indices = @transform_7, window_bounds = array<i64: 2, 32, 32>}, {pipeline_mode = #tpu.pipeline_mode<synchronous>, transform_indices = @transform_8, window_bounds = array<i64: 2, 1, 32>}, {pipeline_mode = #tpu.pipeline_mode<synchronous>, transform_indices = @transform_9, window_bounds = array<i64: 2, 32, 32>}, {pipeline_mode = #tpu.pipeline_mode<synchronous>, transform_indices = @transform_10, window_bounds = array<i64: 2, 1, 32>}, {pipeline_mode = #tpu.pipeline_mode<synchronous>, transform_indices = @transform_11, window_bounds = array<i64: 2, 32, 32>}, {pipeline_mode = #tpu.pipeline_mode<synchronous>, transform_indices = @transform_12, window_bounds = array<i64: 2, 1, 32>}, {pipeline_mode = #tpu.pipeline_mode<synchronous>, transform_indices = @transform_13, window_bounds = array<i64: 2, 32, 32>}, {pipeline_mode = #tpu.pipeline_mode<synchronous>, transform_indices = @transform_14, window_bounds = array<i64: 2, 1, 32>}, {pipeline_mode = #tpu.pipeline_mode<synchronous>, transform_indices = @transform_15, window_bounds = array<i64: 2, 1, 32>}, {pipeline_mode = #tpu.pipeline_mode<synchronous>, transform_indices = @transform_16, window_bounds = array<i64: 2, 1, 32>}, {pipeline_mode = #tpu.pipeline_mode<synchronous>, transform_indices = @transform_17, window_bounds = array<i64: 2, 32, 128>}, {pipeline_mode = #tpu.pipeline_mode<synchronous>, transform_indices = @transform_18, window_bounds = array<i64: 2, 1, 128>}, {pipeline_mode = #tpu.pipeline_mode<synchronous>, transform_indices = @transform_19, window_bounds = array<i64: 2, 128, 32>}, {pipeline_mode = #tpu.pipeline_mode<synchronous>, transform_indices = @transform_20, window_bounds = array<i64: 2, 1, 32>}, {pipeline_mode = #tpu.pipeline_mode<synchronous>, transform_indices = @transform_21, window_bounds = array<i64: 1, 32>}, {pipeline_mode = #tpu.pipeline_mode<synchronous>, transform_indices = @transform_22, window_bounds = array<i64: 1, 32>}, {pipeline_mode = #tpu.pipeline_mode<synchronous>, transform_indices = @transform_23, window_bounds = array<i64: 32, 128>}, {pipeline_mode = #tpu.pipeline_mode<synchronous>, transform_indices = @transform_24, window_bounds = array<i64: 1, 128>}, {pipeline_mode = #tpu.pipeline_mode<synchronous>, transform_indices = @transform_25, window_bounds = array<i64: 2, 128>}]} {
    %c0 = arith.constant 0 : index
    %c0_0 = arith.constant 0 : index
    %0 = vector.load %arg1[%c0, %c0_0] : memref<8x512xf32, #tpu.memory_space<vmem>>, vector<8x512xf32>
    %c0_1 = arith.constant 0 : index
    %c0_2 = arith.constant 0 : index
    %1 = vector.load %arg2[%c0_1, %c0_2] : memref<512x32xf32, #tpu.memory_space<vmem>>, vector<512x32xf32>
    %cst = arith.constant dense<0.000000e+00> : vector<8x32xf32>
    %2 = tpu.matmul %0, %1, %cst {dimension_numbers = #tpu.dot_dimension_numbers<[1], [0], [0], [1], [0, 0, 1, 1], [], []>} : vector<8x512xf32>, vector<512x32xf32>, vector<8x32xf32> -> vector<8x32xf32>
    %c0_3 = arith.constant 0 : index
    %c0_4 = arith.constant 0 : index
    %3 = vector.load %arg3[%c0_3, %c0_4] : memref<1x32xf32, #tpu.memory_space<vmem>>, vector<1x32xf32>
    %4 = vector.broadcast %3 : vector<1x32xf32> to vector<8x32xf32>
    %5 = arith.addf %2, %4 : vector<8x32xf32>
    %c0_5 = arith.constant 0 : index
    %c0_6 = arith.constant 0 : index
    %6 = vector.load %arg4[%c0_5, %c0_6] : memref<1x32xf32, #tpu.memory_space<vmem>>, vector<1x32xf32>
    %c0_7 = arith.constant 0 : index
    %c0_8 = arith.constant 0 : index
    %7 = vector.load %arg5[%c0_7, %c0_8] : memref<4x32xf32, #tpu.memory_space<vmem>>, vector<4x32xf32>
    %c0_9 = arith.constant 0 : index
    %c0_10 = arith.constant 0 : index
    %8 = vector.load %arg27[%c0_9, %c0_10] : memref<10x32xf32, #tpu.memory_space<vmem>>, vector<1x32xf32>
    tpu.vector_store %arg27[%c0_9, %c0_10], %6 {strides = array<i32>} : memref<10x32xf32, #tpu.memory_space<vmem>>, vector<1x32xf32>,
    %9 = vector.extract_strided_slice %5 {offsets = [0, 0], sizes = [4, 32], strides = [1, 1]} : vector<8x32xf32> to vector<4x32xf32>
    %10 = arith.addf %9, %7 : vector<4x32xf32>
    %c1 = arith.constant 1 : index
    %c0_11 = arith.constant 0 : index
    %11 = vector.load %arg27[%c1, %c0_11] : memref<10x32xf32, #tpu.memory_space<vmem>>, vector<4x32xf32>
    tpu.vector_store %arg27[%c1, %c0_11], %10 {strides = array<i32>} : memref<10x32xf32, #tpu.memory_space<vmem>>, vector<4x32xf32>,
    %c5 = arith.constant 5 : index
    %c0_12 = arith.constant 0 : index
    %12 = vector.load %arg27[%c5, %c0_12] : memref<10x32xf32, #tpu.memory_space<vmem>>, vector<1x32xf32>
    tpu.vector_store %arg27[%c5, %c0_12], %6 {strides = array<i32>} : memref<10x32xf32, #tpu.memory_space<vmem>>, vector<1x32xf32>,
    %13 = vector.extract_strided_slice %5 {offsets = [4, 0], sizes = [4, 32], strides = [1, 1]} : vector<8x32xf32> to vector<4x32xf32>
    %14 = arith.addf %13, %7 : vector<4x32xf32>
    %c6 = arith.constant 6 : index
    %c0_13 = arith.constant 0 : index
    %15 = vector.load %arg27[%c6, %c0_13] : memref<10x32xf32, #tpu.memory_space<vmem>>, vector<4x32xf32>
    tpu.vector_store %arg27[%c6, %c0_13], %14 {strides = array<i32>} : memref<10x32xf32, #tpu.memory_space<vmem>>, vector<4x32xf32>,
    %c0_14 = arith.constant 0 : index
    %c0_15 = arith.constant 0 : index
    %16 = vector.load %arg27[%c0_14, %c0_15] : memref<10x32xf32, #tpu.memory_space<vmem>>, vector<10x32xf32>
    %17 = tpu.iota {dimensions = array<i32: 0>} : vector<10x10xi32>
    %18 = tpu.iota {dimensions = array<i32: 1>} : vector<10x10xi32>
    %c0_i32 = arith.constant 0 : i32
    %19 = vector.broadcast %c0_i32 : i32 to vector<10x10xi32>
    %20 = arith.cmpi sge, %17, %19 : vector<10x10xi32>
    %c5_i32 = arith.constant 5 : i32
    %21 = vector.broadcast %c5_i32 : i32 to vector<10x10xi32>
    %22 = arith.cmpi slt, %17, %21 : vector<10x10xi32>
    %23 = arith.andi %20, %22 : vector<10x10xi1>
    %c0_i32_16 = arith.constant 0 : i32
    %24 = vector.broadcast %c0_i32_16 : i32 to vector<10x10xi32>
    %25 = arith.cmpi sge, %18, %24 : vector<10x10xi32>
    %c5_i32_17 = arith.constant 5 : i32
    %26 = vector.broadcast %c5_i32_17 : i32 to vector<10x10xi32>
    %27 = arith.cmpi slt, %18, %26 : vector<10x10xi32>
    %28 = arith.andi %25, %27 : vector<10x10xi1>
    %29 = arith.andi %23, %28 : vector<10x10xi1>
    %c5_i32_18 = arith.constant 5 : i32
    %30 = vector.broadcast %c5_i32_18 : i32 to vector<10x10xi32>
    %31 = arith.cmpi sge, %17, %30 : vector<10x10xi32>
    %c10_i32 = arith.constant 10 : i32
    %32 = vector.broadcast %c10_i32 : i32 to vector<10x10xi32>
    %33 = arith.cmpi slt, %17, %32 : vector<10x10xi32>
    %34 = arith.andi %31, %33 : vector<10x10xi1>
    %c5_i32_19 = arith.constant 5 : i32
    %35 = vector.broadcast %c5_i32_19 : i32 to vector<10x10xi32>
    %36 = arith.cmpi sge, %18, %35 : vector<10x10xi32>
    %c10_i32_20 = arith.constant 10 : i32
    %37 = vector.broadcast %c10_i32_20 : i32 to vector<10x10xi32>
    %38 = arith.cmpi slt, %18, %37 : vector<10x10xi32>
    %39 = arith.andi %36, %38 : vector<10x10xi1>
    %40 = arith.andi %34, %39 : vector<10x10xi1>
    %41 = arith.ori %29, %40 : vector<10x10xi1>
    %cst_21 = arith.constant 0.000000e+00 : f32
    %cst_22 = arith.constant -1.000000e+30 : f32
    %42 = vector.broadcast %cst_21 : f32 to vector<10x10xf32>
    %43 = vector.broadcast %cst_22 : f32 to vector<10x10xf32>
    %44 = arith.select %41, %42, %43 : vector<10x10xi1>, vector<10x10xf32>
    %c0_23 = arith.constant 0 : index
    %c0_24 = arith.constant 0 : index
    %c0_25 = arith.constant 0 : index
    %45 = vector.load %arg6[%c0_23, %c0_24, %c0_25] : memref<2x1x32xf32, #tpu.memory_space<vmem>>, vector<1x1x32xf32>
    %46 = vector.shape_cast %45 : vector<1x1x32xf32> to vector<1x32xf32>
    %c0_26 = arith.constant 0 : index
    %c0_27 = arith.constant 0 : index
    %c0_28 = arith.constant 0 : index
    %47 = vector.load %arg7[%c0_26, %c0_27, %c0_28] : memref<2x1x32xf32, #tpu.memory_space<vmem>>, vector<1x1x32xf32>
    %48 = vector.shape_cast %47 : vector<1x1x32xf32> to vector<1x32xf32>
    %cst_29 = arith.constant dense<0.000000e+00> : vector<10xf32>
    %49 = vector.multi_reduction <add>, %16, %cst_29 [1] : vector<10x32xf32> to vector<10xf32>
    %50 = vector.shape_cast %49 : vector<10xf32> to vector<10x1xf32>
    %cst_30 = arith.constant 3.200000e+01 : f32
    %51 = vector.broadcast %cst_30 : f32 to vector<10x1xf32>
    %52 = arith.divf %50, %51 : vector<10x1xf32>
    %53 = vector.broadcast %52 : vector<10x1xf32> to vector<10x32xf32>
    %54 = arith.subf %16, %53 : vector<10x32xf32>
    %55 = arith.mulf %54, %54 : vector<10x32xf32>
    %cst_31 = arith.constant dense<0.000000e+00> : vector<10xf32>
    %56 = vector.multi_reduction <add>, %55, %cst_31 [1] : vector<10x32xf32> to vector<10xf32>
    %57 = vector.shape_cast %56 : vector<10xf32> to vector<10x1xf32>
    %cst_32 = arith.constant 3.200000e+01 : f32
    %58 = vector.broadcast %cst_32 : f32 to vector<10x1xf32>
    %59 = arith.divf %57, %58 : vector<10x1xf32>
    %60 = vector.broadcast %52 : vector<10x1xf32> to vector<10x32xf32>
    %61 = arith.subf %16, %60 : vector<10x32xf32>
    %cst_33 = arith.constant 9.99999997E-7 : f32
    %62 = vector.broadcast %cst_33 : f32 to vector<10x1xf32>
    %63 = arith.addf %59, %62 : vector<10x1xf32>
    %64 = math.rsqrt %63 : vector<10x1xf32>
    %65 = vector.broadcast %64 : vector<10x1xf32> to vector<10x32xf32>
    %66 = arith.mulf %61, %65 : vector<10x32xf32>
    %67 = vector.broadcast %46 : vector<1x32xf32> to vector<10x32xf32>
    %68 = arith.mulf %66, %67 : vector<10x32xf32>
    %69 = vector.broadcast %48 : vector<1x32xf32> to vector<10x32xf32>
    %70 = arith.addf %68, %69 : vector<10x32xf32>
    %c0_34 = arith.constant 0 : index
    %c0_35 = arith.constant 0 : index
    %c0_36 = arith.constant 0 : index
    %71 = vector.load %arg8[%c0_34, %c0_35, %c0_36] : memref<2x32x32xf32, #tpu.memory_space<vmem>>, vector<1x32x32xf32>
    %72 = vector.shape_cast %71 : vector<1x32x32xf32> to vector<32x32xf32>
    %cst_37 = arith.constant dense<0.000000e+00> : vector<10x32xf32>
    %73 = tpu.matmul %70, %72, %cst_37 {dimension_numbers = #tpu.dot_dimension_numbers<[1], [0], [0], [1], [0, 0, 1, 1], [], []>} : vector<10x32xf32>, vector<32x32xf32>, vector<10x32xf32> -> vector<10x32xf32>
    %c0_38 = arith.constant 0 : index
    %c0_39 = arith.constant 0 : index
    %c0_40 = arith.constant 0 : index
    %74 = vector.load %arg9[%c0_38, %c0_39, %c0_40] : memref<2x1x32xf32, #tpu.memory_space<vmem>>, vector<1x1x32xf32>
    %75 = vector.shape_cast %74 : vector<1x1x32xf32> to vector<1x32xf32>
    %76 = vector.broadcast %75 : vector<1x32xf32> to vector<10x32xf32>
    %77 = arith.addf %73, %76 : vector<10x32xf32>
    %c0_41 = arith.constant 0 : index
    %c0_42 = arith.constant 0 : index
    %c0_43 = arith.constant 0 : index
    %78 = vector.load %arg10[%c0_41, %c0_42, %c0_43] : memref<2x32x32xf32, #tpu.memory_space<vmem>>, vector<1x32x32xf32>
    %79 = vector.shape_cast %78 : vector<1x32x32xf32> to vector<32x32xf32>
    %cst_44 = arith.constant dense<0.000000e+00> : vector<10x32xf32>
    %80 = tpu.matmul %70, %79, %cst_44 {dimension_numbers = #tpu.dot_dimension_numbers<[1], [0], [0], [1], [0, 0, 1, 1], [], []>} : vector<10x32xf32>, vector<32x32xf32>, vector<10x32xf32> -> vector<10x32xf32>
    %c0_45 = arith.constant 0 : index
    %c0_46 = arith.constant 0 : index
    %c0_47 = arith.constant 0 : index
    %81 = vector.load %arg11[%c0_45, %c0_46, %c0_47] : memref<2x1x32xf32, #tpu.memory_space<vmem>>, vector<1x1x32xf32>
    %82 = vector.shape_cast %81 : vector<1x1x32xf32> to vector<1x32xf32>
    %83 = vector.broadcast %82 : vector<1x32xf32> to vector<10x32xf32>
    %84 = arith.addf %80, %83 : vector<10x32xf32>
    %c0_48 = arith.constant 0 : index
    %c0_49 = arith.constant 0 : index
    %c0_50 = arith.constant 0 : index
    %85 = vector.load %arg12[%c0_48, %c0_49, %c0_50] : memref<2x32x32xf32, #tpu.memory_space<vmem>>, vector<1x32x32xf32>
    %86 = vector.shape_cast %85 : vector<1x32x32xf32> to vector<32x32xf32>
    %cst_51 = arith.constant dense<0.000000e+00> : vector<10x32xf32>
    %87 = tpu.matmul %70, %86, %cst_51 {dimension_numbers = #tpu.dot_dimension_numbers<[1], [0], [0], [1], [0, 0, 1, 1], [], []>} : vector<10x32xf32>, vector<32x32xf32>, vector<10x32xf32> -> vector<10x32xf32>
    %c0_52 = arith.constant 0 : index
    %c0_53 = arith.constant 0 : index
    %c0_54 = arith.constant 0 : index
    %88 = vector.load %arg13[%c0_52, %c0_53, %c0_54] : memref<2x1x32xf32, #tpu.memory_space<vmem>>, vector<1x1x32xf32>
    %89 = vector.shape_cast %88 : vector<1x1x32xf32> to vector<1x32xf32>
    %90 = vector.broadcast %89 : vector<1x32xf32> to vector<10x32xf32>
    %91 = arith.addf %87, %90 : vector<10x32xf32>
    %c0_55 = arith.constant 0 : index
    %c0_56 = arith.constant 0 : index
    %c0_57 = arith.constant 0 : index
    %92 = vector.load %arg14[%c0_55, %c0_56, %c0_57] : memref<2x32x32xf32, #tpu.memory_space<vmem>>, vector<1x32x32xf32>
    %93 = vector.shape_cast %92 : vector<1x32x32xf32> to vector<32x32xf32>
    %cst_58 = arith.constant 0.000000e+00 : f32
    %94 = vector.broadcast %cst_58 : f32 to vector<10x32xf32>
    %95 = vector.extract_strided_slice %77 {offsets = [0, 0], sizes = [10, 8], strides = [1, 1]} : vector<10x32xf32> to vector<10x8xf32>
    %96 = vector.extract_strided_slice %84 {offsets = [0, 0], sizes = [10, 8], strides = [1, 1]} : vector<10x32xf32> to vector<10x8xf32>
    %97 = vector.extract_strided_slice %91 {offsets = [0, 0], sizes = [10, 8], strides = [1, 1]} : vector<10x32xf32> to vector<10x8xf32>
    %cst_59 = arith.constant dense<0.000000e+00> : vector<10x10xf32>
    %98 = tpu.matmul %95, %96, %cst_59 {dimension_numbers = #tpu.dot_dimension_numbers<[1], [1], [0], [0], [0, 0, 1, 0], [], []>} : vector<10x8xf32>, vector<10x8xf32>, vector<10x10xf32> -> vector<10x10xf32>
    %cst_60 = arith.constant 0.353553385 : f32
    %99 = vector.broadcast %cst_60 : f32 to vector<10x10xf32>
    %100 = arith.mulf %98, %99 : vector<10x10xf32>
    %101 = arith.addf %100, %44 : vector<10x10xf32>
    %cst_61 = arith.constant dense<0xFF800000> : vector<10xf32>
    %102 = vector.multi_reduction <maximumf>, %101, %cst_61 [1] : vector<10x10xf32> to vector<10xf32>
    %103 = vector.shape_cast %102 : vector<10xf32> to vector<10x1xf32>
    %104 = vector.broadcast %103 : vector<10x1xf32> to vector<10x10xf32>
    %105 = arith.subf %101, %104 : vector<10x10xf32>
    %106 = math.exp %105 : vector<10x10xf32>
    %cst_62 = arith.constant dense<0.000000e+00> : vector<10xf32>
    %107 = vector.multi_reduction <add>, %106, %cst_62 [1] : vector<10x10xf32> to vector<10xf32>
    %108 = vector.shape_cast %107 : vector<10xf32> to vector<10x1xf32>
    %109 = tpu.reciprocal %108 {approx = true} : vector<10x1xf32> -> vector<10x1xf32>
    %110 = vector.broadcast %109 : vector<10x1xf32> to vector<10x10xf32>
    %111 = arith.mulf %106, %110 : vector<10x10xf32>
    %cst_63 = arith.constant dense<0.000000e+00> : vector<10x8xf32>
    %112 = tpu.matmul %111, %97, %cst_63 {dimension_numbers = #tpu.dot_dimension_numbers<[1], [0], [0], [1], [0, 0, 1, 1], [], []>} : vector<10x10xf32>, vector<10x8xf32>, vector<10x8xf32> -> vector<10x8xf32>
    %113 = vector.extract_strided_slice %93 {offsets = [0, 0], sizes = [8, 32], strides = [1, 1]} : vector<32x32xf32> to vector<8x32xf32>
    %cst_64 = arith.constant dense<0.000000e+00> : vector<10x32xf32>
    %114 = tpu.matmul %112, %113, %cst_64 {dimension_numbers = #tpu.dot_dimension_numbers<[1], [0], [0], [1], [0, 0, 1, 1], [], []>} : vector<10x8xf32>, vector<8x32xf32>, vector<10x32xf32> -> vector<10x32xf32>
    %115 = arith.addf %94, %114 : vector<10x32xf32>
    %116 = vector.extract_strided_slice %77 {offsets = [0, 8], sizes = [10, 8], strides = [1, 1]} : vector<10x32xf32> to vector<10x8xf32>
    %117 = vector.extract_strided_slice %84 {offsets = [0, 8], sizes = [10, 8], strides = [1, 1]} : vector<10x32xf32> to vector<10x8xf32>
    %118 = vector.extract_strided_slice %91 {offsets = [0, 8], sizes = [10, 8], strides = [1, 1]} : vector<10x32xf32> to vector<10x8xf32>
    %cst_65 = arith.constant dense<0.000000e+00> : vector<10x10xf32>
    %119 = tpu.matmul %116, %117, %cst_65 {dimension_numbers = #tpu.dot_dimension_numbers<[1], [1], [0], [0], [0, 0, 1, 0], [], []>} : vector<10x8xf32>, vector<10x8xf32>, vector<10x10xf32> -> vector<10x10xf32>
    %cst_66 = arith.constant 0.353553385 : f32
    %120 = vector.broadcast %cst_66 : f32 to vector<10x10xf32>
    %121 = arith.mulf %119, %120 : vector<10x10xf32>
    %122 = arith.addf %121, %44 : vector<10x10xf32>
    %cst_67 = arith.constant dense<0xFF800000> : vector<10xf32>
    %123 = vector.multi_reduction <maximumf>, %122, %cst_67 [1] : vector<10x10xf32> to vector<10xf32>
    %124 = vector.shape_cast %123 : vector<10xf32> to vector<10x1xf32>
    %125 = vector.broadcast %124 : vector<10x1xf32> to vector<10x10xf32>
    %126 = arith.subf %122, %125 : vector<10x10xf32>
    %127 = math.exp %126 : vector<10x10xf32>
    %cst_68 = arith.constant dense<0.000000e+00> : vector<10xf32>
    %128 = vector.multi_reduction <add>, %127, %cst_68 [1] : vector<10x10xf32> to vector<10xf32>
    %129 = vector.shape_cast %128 : vector<10xf32> to vector<10x1xf32>
    %130 = tpu.reciprocal %129 {approx = true} : vector<10x1xf32> -> vector<10x1xf32>
    %131 = vector.broadcast %130 : vector<10x1xf32> to vector<10x10xf32>
    %132 = arith.mulf %127, %131 : vector<10x10xf32>
    %cst_69 = arith.constant dense<0.000000e+00> : vector<10x8xf32>
    %133 = tpu.matmul %132, %118, %cst_69 {dimension_numbers = #tpu.dot_dimension_numbers<[1], [0], [0], [1], [0, 0, 1, 1], [], []>} : vector<10x10xf32>, vector<10x8xf32>, vector<10x8xf32> -> vector<10x8xf32>
    %134 = vector.extract_strided_slice %93 {offsets = [8, 0], sizes = [8, 32], strides = [1, 1]} : vector<32x32xf32> to vector<8x32xf32>
    %cst_70 = arith.constant dense<0.000000e+00> : vector<10x32xf32>
    %135 = tpu.matmul %133, %134, %cst_70 {dimension_numbers = #tpu.dot_dimension_numbers<[1], [0], [0], [1], [0, 0, 1, 1], [], []>} : vector<10x8xf32>, vector<8x32xf32>, vector<10x32xf32> -> vector<10x32xf32>
    %136 = arith.addf %115, %135 : vector<10x32xf32>
    %137 = vector.extract_strided_slice %77 {offsets = [0, 16], sizes = [10, 8], strides = [1, 1]} : vector<10x32xf32> to vector<10x8xf32>
    %138 = vector.extract_strided_slice %84 {offsets = [0, 16], sizes = [10, 8], strides = [1, 1]} : vector<10x32xf32> to vector<10x8xf32>
    %139 = vector.extract_strided_slice %91 {offsets = [0, 16], sizes = [10, 8], strides = [1, 1]} : vector<10x32xf32> to vector<10x8xf32>
    %cst_71 = arith.constant dense<0.000000e+00> : vector<10x10xf32>
    %140 = tpu.matmul %137, %138, %cst_71 {dimension_numbers = #tpu.dot_dimension_numbers<[1], [1], [0], [0], [0, 0, 1, 0], [], []>} : vector<10x8xf32>, vector<10x8xf32>, vector<10x10xf32> -> vector<10x10xf32>
    %cst_72 = arith.constant 0.353553385 : f32
    %141 = vector.broadcast %cst_72 : f32 to vector<10x10xf32>
    %142 = arith.mulf %140, %141 : vector<10x10xf32>
    %143 = arith.addf %142, %44 : vector<10x10xf32>
    %cst_73 = arith.constant dense<0xFF800000> : vector<10xf32>
    %144 = vector.multi_reduction <maximumf>, %143, %cst_73 [1] : vector<10x10xf32> to vector<10xf32>
    %145 = vector.shape_cast %144 : vector<10xf32> to vector<10x1xf32>
    %146 = vector.broadcast %145 : vector<10x1xf32> to vector<10x10xf32>
    %147 = arith.subf %143, %146 : vector<10x10xf32>
    %148 = math.exp %147 : vector<10x10xf32>
    %cst_74 = arith.constant dense<0.000000e+00> : vector<10xf32>
    %149 = vector.multi_reduction <add>, %148, %cst_74 [1] : vector<10x10xf32> to vector<10xf32>
    %150 = vector.shape_cast %149 : vector<10xf32> to vector<10x1xf32>
    %151 = tpu.reciprocal %150 {approx = true} : vector<10x1xf32> -> vector<10x1xf32>
    %152 = vector.broadcast %151 : vector<10x1xf32> to vector<10x10xf32>
    %153 = arith.mulf %148, %152 : vector<10x10xf32>
    %cst_75 = arith.constant dense<0.000000e+00> : vector<10x8xf32>
    %154 = tpu.matmul %153, %139, %cst_75 {dimension_numbers = #tpu.dot_dimension_numbers<[1], [0], [0], [1], [0, 0, 1, 1], [], []>} : vector<10x10xf32>, vector<10x8xf32>, vector<10x8xf32> -> vector<10x8xf32>
    %155 = vector.extract_strided_slice %93 {offsets = [16, 0], sizes = [8, 32], strides = [1, 1]} : vector<32x32xf32> to vector<8x32xf32>
    %cst_76 = arith.constant dense<0.000000e+00> : vector<10x32xf32>
    %156 = tpu.matmul %154, %155, %cst_76 {dimension_numbers = #tpu.dot_dimension_numbers<[1], [0], [0], [1], [0, 0, 1, 1], [], []>} : vector<10x8xf32>, vector<8x32xf32>, vector<10x32xf32> -> vector<10x32xf32>
    %157 = arith.addf %136, %156 : vector<10x32xf32>
    %158 = vector.extract_strided_slice %77 {offsets = [0, 24], sizes = [10, 8], strides = [1, 1]} : vector<10x32xf32> to vector<10x8xf32>
    %159 = vector.extract_strided_slice %84 {offsets = [0, 24], sizes = [10, 8], strides = [1, 1]} : vector<10x32xf32> to vector<10x8xf32>
    %160 = vector.extract_strided_slice %91 {offsets = [0, 24], sizes = [10, 8], strides = [1, 1]} : vector<10x32xf32> to vector<10x8xf32>
    %cst_77 = arith.constant dense<0.000000e+00> : vector<10x10xf32>
    %161 = tpu.matmul %158, %159, %cst_77 {dimension_numbers = #tpu.dot_dimension_numbers<[1], [1], [0], [0], [0, 0, 1, 0], [], []>} : vector<10x8xf32>, vector<10x8xf32>, vector<10x10xf32> -> vector<10x10xf32>
    %cst_78 = arith.constant 0.353553385 : f32
    %162 = vector.broadcast %cst_78 : f32 to vector<10x10xf32>
    %163 = arith.mulf %161, %162 : vector<10x10xf32>
    %164 = arith.addf %163, %44 : vector<10x10xf32>
    %cst_79 = arith.constant dense<0xFF800000> : vector<10xf32>
    %165 = vector.multi_reduction <maximumf>, %164, %cst_79 [1] : vector<10x10xf32> to vector<10xf32>
    %166 = vector.shape_cast %165 : vector<10xf32> to vector<10x1xf32>
    %167 = vector.broadcast %166 : vector<10x1xf32> to vector<10x10xf32>
    %168 = arith.subf %164, %167 : vector<10x10xf32>
    %169 = math.exp %168 : vector<10x10xf32>
    %cst_80 = arith.constant dense<0.000000e+00> : vector<10xf32>
    %170 = vector.multi_reduction <add>, %169, %cst_80 [1] : vector<10x10xf32> to vector<10xf32>
    %171 = vector.shape_cast %170 : vector<10xf32> to vector<10x1xf32>
    %172 = tpu.reciprocal %171 {approx = true} : vector<10x1xf32> -> vector<10x1xf32>
    %173 = vector.broadcast %172 : vector<10x1xf32> to vector<10x10xf32>
    %174 = arith.mulf %169, %173 : vector<10x10xf32>
    %cst_81 = arith.constant dense<0.000000e+00> : vector<10x8xf32>
    %175 = tpu.matmul %174, %160, %cst_81 {dimension_numbers = #tpu.dot_dimension_numbers<[1], [0], [0], [1], [0, 0, 1, 1], [], []>} : vector<10x10xf32>, vector<10x8xf32>, vector<10x8xf32> -> vector<10x8xf32>
    %176 = vector.extract_strided_slice %93 {offsets = [24, 0], sizes = [8, 32], strides = [1, 1]} : vector<32x32xf32> to vector<8x32xf32>
    %cst_82 = arith.constant dense<0.000000e+00> : vector<10x32xf32>
    %177 = tpu.matmul %175, %176, %cst_82 {dimension_numbers = #tpu.dot_dimension_numbers<[1], [0], [0], [1], [0, 0, 1, 1], [], []>} : vector<10x8xf32>, vector<8x32xf32>, vector<10x32xf32> -> vector<10x32xf32>
    %178 = arith.addf %157, %177 : vector<10x32xf32>
    %179 = arith.addf %16, %178 : vector<10x32xf32>
    %c0_83 = arith.constant 0 : index
    %c0_84 = arith.constant 0 : index
    %c0_85 = arith.constant 0 : index
    %180 = vector.load %arg15[%c0_83, %c0_84, %c0_85] : memref<2x1x32xf32, #tpu.memory_space<vmem>>, vector<1x1x32xf32>
    %181 = vector.shape_cast %180 : vector<1x1x32xf32> to vector<1x32xf32>
    %182 = vector.broadcast %181 : vector<1x32xf32> to vector<10x32xf32>
    %183 = arith.addf %179, %182 : vector<10x32xf32>
    %c0_86 = arith.constant 0 : index
    %c0_87 = arith.constant 0 : index
    %c0_88 = arith.constant 0 : index
    %184 = vector.load %arg16[%c0_86, %c0_87, %c0_88] : memref<2x1x32xf32, #tpu.memory_space<vmem>>, vector<1x1x32xf32>
    %185 = vector.shape_cast %184 : vector<1x1x32xf32> to vector<1x32xf32>
    %c0_89 = arith.constant 0 : index
    %c0_90 = arith.constant 0 : index
    %c0_91 = arith.constant 0 : index
    %186 = vector.load %arg17[%c0_89, %c0_90, %c0_91] : memref<2x1x32xf32, #tpu.memory_space<vmem>>, vector<1x1x32xf32>
    %187 = vector.shape_cast %186 : vector<1x1x32xf32> to vector<1x32xf32>
    %cst_92 = arith.constant dense<0.000000e+00> : vector<10xf32>
    %188 = vector.multi_reduction <add>, %183, %cst_92 [1] : vector<10x32xf32> to vector<10xf32>
    %189 = vector.shape_cast %188 : vector<10xf32> to vector<10x1xf32>
    %cst_93 = arith.constant 3.200000e+01 : f32
    %190 = vector.broadcast %cst_93 : f32 to vector<10x1xf32>
    %191 = arith.divf %189, %190 : vector<10x1xf32>
    %192 = vector.broadcast %191 : vector<10x1xf32> to vector<10x32xf32>
    %193 = arith.subf %183, %192 : vector<10x32xf32>
    %194 = arith.mulf %193, %193 : vector<10x32xf32>
    %cst_94 = arith.constant dense<0.000000e+00> : vector<10xf32>
    %195 = vector.multi_reduction <add>, %194, %cst_94 [1] : vector<10x32xf32> to vector<10xf32>
    %196 = vector.shape_cast %195 : vector<10xf32> to vector<10x1xf32>
    %cst_95 = arith.constant 3.200000e+01 : f32
    %197 = vector.broadcast %cst_95 : f32 to vector<10x1xf32>
    %198 = arith.divf %196, %197 : vector<10x1xf32>
    %199 = vector.broadcast %191 : vector<10x1xf32> to vector<10x32xf32>
    %200 = arith.subf %183, %199 : vector<10x32xf32>
    %cst_96 = arith.constant 9.99999997E-7 : f32
    %201 = vector.broadcast %cst_96 : f32 to vector<10x1xf32>
    %202 = arith.addf %198, %201 : vector<10x1xf32>
    %203 = math.rsqrt %202 : vector<10x1xf32>
    %204 = vector.broadcast %203 : vector<10x1xf32> to vector<10x32xf32>
    %205 = arith.mulf %200, %204 : vector<10x32xf32>
    %206 = vector.broadcast %185 : vector<1x32xf32> to vector<10x32xf32>
    %207 = arith.mulf %205, %206 : vector<10x32xf32>
    %208 = vector.broadcast %187 : vector<1x32xf32> to vector<10x32xf32>
    %209 = arith.addf %207, %208 : vector<10x32xf32>
    %c0_97 = arith.constant 0 : index
    %c0_98 = arith.constant 0 : index
    %c0_99 = arith.constant 0 : index
    %210 = vector.load %arg18[%c0_97, %c0_98, %c0_99] : memref<2x32x128xf32, #tpu.memory_space<vmem>>, vector<1x32x128xf32>
    %211 = vector.shape_cast %210 : vector<1x32x128xf32> to vector<32x128xf32>
    %cst_100 = arith.constant dense<0.000000e+00> : vector<10x128xf32>
    %212 = tpu.matmul %209, %211, %cst_100 {dimension_numbers = #tpu.dot_dimension_numbers<[1], [0], [0], [1], [0, 0, 1, 1], [], []>} : vector<10x32xf32>, vector<32x128xf32>, vector<10x128xf32> -> vector<10x128xf32>
    %c0_101 = arith.constant 0 : index
    %c0_102 = arith.constant 0 : index
    %c0_103 = arith.constant 0 : index
    %213 = vector.load %arg19[%c0_101, %c0_102, %c0_103] : memref<2x1x128xf32, #tpu.memory_space<vmem>>, vector<1x1x128xf32>
    %214 = vector.shape_cast %213 : vector<1x1x128xf32> to vector<1x128xf32>
    %215 = vector.broadcast %214 : vector<1x128xf32> to vector<10x128xf32>
    %216 = arith.addf %212, %215 : vector<10x128xf32>
    %cst_104 = arith.constant 5.000000e-01 : f32
    %217 = vector.broadcast %cst_104 : f32 to vector<10x128xf32>
    %218 = arith.mulf %217, %216 : vector<10x128xf32>
    %cst_105 = arith.constant 4.471500e-02 : f32
    %219 = vector.broadcast %cst_105 : f32 to vector<10x128xf32>
    %220 = arith.mulf %219, %216 : vector<10x128xf32>
    %221 = arith.mulf %220, %216 : vector<10x128xf32>
    %222 = arith.mulf %221, %216 : vector<10x128xf32>
    %223 = arith.addf %216, %222 : vector<10x128xf32>
    %cst_106 = arith.constant 0.797884583 : f32
    %224 = vector.broadcast %cst_106 : f32 to vector<10x128xf32>
    %225 = arith.mulf %224, %223 : vector<10x128xf32>
    %226 = math.tanh %225 : vector<10x128xf32>
    %cst_107 = arith.constant 1.000000e+00 : f32
    %227 = vector.broadcast %cst_107 : f32 to vector<10x128xf32>
    %228 = arith.addf %227, %226 : vector<10x128xf32>
    %229 = arith.mulf %218, %228 : vector<10x128xf32>
    %c0_108 = arith.constant 0 : index
    %c0_109 = arith.constant 0 : index
    %c0_110 = arith.constant 0 : index
    %230 = vector.load %arg20[%c0_108, %c0_109, %c0_110] : memref<2x128x32xf32, #tpu.memory_space<vmem>>, vector<1x128x32xf32>
    %231 = vector.shape_cast %230 : vector<1x128x32xf32> to vector<128x32xf32>
    %cst_111 = arith.constant dense<0.000000e+00> : vector<10x32xf32>
    %232 = tpu.matmul %229, %231, %cst_111 {dimension_numbers = #tpu.dot_dimension_numbers<[1], [0], [0], [1], [0, 0, 1, 1], [], []>} : vector<10x128xf32>, vector<128x32xf32>, vector<10x32xf32> -> vector<10x32xf32>
    %c0_112 = arith.constant 0 : index
    %c0_113 = arith.constant 0 : index
    %c0_114 = arith.constant 0 : index
    %233 = vector.load %arg21[%c0_112, %c0_113, %c0_114] : memref<2x1x32xf32, #tpu.memory_space<vmem>>, vector<1x1x32xf32>
    %234 = vector.shape_cast %233 : vector<1x1x32xf32> to vector<1x32xf32>
    %235 = vector.broadcast %234 : vector<1x32xf32> to vector<10x32xf32>
    %236 = arith.addf %232, %235 : vector<10x32xf32>
    %237 = arith.addf %183, %236 : vector<10x32xf32>
    %c1_115 = arith.constant 1 : index
    %c0_116 = arith.constant 0 : index
    %c0_117 = arith.constant 0 : index
    %238 = vector.load %arg6[%c1_115, %c0_116, %c0_117] : memref<2x1x32xf32, #tpu.memory_space<vmem>>, vector<1x1x32xf32>
    %239 = vector.shape_cast %238 : vector<1x1x32xf32> to vector<1x32xf32>
    %c1_118 = arith.constant 1 : index
    %c0_119 = arith.constant 0 : index
    %c0_120 = arith.constant 0 : index
    %240 = vector.load %arg7[%c1_118, %c0_119, %c0_120] : memref<2x1x32xf32, #tpu.memory_space<vmem>>, vector<1x1x32xf32>
    %241 = vector.shape_cast %240 : vector<1x1x32xf32> to vector<1x32xf32>
    %cst_121 = arith.constant dense<0.000000e+00> : vector<10xf32>
    %242 = vector.multi_reduction <add>, %237, %cst_121 [1] : vector<10x32xf32> to vector<10xf32>
    %243 = vector.shape_cast %242 : vector<10xf32> to vector<10x1xf32>
    %cst_122 = arith.constant 3.200000e+01 : f32
    %244 = vector.broadcast %cst_122 : f32 to vector<10x1xf32>
    %245 = arith.divf %243, %244 : vector<10x1xf32>
    %246 = vector.broadcast %245 : vector<10x1xf32> to vector<10x32xf32>
    %247 = arith.subf %237, %246 : vector<10x32xf32>
    %248 = arith.mulf %247, %247 : vector<10x32xf32>
    %cst_123 = arith.constant dense<0.000000e+00> : vector<10xf32>
    %249 = vector.multi_reduction <add>, %248, %cst_123 [1] : vector<10x32xf32> to vector<10xf32>
    %250 = vector.shape_cast %249 : vector<10xf32> to vector<10x1xf32>
    %cst_124 = arith.constant 3.200000e+01 : f32
    %251 = vector.broadcast %cst_124 : f32 to vector<10x1xf32>
    %252 = arith.divf %250, %251 : vector<10x1xf32>
    %253 = vector.broadcast %245 : vector<10x1xf32> to vector<10x32xf32>
    %254 = arith.subf %237, %253 : vector<10x32xf32>
    %cst_125 = arith.constant 9.99999997E-7 : f32
    %255 = vector.broadcast %cst_125 : f32 to vector<10x1xf32>
    %256 = arith.addf %252, %255 : vector<10x1xf32>
    %257 = math.rsqrt %256 : vector<10x1xf32>
    %258 = vector.broadcast %257 : vector<10x1xf32> to vector<10x32xf32>
    %259 = arith.mulf %254, %258 : vector<10x32xf32>
    %260 = vector.broadcast %239 : vector<1x32xf32> to vector<10x32xf32>
    %261 = arith.mulf %259, %260 : vector<10x32xf32>
    %262 = vector.broadcast %241 : vector<1x32xf32> to vector<10x32xf32>
    %263 = arith.addf %261, %262 : vector<10x32xf32>
    %c1_126 = arith.constant 1 : index
    %c0_127 = arith.constant 0 : index
    %c0_128 = arith.constant 0 : index
    %264 = vector.load %arg8[%c1_126, %c0_127, %c0_128] : memref<2x32x32xf32, #tpu.memory_space<vmem>>, vector<1x32x32xf32>
    %265 = vector.shape_cast %264 : vector<1x32x32xf32> to vector<32x32xf32>
    %cst_129 = arith.constant dense<0.000000e+00> : vector<10x32xf32>
    %266 = tpu.matmul %263, %265, %cst_129 {dimension_numbers = #tpu.dot_dimension_numbers<[1], [0], [0], [1], [0, 0, 1, 1], [], []>} : vector<10x32xf32>, vector<32x32xf32>, vector<10x32xf32> -> vector<10x32xf32>
    %c1_130 = arith.constant 1 : index
    %c0_131 = arith.constant 0 : index
    %c0_132 = arith.constant 0 : index
    %267 = vector.load %arg9[%c1_130, %c0_131, %c0_132] : memref<2x1x32xf32, #tpu.memory_space<vmem>>, vector<1x1x32xf32>
    %268 = vector.shape_cast %267 : vector<1x1x32xf32> to vector<1x32xf32>
    %269 = vector.broadcast %268 : vector<1x32xf32> to vector<10x32xf32>
    %270 = arith.addf %266, %269 : vector<10x32xf32>
    %c1_133 = arith.constant 1 : index
    %c0_134 = arith.constant 0 : index
    %c0_135 = arith.constant 0 : index
    %271 = vector.load %arg10[%c1_133, %c0_134, %c0_135] : memref<2x32x32xf32, #tpu.memory_space<vmem>>, vector<1x32x32xf32>
    %272 = vector.shape_cast %271 : vector<1x32x32xf32> to vector<32x32xf32>
    %cst_136 = arith.constant dense<0.000000e+00> : vector<10x32xf32>
    %273 = tpu.matmul %263, %272, %cst_136 {dimension_numbers = #tpu.dot_dimension_numbers<[1], [0], [0], [1], [0, 0, 1, 1], [], []>} : vector<10x32xf32>, vector<32x32xf32>, vector<10x32xf32> -> vector<10x32xf32>
    %c1_137 = arith.constant 1 : index
    %c0_138 = arith.constant 0 : index
    %c0_139 = arith.constant 0 : index
    %274 = vector.load %arg11[%c1_137, %c0_138, %c0_139] : memref<2x1x32xf32, #tpu.memory_space<vmem>>, vector<1x1x32xf32>
    %275 = vector.shape_cast %274 : vector<1x1x32xf32> to vector<1x32xf32>
    %276 = vector.broadcast %275 : vector<1x32xf32> to vector<10x32xf32>
    %277 = arith.addf %273, %276 : vector<10x32xf32>
    %c1_140 = arith.constant 1 : index
    %c0_141 = arith.constant 0 : index
    %c0_142 = arith.constant 0 : index
    %278 = vector.load %arg12[%c1_140, %c0_141, %c0_142] : memref<2x32x32xf32, #tpu.memory_space<vmem>>, vector<1x32x32xf32>
    %279 = vector.shape_cast %278 : vector<1x32x32xf32> to vector<32x32xf32>
    %cst_143 = arith.constant dense<0.000000e+00> : vector<10x32xf32>
    %280 = tpu.matmul %263, %279, %cst_143 {dimension_numbers = #tpu.dot_dimension_numbers<[1], [0], [0], [1], [0, 0, 1, 1], [], []>} : vector<10x32xf32>, vector<32x32xf32>, vector<10x32xf32> -> vector<10x32xf32>
    %c1_144 = arith.constant 1 : index
    %c0_145 = arith.constant 0 : index
    %c0_146 = arith.constant 0 : index
    %281 = vector.load %arg13[%c1_144, %c0_145, %c0_146] : memref<2x1x32xf32, #tpu.memory_space<vmem>>, vector<1x1x32xf32>
    %282 = vector.shape_cast %281 : vector<1x1x32xf32> to vector<1x32xf32>
    %283 = vector.broadcast %282 : vector<1x32xf32> to vector<10x32xf32>
    %284 = arith.addf %280, %283 : vector<10x32xf32>
    %c1_147 = arith.constant 1 : index
    %c0_148 = arith.constant 0 : index
    %c0_149 = arith.constant 0 : index
    %285 = vector.load %arg14[%c1_147, %c0_148, %c0_149] : memref<2x32x32xf32, #tpu.memory_space<vmem>>, vector<1x32x32xf32>
    %286 = vector.shape_cast %285 : vector<1x32x32xf32> to vector<32x32xf32>
    %cst_150 = arith.constant 0.000000e+00 : f32
    %287 = vector.broadcast %cst_150 : f32 to vector<10x32xf32>
    %288 = vector.extract_strided_slice %270 {offsets = [0, 0], sizes = [10, 8], strides = [1, 1]} : vector<10x32xf32> to vector<10x8xf32>
    %289 = vector.extract_strided_slice %277 {offsets = [0, 0], sizes = [10, 8], strides = [1, 1]} : vector<10x32xf32> to vector<10x8xf32>
    %290 = vector.extract_strided_slice %284 {offsets = [0, 0], sizes = [10, 8], strides = [1, 1]} : vector<10x32xf32> to vector<10x8xf32>
    %cst_151 = arith.constant dense<0.000000e+00> : vector<10x10xf32>
    %291 = tpu.matmul %288, %289, %cst_151 {dimension_numbers = #tpu.dot_dimension_numbers<[1], [1], [0], [0], [0, 0, 1, 0], [], []>} : vector<10x8xf32>, vector<10x8xf32>, vector<10x10xf32> -> vector<10x10xf32>
    %cst_152 = arith.constant 0.353553385 : f32
    %292 = vector.broadcast %cst_152 : f32 to vector<10x10xf32>
    %293 = arith.mulf %291, %292 : vector<10x10xf32>
    %294 = arith.addf %293, %44 : vector<10x10xf32>
    %cst_153 = arith.constant dense<0xFF800000> : vector<10xf32>
    %295 = vector.multi_reduction <maximumf>, %294, %cst_153 [1] : vector<10x10xf32> to vector<10xf32>
    %296 = vector.shape_cast %295 : vector<10xf32> to vector<10x1xf32>
    %297 = vector.broadcast %296 : vector<10x1xf32> to vector<10x10xf32>
    %298 = arith.subf %294, %297 : vector<10x10xf32>
    %299 = math.exp %298 : vector<10x10xf32>
    %cst_154 = arith.constant dense<0.000000e+00> : vector<10xf32>
    %300 = vector.multi_reduction <add>, %299, %cst_154 [1] : vector<10x10xf32> to vector<10xf32>
    %301 = vector.shape_cast %300 : vector<10xf32> to vector<10x1xf32>
    %302 = tpu.reciprocal %301 {approx = true} : vector<10x1xf32> -> vector<10x1xf32>
    %303 = vector.broadcast %302 : vector<10x1xf32> to vector<10x10xf32>
    %304 = arith.mulf %299, %303 : vector<10x10xf32>
    %cst_155 = arith.constant dense<0.000000e+00> : vector<10x8xf32>
    %305 = tpu.matmul %304, %290, %cst_155 {dimension_numbers = #tpu.dot_dimension_numbers<[1], [0], [0], [1], [0, 0, 1, 1], [], []>} : vector<10x10xf32>, vector<10x8xf32>, vector<10x8xf32> -> vector<10x8xf32>
    %306 = vector.extract_strided_slice %286 {offsets = [0, 0], sizes = [8, 32], strides = [1, 1]} : vector<32x32xf32> to vector<8x32xf32>
    %cst_156 = arith.constant dense<0.000000e+00> : vector<10x32xf32>
    %307 = tpu.matmul %305, %306, %cst_156 {dimension_numbers = #tpu.dot_dimension_numbers<[1], [0], [0], [1], [0, 0, 1, 1], [], []>} : vector<10x8xf32>, vector<8x32xf32>, vector<10x32xf32> -> vector<10x32xf32>
    %308 = arith.addf %287, %307 : vector<10x32xf32>
    %309 = vector.extract_strided_slice %270 {offsets = [0, 8], sizes = [10, 8], strides = [1, 1]} : vector<10x32xf32> to vector<10x8xf32>
    %310 = vector.extract_strided_slice %277 {offsets = [0, 8], sizes = [10, 8], strides = [1, 1]} : vector<10x32xf32> to vector<10x8xf32>
    %311 = vector.extract_strided_slice %284 {offsets = [0, 8], sizes = [10, 8], strides = [1, 1]} : vector<10x32xf32> to vector<10x8xf32>
    %cst_157 = arith.constant dense<0.000000e+00> : vector<10x10xf32>
    %312 = tpu.matmul %309, %310, %cst_157 {dimension_numbers = #tpu.dot_dimension_numbers<[1], [1], [0], [0], [0, 0, 1, 0], [], []>} : vector<10x8xf32>, vector<10x8xf32>, vector<10x10xf32> -> vector<10x10xf32>
    %cst_158 = arith.constant 0.353553385 : f32
    %313 = vector.broadcast %cst_158 : f32 to vector<10x10xf32>
    %314 = arith.mulf %312, %313 : vector<10x10xf32>
    %315 = arith.addf %314, %44 : vector<10x10xf32>
    %cst_159 = arith.constant dense<0xFF800000> : vector<10xf32>
    %316 = vector.multi_reduction <maximumf>, %315, %cst_159 [1] : vector<10x10xf32> to vector<10xf32>
    %317 = vector.shape_cast %316 : vector<10xf32> to vector<10x1xf32>
    %318 = vector.broadcast %317 : vector<10x1xf32> to vector<10x10xf32>
    %319 = arith.subf %315, %318 : vector<10x10xf32>
    %320 = math.exp %319 : vector<10x10xf32>
    %cst_160 = arith.constant dense<0.000000e+00> : vector<10xf32>
    %321 = vector.multi_reduction <add>, %320, %cst_160 [1] : vector<10x10xf32> to vector<10xf32>
    %322 = vector.shape_cast %321 : vector<10xf32> to vector<10x1xf32>
    %323 = tpu.reciprocal %322 {approx = true} : vector<10x1xf32> -> vector<10x1xf32>
    %324 = vector.broadcast %323 : vector<10x1xf32> to vector<10x10xf32>
    %325 = arith.mulf %320, %324 : vector<10x10xf32>
    %cst_161 = arith.constant dense<0.000000e+00> : vector<10x8xf32>
    %326 = tpu.matmul %325, %311, %cst_161 {dimension_numbers = #tpu.dot_dimension_numbers<[1], [0], [0], [1], [0, 0, 1, 1], [], []>} : vector<10x10xf32>, vector<10x8xf32>, vector<10x8xf32> -> vector<10x8xf32>
    %327 = vector.extract_strided_slice %286 {offsets = [8, 0], sizes = [8, 32], strides = [1, 1]} : vector<32x32xf32> to vector<8x32xf32>
    %cst_162 = arith.constant dense<0.000000e+00> : vector<10x32xf32>
    %328 = tpu.matmul %326, %327, %cst_162 {dimension_numbers = #tpu.dot_dimension_numbers<[1], [0], [0], [1], [0, 0, 1, 1], [], []>} : vector<10x8xf32>, vector<8x32xf32>, vector<10x32xf32> -> vector<10x32xf32>
    %329 = arith.addf %308, %328 : vector<10x32xf32>
    %330 = vector.extract_strided_slice %270 {offsets = [0, 16], sizes = [10, 8], strides = [1, 1]} : vector<10x32xf32> to vector<10x8xf32>
    %331 = vector.extract_strided_slice %277 {offsets = [0, 16], sizes = [10, 8], strides = [1, 1]} : vector<10x32xf32> to vector<10x8xf32>
    %332 = vector.extract_strided_slice %284 {offsets = [0, 16], sizes = [10, 8], strides = [1, 1]} : vector<10x32xf32> to vector<10x8xf32>
    %cst_163 = arith.constant dense<0.000000e+00> : vector<10x10xf32>
    %333 = tpu.matmul %330, %331, %cst_163 {dimension_numbers = #tpu.dot_dimension_numbers<[1], [1], [0], [0], [0, 0, 1, 0], [], []>} : vector<10x8xf32>, vector<10x8xf32>, vector<10x10xf32> -> vector<10x10xf32>
    %cst_164 = arith.constant 0.353553385 : f32
    %334 = vector.broadcast %cst_164 : f32 to vector<10x10xf32>
    %335 = arith.mulf %333, %334 : vector<10x10xf32>
    %336 = arith.addf %335, %44 : vector<10x10xf32>
    %cst_165 = arith.constant dense<0xFF800000> : vector<10xf32>
    %337 = vector.multi_reduction <maximumf>, %336, %cst_165 [1] : vector<10x10xf32> to vector<10xf32>
    %338 = vector.shape_cast %337 : vector<10xf32> to vector<10x1xf32>
    %339 = vector.broadcast %338 : vector<10x1xf32> to vector<10x10xf32>
    %340 = arith.subf %336, %339 : vector<10x10xf32>
    %341 = math.exp %340 : vector<10x10xf32>
    %cst_166 = arith.constant dense<0.000000e+00> : vector<10xf32>
    %342 = vector.multi_reduction <add>, %341, %cst_166 [1] : vector<10x10xf32> to vector<10xf32>
    %343 = vector.shape_cast %342 : vector<10xf32> to vector<10x1xf32>
    %344 = tpu.reciprocal %343 {approx = true} : vector<10x1xf32> -> vector<10x1xf32>
    %345 = vector.broadcast %344 : vector<10x1xf32> to vector<10x10xf32>
    %346 = arith.mulf %341, %345 : vector<10x10xf32>
    %cst_167 = arith.constant dense<0.000000e+00> : vector<10x8xf32>
    %347 = tpu.matmul %346, %332, %cst_167 {dimension_numbers = #tpu.dot_dimension_numbers<[1], [0], [0], [1], [0, 0, 1, 1], [], []>} : vector<10x10xf32>, vector<10x8xf32>, vector<10x8xf32> -> vector<10x8xf32>
    %348 = vector.extract_strided_slice %286 {offsets = [16, 0], sizes = [8, 32], strides = [1, 1]} : vector<32x32xf32> to vector<8x32xf32>
    %cst_168 = arith.constant dense<0.000000e+00> : vector<10x32xf32>
    %349 = tpu.matmul %347, %348, %cst_168 {dimension_numbers = #tpu.dot_dimension_numbers<[1], [0], [0], [1], [0, 0, 1, 1], [], []>} : vector<10x8xf32>, vector<8x32xf32>, vector<10x32xf32> -> vector<10x32xf32>
    %350 = arith.addf %329, %349 : vector<10x32xf32>
    %351 = vector.extract_strided_slice %270 {offsets = [0, 24], sizes = [10, 8], strides = [1, 1]} : vector<10x32xf32> to vector<10x8xf32>
    %352 = vector.extract_strided_slice %277 {offsets = [0, 24], sizes = [10, 8], strides = [1, 1]} : vector<10x32xf32> to vector<10x8xf32>
    %353 = vector.extract_strided_slice %284 {offsets = [0, 24], sizes = [10, 8], strides = [1, 1]} : vector<10x32xf32> to vector<10x8xf32>
    %cst_169 = arith.constant dense<0.000000e+00> : vector<10x10xf32>
    %354 = tpu.matmul %351, %352, %cst_169 {dimension_numbers = #tpu.dot_dimension_numbers<[1], [1], [0], [0], [0, 0, 1, 0], [], []>} : vector<10x8xf32>, vector<10x8xf32>, vector<10x10xf32> -> vector<10x10xf32>
    %cst_170 = arith.constant 0.353553385 : f32
    %355 = vector.broadcast %cst_170 : f32 to vector<10x10xf32>
    %356 = arith.mulf %354, %355 : vector<10x10xf32>
    %357 = arith.addf %356, %44 : vector<10x10xf32>
    %cst_171 = arith.constant dense<0xFF800000> : vector<10xf32>
    %358 = vector.multi_reduction <maximumf>, %357, %cst_171 [1] : vector<10x10xf32> to vector<10xf32>
    %359 = vector.shape_cast %358 : vector<10xf32> to vector<10x1xf32>
    %360 = vector.broadcast %359 : vector<10x1xf32> to vector<10x10xf32>
    %361 = arith.subf %357, %360 : vector<10x10xf32>
    %362 = math.exp %361 : vector<10x10xf32>
    %cst_172 = arith.constant dense<0.000000e+00> : vector<10xf32>
    %363 = vector.multi_reduction <add>, %362, %cst_172 [1] : vector<10x10xf32> to vector<10xf32>
    %364 = vector.shape_cast %363 : vector<10xf32> to vector<10x1xf32>
    %365 = tpu.reciprocal %364 {approx = true} : vector<10x1xf32> -> vector<10x1xf32>
    %366 = vector.broadcast %365 : vector<10x1xf32> to vector<10x10xf32>
    %367 = arith.mulf %362, %366 : vector<10x10xf32>
    %cst_173 = arith.constant dense<0.000000e+00> : vector<10x8xf32>
    %368 = tpu.matmul %367, %353, %cst_173 {dimension_numbers = #tpu.dot_dimension_numbers<[1], [0], [0], [1], [0, 0, 1, 1], [], []>} : vector<10x10xf32>, vector<10x8xf32>, vector<10x8xf32> -> vector<10x8xf32>
    %369 = vector.extract_strided_slice %286 {offsets = [24, 0], sizes = [8, 32], strides = [1, 1]} : vector<32x32xf32> to vector<8x32xf32>
    %cst_174 = arith.constant dense<0.000000e+00> : vector<10x32xf32>
    %370 = tpu.matmul %368, %369, %cst_174 {dimension_numbers = #tpu.dot_dimension_numbers<[1], [0], [0], [1], [0, 0, 1, 1], [], []>} : vector<10x8xf32>, vector<8x32xf32>, vector<10x32xf32> -> vector<10x32xf32>
    %371 = arith.addf %350, %370 : vector<10x32xf32>
    %372 = arith.addf %237, %371 : vector<10x32xf32>
    %c1_175 = arith.constant 1 : index
    %c0_176 = arith.constant 0 : index
    %c0_177 = arith.constant 0 : index
    %373 = vector.load %arg15[%c1_175, %c0_176, %c0_177] : memref<2x1x32xf32, #tpu.memory_space<vmem>>, vector<1x1x32xf32>
    %374 = vector.shape_cast %373 : vector<1x1x32xf32> to vector<1x32xf32>
    %375 = vector.broadcast %374 : vector<1x32xf32> to vector<10x32xf32>
    %376 = arith.addf %372, %375 : vector<10x32xf32>
    %c1_178 = arith.constant 1 : index
    %c0_179 = arith.constant 0 : index
    %c0_180 = arith.constant 0 : index
    %377 = vector.load %arg16[%c1_178, %c0_179, %c0_180] : memref<2x1x32xf32, #tpu.memory_space<vmem>>, vector<1x1x32xf32>
    %378 = vector.shape_cast %377 : vector<1x1x32xf32> to vector<1x32xf32>
    %c1_181 = arith.constant 1 : index
    %c0_182 = arith.constant 0 : index
    %c0_183 = arith.constant 0 : index
    %379 = vector.load %arg17[%c1_181, %c0_182, %c0_183] : memref<2x1x32xf32, #tpu.memory_space<vmem>>, vector<1x1x32xf32>
    %380 = vector.shape_cast %379 : vector<1x1x32xf32> to vector<1x32xf32>
    %cst_184 = arith.constant dense<0.000000e+00> : vector<10xf32>
    %381 = vector.multi_reduction <add>, %376, %cst_184 [1] : vector<10x32xf32> to vector<10xf32>
    %382 = vector.shape_cast %381 : vector<10xf32> to vector<10x1xf32>
    %cst_185 = arith.constant 3.200000e+01 : f32
    %383 = vector.broadcast %cst_185 : f32 to vector<10x1xf32>
    %384 = arith.divf %382, %383 : vector<10x1xf32>
    %385 = vector.broadcast %384 : vector<10x1xf32> to vector<10x32xf32>
    %386 = arith.subf %376, %385 : vector<10x32xf32>
    %387 = arith.mulf %386, %386 : vector<10x32xf32>
    %cst_186 = arith.constant dense<0.000000e+00> : vector<10xf32>
    %388 = vector.multi_reduction <add>, %387, %cst_186 [1] : vector<10x32xf32> to vector<10xf32>
    %389 = vector.shape_cast %388 : vector<10xf32> to vector<10x1xf32>
    %cst_187 = arith.constant 3.200000e+01 : f32
    %390 = vector.broadcast %cst_187 : f32 to vector<10x1xf32>
    %391 = arith.divf %389, %390 : vector<10x1xf32>
    %392 = vector.broadcast %384 : vector<10x1xf32> to vector<10x32xf32>
    %393 = arith.subf %376, %392 : vector<10x32xf32>
    %cst_188 = arith.constant 9.99999997E-7 : f32
    %394 = vector.broadcast %cst_188 : f32 to vector<10x1xf32>
    %395 = arith.addf %391, %394 : vector<10x1xf32>
    %396 = math.rsqrt %395 : vector<10x1xf32>
    %397 = vector.broadcast %396 : vector<10x1xf32> to vector<10x32xf32>
    %398 = arith.mulf %393, %397 : vector<10x32xf32>
    %399 = vector.broadcast %378 : vector<1x32xf32> to vector<10x32xf32>
    %400 = arith.mulf %398, %399 : vector<10x32xf32>
    %401 = vector.broadcast %380 : vector<1x32xf32> to vector<10x32xf32>
    %402 = arith.addf %400, %401 : vector<10x32xf32>
    %c1_189 = arith.constant 1 : index
    %c0_190 = arith.constant 0 : index
    %c0_191 = arith.constant 0 : index
    %403 = vector.load %arg18[%c1_189, %c0_190, %c0_191] : memref<2x32x128xf32, #tpu.memory_space<vmem>>, vector<1x32x128xf32>
    %404 = vector.shape_cast %403 : vector<1x32x128xf32> to vector<32x128xf32>
    %cst_192 = arith.constant dense<0.000000e+00> : vector<10x128xf32>
    %405 = tpu.matmul %402, %404, %cst_192 {dimension_numbers = #tpu.dot_dimension_numbers<[1], [0], [0], [1], [0, 0, 1, 1], [], []>} : vector<10x32xf32>, vector<32x128xf32>, vector<10x128xf32> -> vector<10x128xf32>
    %c1_193 = arith.constant 1 : index
    %c0_194 = arith.constant 0 : index
    %c0_195 = arith.constant 0 : index
    %406 = vector.load %arg19[%c1_193, %c0_194, %c0_195] : memref<2x1x128xf32, #tpu.memory_space<vmem>>, vector<1x1x128xf32>
    %407 = vector.shape_cast %406 : vector<1x1x128xf32> to vector<1x128xf32>
    %408 = vector.broadcast %407 : vector<1x128xf32> to vector<10x128xf32>
    %409 = arith.addf %405, %408 : vector<10x128xf32>
    %cst_196 = arith.constant 5.000000e-01 : f32
    %410 = vector.broadcast %cst_196 : f32 to vector<10x128xf32>
    %411 = arith.mulf %410, %409 : vector<10x128xf32>
    %cst_197 = arith.constant 4.471500e-02 : f32
    %412 = vector.broadcast %cst_197 : f32 to vector<10x128xf32>
    %413 = arith.mulf %412, %409 : vector<10x128xf32>
    %414 = arith.mulf %413, %409 : vector<10x128xf32>
    %415 = arith.mulf %414, %409 : vector<10x128xf32>
    %416 = arith.addf %409, %415 : vector<10x128xf32>
    %cst_198 = arith.constant 0.797884583 : f32
    %417 = vector.broadcast %cst_198 : f32 to vector<10x128xf32>
    %418 = arith.mulf %417, %416 : vector<10x128xf32>
    %419 = math.tanh %418 : vector<10x128xf32>
    %cst_199 = arith.constant 1.000000e+00 : f32
    %420 = vector.broadcast %cst_199 : f32 to vector<10x128xf32>
    %421 = arith.addf %420, %419 : vector<10x128xf32>
    %422 = arith.mulf %411, %421 : vector<10x128xf32>
    %c1_200 = arith.constant 1 : index
    %c0_201 = arith.constant 0 : index
    %c0_202 = arith.constant 0 : index
    %423 = vector.load %arg20[%c1_200, %c0_201, %c0_202] : memref<2x128x32xf32, #tpu.memory_space<vmem>>, vector<1x128x32xf32>
    %424 = vector.shape_cast %423 : vector<1x128x32xf32> to vector<128x32xf32>
    %cst_203 = arith.constant dense<0.000000e+00> : vector<10x32xf32>
    %425 = tpu.matmul %422, %424, %cst_203 {dimension_numbers = #tpu.dot_dimension_numbers<[1], [0], [0], [1], [0, 0, 1, 1], [], []>} : vector<10x128xf32>, vector<128x32xf32>, vector<10x32xf32> -> vector<10x32xf32>
    %c1_204 = arith.constant 1 : index
    %c0_205 = arith.constant 0 : index
    %c0_206 = arith.constant 0 : index
    %426 = vector.load %arg21[%c1_204, %c0_205, %c0_206] : memref<2x1x32xf32, #tpu.memory_space<vmem>>, vector<1x1x32xf32>
    %427 = vector.shape_cast %426 : vector<1x1x32xf32> to vector<1x32xf32>
    %428 = vector.broadcast %427 : vector<1x32xf32> to vector<10x32xf32>
    %429 = arith.addf %425, %428 : vector<10x32xf32>
    %430 = arith.addf %376, %429 : vector<10x32xf32>
    %c0_207 = arith.constant 0 : index
    %c0_208 = arith.constant 0 : index
    %431 = vector.load %arg22[%c0_207, %c0_208] : memref<1x32xf32, #tpu.memory_space<vmem>>, vector<1x32xf32>
    %c0_209 = arith.constant 0 : index
    %c0_210 = arith.constant 0 : index
    %432 = vector.load %arg23[%c0_209, %c0_210] : memref<1x32xf32, #tpu.memory_space<vmem>>, vector<1x32xf32>
    %cst_211 = arith.constant dense<0.000000e+00> : vector<10xf32>
    %433 = vector.multi_reduction <add>, %430, %cst_211 [1] : vector<10x32xf32> to vector<10xf32>
    %434 = vector.shape_cast %433 : vector<10xf32> to vector<10x1xf32>
    %cst_212 = arith.constant 3.200000e+01 : f32
    %435 = vector.broadcast %cst_212 : f32 to vector<10x1xf32>
    %436 = arith.divf %434, %435 : vector<10x1xf32>
    %437 = vector.broadcast %436 : vector<10x1xf32> to vector<10x32xf32>
    %438 = arith.subf %430, %437 : vector<10x32xf32>
    %439 = arith.mulf %438, %438 : vector<10x32xf32>
    %cst_213 = arith.constant dense<0.000000e+00> : vector<10xf32>
    %440 = vector.multi_reduction <add>, %439, %cst_213 [1] : vector<10x32xf32> to vector<10xf32>
    %441 = vector.shape_cast %440 : vector<10xf32> to vector<10x1xf32>
    %cst_214 = arith.constant 3.200000e+01 : f32
    %442 = vector.broadcast %cst_214 : f32 to vector<10x1xf32>
    %443 = arith.divf %441, %442 : vector<10x1xf32>
    %444 = vector.broadcast %436 : vector<10x1xf32> to vector<10x32xf32>
    %445 = arith.subf %430, %444 : vector<10x32xf32>
    %cst_215 = arith.constant 9.99999997E-7 : f32
    %446 = vector.broadcast %cst_215 : f32 to vector<10x1xf32>
    %447 = arith.addf %443, %446 : vector<10x1xf32>
    %448 = math.rsqrt %447 : vector<10x1xf32>
    %449 = vector.broadcast %448 : vector<10x1xf32> to vector<10x32xf32>
    %450 = arith.mulf %445, %449 : vector<10x32xf32>
    %451 = vector.broadcast %431 : vector<1x32xf32> to vector<10x32xf32>
    %452 = arith.mulf %450, %451 : vector<10x32xf32>
    %453 = vector.broadcast %432 : vector<1x32xf32> to vector<10x32xf32>
    %454 = arith.addf %452, %453 : vector<10x32xf32>
    %c0_216 = arith.constant 0 : index
    %c0_217 = arith.constant 0 : index
    %455 = vector.load %arg24[%c0_216, %c0_217] : memref<32x128xf32, #tpu.memory_space<vmem>>, vector<32x128xf32>
    %cst_218 = arith.constant dense<0.000000e+00> : vector<10x128xf32>
    %456 = tpu.matmul %454, %455, %cst_218 {dimension_numbers = #tpu.dot_dimension_numbers<[1], [0], [0], [1], [0, 0, 1, 1], [], []>} : vector<10x32xf32>, vector<32x128xf32>, vector<10x128xf32> -> vector<10x128xf32>
    %c0_219 = arith.constant 0 : index
    %c0_220 = arith.constant 0 : index
    %457 = vector.load %arg25[%c0_219, %c0_220] : memref<1x128xf32, #tpu.memory_space<vmem>>, vector<1x128xf32>
    %458 = vector.broadcast %457 : vector<1x128xf32> to vector<10x128xf32>
    %459 = arith.addf %456, %458 : vector<10x128xf32>
    %460 = vector.extract_strided_slice %459 {offsets = [0, 0], sizes = [1, 128], strides = [1, 1]} : vector<10x128xf32> to vector<1x128xf32>
    %c0_221 = arith.constant 0 : index
    %c0_222 = arith.constant 0 : index
    %461 = vector.load %arg26[%c0_221, %c0_222] : memref<2x128xf32, #tpu.memory_space<vmem>>, vector<1x128xf32>
    tpu.vector_store %arg26[%c0_221, %c0_222], %460 {strides = array<i32>} : memref<2x128xf32, #tpu.memory_space<vmem>>, vector<1x128xf32>,
    %462 = vector.extract_strided_slice %459 {offsets = [5, 0], sizes = [1, 128], strides = [1, 1]} : vector<10x128xf32> to vector<1x128xf32>
    %c1_223 = arith.constant 1 : index
    %c0_224 = arith.constant 0 : index
    %463 = vector.load %arg26[%c1_223, %c0_224] : memref<2x128xf32, #tpu.memory_space<vmem>>, vector<1x128xf32>
    tpu.vector_store %arg26[%c1_223, %c0_224], %462 {strides = array<i32>} : memref<2x128xf32, #tpu.memory_space<vmem>>, vector<1x128xf32>,
    return
  }
  func.func @transform_0(%arg0: i32) -> (i32, i32) {
    %c0_i32 = arith.constant 0 : i32
    %c0_i32_0 = arith.constant 0 : i32
    %c0_i32_1 = arith.constant 0 : i32
    return %c0_i32, %c0_i32_0 : i32, i32
  }
  func.func @transform_1(%arg0: i32) -> (i32, i32) {
    %c0_i32 = arith.constant 0 : i32
    %c0_i32_0 = arith.constant 0 : i32
    %c0_i32_1 = arith.constant 0 : i32
    return %c0_i32, %c0_i32_0 : i32, i32
  }
  func.func @transform_2(%arg0: i32) -> (i32, i32) {
    %c0_i32 = arith.constant 0 : i32
    %c0_i32_0 = arith.constant 0 : i32
    %c0_i32_1 = arith.constant 0 : i32
    return %c0_i32, %c0_i32_0 : i32, i32
  }
  func.func @transform_3(%arg0: i32) -> (i32, i32) {
    %c0_i32 = arith.constant 0 : i32
    %c0_i32_0 = arith.constant 0 : i32
    %c0_i32_1 = arith.constant 0 : i32
    return %c0_i32, %c0_i32_0 : i32, i32
  }
  func.func @transform_4(%arg0: i32) -> (i32, i32) {
    %c0_i32 = arith.constant 0 : i32
    %c0_i32_0 = arith.constant 0 : i32
    %c0_i32_1 = arith.constant 0 : i32
    return %c0_i32, %c0_i32_0 : i32, i32
  }
  func.func @transform_5(%arg0: i32) -> (i32, i32, i32) {
    %c0_i32 = arith.constant 0 : i32
    %c0_i32_0 = arith.constant 0 : i32
    %c0_i32_1 = arith.constant 0 : i32
    %c0_i32_2 = arith.constant 0 : i32
    return %c0_i32, %c0_i32_0, %c0_i32_1 : i32, i32, i32
  }
  func.func @transform_6(%arg0: i32) -> (i32, i32, i32) {
    %c0_i32 = arith.constant 0 : i32
    %c0_i32_0 = arith.constant 0 : i32
    %c0_i32_1 = arith.constant 0 : i32
    %c0_i32_2 = arith.constant 0 : i32
    return %c0_i32, %c0_i32_0, %c0_i32_1 : i32, i32, i32
  }
  func.func @transform_7(%arg0: i32) -> (i32, i32, i32) {
    %c0_i32 = arith.constant 0 : i32
    %c0_i32_0 = arith.constant 0 : i32
    %c0_i32_1 = arith.constant 0 : i32
    %c0_i32_2 = arith.constant 0 : i32
    return %c0_i32, %c0_i32_0, %c0_i32_1 : i32, i32, i32
  }
  func.func @transform_8(%arg0: i32) -> (i32, i32, i32) {
    %c0_i32 = arith.constant 0 : i32
    %c0_i32_0 = arith.constant 0 : i32
    %c0_i32_1 = arith.constant 0 : i32
    %c0_i32_2 = arith.constant 0 : i32
    return %c0_i32, %c0_i32_0, %c0_i32_1 : i32, i32, i32
  }
  func.func @transform_9(%arg0: i32) -> (i32, i32, i32) {
    %c0_i32 = arith.constant 0 : i32
    %c0_i32_0 = arith.constant 0 : i32
    %c0_i32_1 = arith.constant 0 : i32
    %c0_i32_2 = arith.constant 0 : i32
    return %c0_i32, %c0_i32_0, %c0_i32_1 : i32, i32, i32
  }
  func.func @transform_10(%arg0: i32) -> (i32, i32, i32) {
    %c0_i32 = arith.constant 0 : i32
    %c0_i32_0 = arith.constant 0 : i32
    %c0_i32_1 = arith.constant 0 : i32
    %c0_i32_2 = arith.constant 0 : i32
    return %c0_i32, %c0_i32_0, %c0_i32_1 : i32, i32, i32
  }
  func.func @transform_11(%arg0: i32) -> (i32, i32, i32) {
    %c0_i32 = arith.constant 0 : i32
    %c0_i32_0 = arith.constant 0 : i32
    %c0_i32_1 = arith.constant 0 : i32
    %c0_i32_2 = arith.constant 0 : i32
    return %c0_i32, %c0_i32_0, %c0_i32_1 : i32, i32, i32
  }
  func.func @transform_12(%arg0: i32) -> (i32, i32, i32) {
    %c0_i32 = arith.constant 0 : i32
    %c0_i32_0 = arith.constant 0 : i32
    %c0_i32_1 = arith.constant 0 : i32
    %c0_i32_2 = arith.constant 0 : i32
    return %c0_i32, %c0_i32_0, %c0_i32_1 : i32, i32, i32
  }
  func.func @transform_13(%arg0: i32) -> (i32, i32, i32) {
    %c0_i32 = arith.constant 0 : i32
    %c0_i32_0 = arith.constant 0 : i32
    %c0_i32_1 = arith.constant 0 : i32
    %c0_i32_2 = arith.constant 0 : i32
    return %c0_i32, %c0_i32_0, %c0_i32_1 : i32, i32, i32
  }
  func.func @transform_14(%arg0: i32) -> (i32, i32, i32) {
    %c0_i32 = arith.constant 0 : i32
    %c0_i32_0 = arith.constant 0 : i32
    %c0_i32_1 = arith.constant 0 : i32
    %c0_i32_2 = arith.constant 0 : i32
    return %c0_i32, %c0_i32_0, %c0_i32_1 : i32, i32, i32
  }
  func.func @transform_15(%arg0: i32) -> (i32, i32, i32) {
    %c0_i32 = arith.constant 0 : i32
    %c0_i32_0 = arith.constant 0 : i32
    %c0_i32_1 = arith.constant 0 : i32
    %c0_i32_2 = arith.constant 0 : i32
    return %c0_i32, %c0_i32_0, %c0_i32_1 : i32, i32, i32
  }
  func.func @transform_16(%arg0: i32) -> (i32, i32, i32) {
    %c0_i32 = arith.constant 0 : i32
    %c0_i32_0 = arith.constant 0 : i32
    %c0_i32_1 = arith.constant 0 : i32
    %c0_i32_2 = arith.constant 0 : i32
    return %c0_i32, %c0_i32_0, %c0_i32_1 : i32, i32, i32
  }
  func.func @transform_17(%arg0: i32) -> (i32, i32, i32) {
    %c0_i32 = arith.constant 0 : i32
    %c0_i32_0 = arith.constant 0 : i32
    %c0_i32_1 = arith.constant 0 : i32
    %c0_i32_2 = arith.constant 0 : i32
    return %c0_i32, %c0_i32_0, %c0_i32_1 : i32, i32, i32
  }
  func.func @transform_18(%arg0: i32) -> (i32, i32, i32) {
    %c0_i32 = arith.constant 0 : i32
    %c0_i32_0 = arith.constant 0 : i32
    %c0_i32_1 = arith.constant 0 : i32
    %c0_i32_2 = arith.constant 0 : i32
    return %c0_i32, %c0_i32_0, %c0_i32_1 : i32, i32, i32
  }
  func.func @transform_19(%arg0: i32) -> (i32, i32, i32) {
    %c0_i32 = arith.constant 0 : i32
    %c0_i32_0 = arith.constant 0 : i32
    %c0_i32_1 = arith.constant 0 : i32
    %c0_i32_2 = arith.constant 0 : i32
    return %c0_i32, %c0_i32_0, %c0_i32_1 : i32, i32, i32
  }
  func.func @transform_20(%arg0: i32) -> (i32, i32, i32) {
    %c0_i32 = arith.constant 0 : i32
    %c0_i32_0 = arith.constant 0 : i32
    %c0_i32_1 = arith.constant 0 : i32
    %c0_i32_2 = arith.constant 0 : i32
    return %c0_i32, %c0_i32_0, %c0_i32_1 : i32, i32, i32
  }
  func.func @transform_21(%arg0: i32) -> (i32, i32) {
    %c0_i32 = arith.constant 0 : i32
    %c0_i32_0 = arith.constant 0 : i32
    %c0_i32_1 = arith.constant 0 : i32
    return %c0_i32, %c0_i32_0 : i32, i32
  }
  func.func @transform_22(%arg0: i32) -> (i32, i32) {
    %c0_i32 = arith.constant 0 : i32
    %c0_i32_0 = arith.constant 0 : i32
    %c0_i32_1 = arith.constant 0 : i32
    return %c0_i32, %c0_i32_0 : i32, i32
  }
  func.func @transform_23(%arg0: i32) -> (i32, i32) {
    %c0_i32 = arith.constant 0 : i32
    %c0_i32_0 = arith.constant 0 : i32
    %c0_i32_1 = arith.constant 0 : i32
    return %c0_i32, %c0_i32_0 : i32, i32
  }
  func.func @transform_24(%arg0: i32) -> (i32, i32) {
    %c0_i32 = arith.constant 0 : i32
    %c0_i32_0 = arith.constant 0 : i32
    %c0_i32_1 = arith.constant 0 : i32
    return %c0_i32, %c0_i32_0 : i32, i32
  }
  func.func @transform_25(%arg0: i32) -> (i32, i32) {
    %c0_i32 = arith.constant 0 : i32
    %c0_i32_0 = arith.constant 0 : i32
    %c0_i32_1 = arith.constant 0 : i32
    return %c0_i32, %c0_i32_0 : i32, i32
  }
}

</mosaic_0001>

<bundles_post_ra>
// kernel: vit_forward.1
= control target key start
LH: loop header
LB: loop body
LE: loop exit
PB: predicated region body
PF: predicated region fallthrough
CT: control target
= control target key end

     0   :  { %s5803_s0 = inlined_call_operand.vmem [shape: f32[8,512], index: 0, kind: input, shape index: {}]   ;;  %s5804_s1 = inlined_call_operand.vmem [shape: f32[512,32], index: 1, kind: input, shape index: {}]   ;;  %s5805_s2 = inlined_call_operand.vmem [shape: f32[1,32], index: 2, kind: input, shape index: {}]   ;;  %s5806_s3 = inlined_call_operand.vmem [shape: f32[1,32], index: 3, kind: input, shape index: {}]   ;;  %s5807_s4 = inlined_call_operand.vmem [shape: f32[4,32], index: 4, kind: input, shape index: {}]   ;;  %s5808_s5 = inlined_call_operand.vmem [shape: f32[2,1,32], index: 5, kind: input, shape index: {}]   ;;  %s5809_s6 = inlined_call_operand.vmem [shape: f32[2,1,32], index: 6, kind: input, shape index: {}]   ;;  %s5810_s7 = inlined_call_operand.vmem [shape: f32[2,32,32], index: 7, kind: input, shape index: {}]   ;;  %s5811_s8 = inlined_call_operand.vmem [shape: f32[2,1,32], index: 8, kind: input, shape index: {}]   ;;  %s5812_s9 = inlined_call_operand.vmem [shape: f32[2,32,32], index: 9, kind: input, shape index: {}]   ;;  %s5813_s10 = inlined_call_operand.vmem [shape: f32[2,1,32], index: 10, kind: input, shape index: {}]   ;;  %s5814_s11 = inlined_call_operand.vmem [shape: f32[2,32,32], index: 11, kind: input, shape index: {}]   ;;  %s5815_s12 = inlined_call_operand.vmem [shape: f32[2,1,32], index: 12, kind: input, shape index: {}]   ;;  %s5816_s13 = inlined_call_operand.vmem [shape: f32[2,32,32], index: 13, kind: input, shape index: {}]   ;;  %s5817_s14 = inlined_call_operand.vmem [shape: f32[2,1,32], index: 14, kind: input, shape index: {}]   ;;  %s5818_s15 = inlined_call_operand.vmem [shape: f32[2,1,32], index: 15, kind: input, shape index: {}]   ;;  %s5819_s16 = inlined_call_operand.vmem [shape: f32[2,1,32], index: 16, kind: input, shape index: {}]   ;;  %s5820_s17 = inlined_call_operand.vmem [shape: f32[2,32,128], index: 17, kind: input, shape index: {}]   ;;  %s5821_s18 = inlined_call_operand.vmem [shape: f32[2,1,128], index: 18, kind: input, shape index: {}]   ;;  %s5822_s19 = inlined_call_operand.vmem [shape: f32[2,128,32], index: 19, kind: input, shape index: {}]   ;;  %s5823_s20 = inlined_call_operand.vmem [shape: f32[2,1,32], index: 20, kind: input, shape index: {}]   ;;  %s5824_s21 = inlined_call_operand.vmem [shape: f32[1,32], index: 21, kind: input, shape index: {}]   ;;  %s5825_s22 = inlined_call_operand.vmem [shape: f32[1,32], index: 22, kind: input, shape index: {}]   ;;  %s5826_s23 = inlined_call_operand.vmem [shape: f32[32,128], index: 23, kind: input, shape index: {}]   ;;  %s5827_s24 = inlined_call_operand.vmem [shape: f32[1,128], index: 24, kind: input, shape index: {}]   ;;  %s5828_s25 = inlined_call_operand.hbm [shape: f32[2,128], index: 25, kind: output, shape index: {}]  }
   0x1   :  { %5839 = sst [smem:[#allocation6_spill]] %s5803_s0 }
   0x2   :  { %5840 = sst [smem:[#allocation7_spill]] %s5804_s1 }
   0x3   :  { %5841 = sst [smem:[#allocation8_spill]] %s5805_s2 }
   0x4   :  { %5842 = sst [smem:[#allocation9_spill]] %s5806_s3 }
   0x5   :  { %5843 = sst [smem:[#allocation10_spill]] %s5807_s4 }
   0x6   :  { %5844 = sst [smem:[#allocation11_spill]] %s5808_s5 }
   0x7   :  { %5845 = sst [smem:[#allocation12_spill]] %s5809_s6 }
   0x8   :  { %5846 = sst [smem:[#allocation13_spill]] %s5810_s7 }
   0x9   :  { %5847 = sst [smem:[#allocation14_spill]] %s5811_s8 }
   0xa   :  { %5848 = sst [smem:[#allocation15_spill]] %s5812_s9 }
   0xb   :  { %s5849_s6 = sld [smem:[#allocation7_spill]] }
  0x11   :  { %v116_v0 = vld [vmem:[%s5849_s6 + $0xf8] sm:$0xff]  ;;  %v115_v4 = vld [vmem:[%s5849_s6 + $0xf0] sm:$0xff]  ;;  %v114_v8 = vld [vmem:[%s5849_s6 + $0xe8] sm:$0xff] }
  0x12   :  { %v148_v1 = vld [vmem:[%s5849_s6 + $0x1f8] sm:$0xff]  ;;  %4113 = vmatprep.subr.mxu0 %v116_v0  ;;  %v147_v5 = vld [vmem:[%s5849_s6 + $0x1f0] sm:$0xff]  ;;  %v146_v9 = vld [vmem:[%s5849_s6 + $0x1e8] sm:$0xff] }
  0x13   :  { %v100_v2 = vld [vmem:[%s5849_s6 + $0x78] sm:$0xff]  ;;  %4148 = vmatprep.subr.mxu1 %v148_v1  ;;  %v99_v6 = vld [vmem:[%s5849_s6 + $0x70] sm:$0xff]  ;;  %v98_v10 = vld [vmem:[%s5849_s6 + $0x68] sm:$0xff] }
  0x14   :  { %v132_v3 = vld [vmem:[%s5849_s6 + $0x178] sm:$0xff]  ;;  %4114 = vmatpush3.msra.mxu0 %v100_v2  ;;  %v131_v7 = vld [vmem:[%s5849_s6 + $0x170] sm:$0xff]  ;;  %v130_v11 = vld [vmem:[%s5849_s6 + $0x168] sm:$0xff] }
  0x15   :  { %4149 = vmatpush3.msra.mxu1 %v132_v3  ;;  %4115 = vmatprep.subr.mxu0 %v115_v4  ;;  %v113_v12 = vld [vmem:[%s5849_s6 + $0xe0] sm:$0xff]  ;;  %v112_v16 = vld [vmem:[%s5849_s6 + $0xd8] sm:$0xff]  ;;  %v111_v20 = vld [vmem:[%s5849_s6 + $0xd0] sm:$0xff] }
  0x16   :  { %4150 = vmatprep.subr.mxu1 %v147_v5  ;;  %4116 = vmatpush3.msra.mxu0 %v99_v6  ;;  %v145_v13 = vld [vmem:[%s5849_s6 + $0x1e0] sm:$0xff]  ;;  %v144_v17 = vld [vmem:[%s5849_s6 + $0x1d8] sm:$0xff]  ;;  %v143_v21 = vld [vmem:[%s5849_s6 + $0x1d0] sm:$0xff] }
  0x17   :  { %4151 = vmatpush3.msra.mxu1 %v131_v7  ;;  %4117 = vmatprep.subr.mxu0 %v114_v8  ;;  %v97_v14 = vld [vmem:[%s5849_s6 + $0x60] sm:$0xff]  ;;  %v96_v18 = vld [vmem:[%s5849_s6 + $0x58] sm:$0xff]  ;;  %v95_v22 = vld [vmem:[%s5849_s6 + $0x50] sm:$0xff] }
  0x18   :  { %4152 = vmatprep.subr.mxu1 %v146_v9  ;;  %v129_v15 = vld [vmem:[%s5849_s6 + $0x160] sm:$0xff]  ;;  %4118 = vmatpush3.msra.mxu0 %v98_v10  ;;  %v128_v19 = vld [vmem:[%s5849_s6 + $0x158] sm:$0xff]  ;;  %v127_v23 = vld [vmem:[%s5849_s6 + $0x150] sm:$0xff] }
  0x19   :  { %4153 = vmatpush3.msra.mxu1 %v130_v11  ;;  %4119 = vmatprep.subr.mxu0 %v113_v12  ;;  %v110_v24 = vld [vmem:[%s5849_s6 + $0xc8] sm:$0xff]  ;;  %v109_v28 = vld [vmem:[%s5849_s6 + $0xc0] sm:$0xff]  ;;  %v108_v32 = vld [vmem:[%s5849_s6 + $0xb8] sm:$0xff] }
  0x1a   :  { %4154 = vmatprep.subr.mxu1 %v145_v13  ;;  %4120 = vmatpush3.msra.mxu0 %v97_v14  ;;  %v142_v25 = vld [vmem:[%s5849_s6 + $0x1c8] sm:$0xff]  ;;  %v141_v29 = vld [vmem:[%s5849_s6 + $0x1c0] sm:$0xff]  ;;  %v140_v33 = vld [vmem:[%s5849_s6 + $0x1b8] sm:$0xff] }
  0x1b   :  { %4155 = vmatpush3.msra.mxu1 %v129_v15  ;;  %4121 = vmatprep.subr.mxu0 %v112_v16  ;;  %v94_v26 = vld [vmem:[%s5849_s6 + $0x48] sm:$0xff]  ;;  %v93_v30 = vld [vmem:[%s5849_s6 + $0x40] sm:$0xff]  ;;  %v92_v34 = vld [vmem:[%s5849_s6 + $0x38] sm:$0xff] }
  0x1c   :  { %4156 = vmatprep.subr.mxu1 %v144_v17  ;;  %4122 = vmatpush3.msra.mxu0 %v96_v18  ;;  %v126_v27 = vld [vmem:[%s5849_s6 + $0x148] sm:$0xff]  ;;  %v125_v31 = vld [vmem:[%s5849_s6 + $0x140] sm:$0xff]  ;;  %v124_v35 = vld [vmem:[%s5849_s6 + $0x138] sm:$0xff] }
  0x1d   :  { %4157 = vmatpush3.msra.mxu1 %v128_v19  ;;  %4123 = vmatprep.subr.mxu0 %v111_v20  ;;  %v107_v36 = vld [vmem:[%s5849_s6 + $0xb0] sm:$0xff]  ;;  %v106_v40 = vld [vmem:[%s5849_s6 + $0xa8] sm:$0xff]  ;;  %v105_v44 = vld [vmem:[%s5849_s6 + $0xa0] sm:$0xff] }
  0x1e   :  { %4158 = vmatprep.subr.mxu1 %v143_v21  ;;  %4124 = vmatpush3.msra.mxu0 %v95_v22  ;;  %v139_v37 = vld [vmem:[%s5849_s6 + $0x1b0] sm:$0xff]  ;;  %v138_v41 = vld [vmem:[%s5849_s6 + $0x1a8] sm:$0xff]  ;;  %v137_v45 = vld [vmem:[%s5849_s6 + $0x1a0] sm:$0xff] }
  0x1f   :  { %4159 = vmatpush3.msra.mxu1 %v127_v23  ;;  %4125 = vmatprep.subr.mxu0 %v110_v24  ;;  %v91_v38 = vld [vmem:[%s5849_s6 + $0x30] sm:$0xff]  ;;  %v90_v42 = vld [vmem:[%s5849_s6 + $0x28] sm:$0xff]  ;;  %v89_v46 = vld [vmem:[%s5849_s6 + $0x20] sm:$0xff] }
  0x20   :  { %4160 = vmatprep.subr.mxu1 %v142_v25  ;;  %4126 = vmatpush3.msra.mxu0 %v94_v26  ;;  %v123_v39 = vld [vmem:[%s5849_s6 + $0x130] sm:$0xff]  ;;  %v122_v43 = vld [vmem:[%s5849_s6 + $0x128] sm:$0xff]  ;;  %v121_v47 = vld [vmem:[%s5849_s6 + $0x120] sm:$0xff] }
  0x21   :  { %4161 = vmatpush3.msra.mxu1 %v126_v27  ;;  %4127 = vmatprep.subr.mxu0 %v109_v28  ;;  %v104_v48 = vld [vmem:[%s5849_s6 + $0x98] sm:$0xff] }
  0x22   :  { %4162 = vmatprep.subr.mxu1 %v141_v29  ;;  %4128 = vmatpush3.msra.mxu0 %v93_v30  ;;  %v136_v49 = vld [vmem:[%s5849_s6 + $0x198] sm:$0xff] }
  0x23   :  { %4163 = vmatpush3.msra.mxu1 %v125_v31  ;;  %4129 = vmatprep.subr.mxu0 %v108_v32 }
  0x24   :  { %4164 = vmatprep.subr.mxu1 %v140_v33  ;;  %4130 = vmatpush3.msra.mxu0 %v92_v34 }
  0x25   :  { %4165 = vmatpush3.msra.mxu1 %v124_v35  ;;  %4131 = vmatprep.subr.mxu0 %v107_v36 }
  0x26   :  { %4166 = vmatprep.subr.mxu1 %v139_v37  ;;  %4132 = vmatpush3.msra.mxu0 %v91_v38 }
  0x27   :  { %4167 = vmatpush3.msra.mxu1 %v123_v39  ;;  %4133 = vmatprep.subr.mxu0 %v106_v40 }
  0x28   :  { %4168 = vmatprep.subr.mxu1 %v138_v41  ;;  %4134 = vmatpush3.msra.mxu0 %v90_v42 }
  0x29   :  { %4169 = vmatpush3.msra.mxu1 %v122_v43 }
  0x2a   :  { %30 = vsyncpa [#allocation4], 0  ;;  %4135 = vmatprep.subr.mxu0 %v105_v44  ;;  %4170 = vmatprep.subr.mxu1 %v137_v45  ;;  %v88_v50 = vld [vmem:[%s5849_s6 + $0x18] sm:$0xff]  ;;  %v103_v52 = vld [vmem:[%s5849_s6 + $0x90] sm:$0xff]  ;;  %s5850_s30 = sld [smem:[#allocation6_spill]]  ;;  %vm298_vm0 = vcmask 253952  }
  0x2b   :  { %v120_v51 = vld [vmem:[%s5849_s6 + $0x118] sm:$0xff]  ;;  %4136 = vmatpush3.msra.mxu0 %v89_v46  ;;  %4171 = vmatpush3.msra.mxu1 %v121_v47  ;;  %v135_v53 = vld [vmem:[%s5849_s6 + $0x190] sm:$0xff]  ;;  %v102_v56 = vld [vmem:[%s5849_s6 + $0x88] sm:$0xff]  ;;  %s5851_s5 = sld [smem:[#allocation9_spill]]  ;;  %vm301_vm1 = vcmask 257024   ;;  %vm308_vm2 = vcmask 261124  }
  0x2c   :  { %4137 = vmatprep.subr.mxu0 %v104_v48  ;;  %4172 = vmatprep.subr.mxu1 %v136_v49  ;;  %v87_v54 = vld [vmem:[%s5849_s6 + $0x10] sm:$0xff]  ;;  %v134_v57 = vld [vmem:[%s5849_s6 + $0x188] sm:$0xff]  ;;  %v101_v60 = vld [vmem:[%s5849_s6 + $0x80] sm:$0xff]  ;;  %s5852_s2 = sld [smem:[#allocation8_spill]]  ;;  %vm5836_vm3 = vcmask 261120   ;;  %vm349_vm4 = vcmask 254976  }
  0x2d   :  { %v119_v55 = vld [vmem:[%s5849_s6 + $0x110] sm:$0xff]  ;;  %4138 = vmatpush3.msra.mxu0 %v88_v50  ;;  %4173 = vmatpush3.msra.mxu1 %v120_v51  ;;  %v86_v58 = vld [vmem:[%s5849_s6 + $0x8] sm:$0xff]  ;;  %v133_v61 = vld [vmem:[%s5849_s6 + $0x180] sm:$0xff]  ;;  %s5853_s3 = sld [smem:[#allocation10_spill]]  ;;  %vm658_vm5 = vcmask 64512   ;;  %s4801_s29 = smov 120  }
  0x2e   :  { %4139 = vmatprep.subr.mxu0 %v103_v52  ;;  %4174 = vmatprep.subr.mxu1 %v135_v53  ;;  %v118_v59 = vld [vmem:[%s5849_s6 + $0x108] sm:$0xff]  ;;  %v85_v62 = vld [vmem:[%s5849_s6] sm:$0xff]  ;;  %s5854_s8 = sld [smem:[#allocation13_spill]]  ;;  %vm780_vm6 = vcmask 1041408   ;;  %s4803_s4 = smov 112  }
  0x2f   :  { %4140 = vmatpush3.msra.mxu0 %v87_v54  ;;  %4175 = vmatpush3.msra.mxu1 %v119_v55  ;;  %v117_v0 = vld [vmem:[%s5849_s6 + $0x100] sm:$0xff]  ;;  %s5857_s27 = sld [smem:[#allocation12_spill]]  ;;  %s5837_s28 = smov 104  }
  0x30   :  { %4141 = vmatprep.subr.mxu0 %v102_v56  ;;  %4176 = vmatprep.subr.mxu1 %v134_v57  ;;  %v82_v63 = vld [vmem:[%s5850_s30 + $0x8] sm:$0xff]  ;;  %v84_v1 = vld [vmem:[%s5850_s30 + $0x18] sm:$0xff]  ;;  %v81_v2 = vld [vmem:[%s5850_s30] sm:$0xff]  ;;  %s5858_s0 = sld [smem:[#allocation14_spill]]  ;;  %s5871_s7 = smov 104  }
  0x31   :  { %4142 = vmatpush3.msra.mxu0 %v86_v58  ;;  %4177 = vmatpush3.msra.mxu1 %v118_v59  ;;  %v83_v3 = vld [vmem:[%s5850_s30 + $0x10] sm:$0xff]  ;;  %v296_v4 = vld [vmem:[%s5851_s5] sm:$0x1]  ;;  %v571_v56 = vld [vmem:[%s5814_s11 + $0x18] sm:$0xff] }
  0x32   :  { %4143 = vmatprep.subr.mxu0 %v101_v60  ;;  %4178 = vmatprep.subr.mxu1 %v133_v61  ;;  %299 = vst.msk [vmem:[#allocation2] sm:$0x1] %vm298_vm0, %v296_v4  ;;  %303 = vst.msk [vmem:[#allocation2 + $0x5] sm:$0x1] %vm298_vm0, %v296_v4  ;;  %v3953_v7 = vld [vmem:[%s5852_s2] ss:$0 sm:$0xff] }
  0x33   :  { %4144 = vmatpush3.msra.mxu0 %v85_v62  ;;  %220 = vmatprep.mubr.f32.mxu0 %v82_v63  ;;  %v297_v10 = vld [vmem:[%s5853_s3] sm:$0xf]  ;;  %s5855_s2 = sld [smem:[#allocation15_spill]]  ;;  %v570_v57 = vld [vmem:[%s5814_s11 + $0x10] sm:$0xff]  ;;  %v569_v58 = vld [vmem:[%s5814_s11 + $0x8] sm:$0xff] }
  0x34   :  { %4179 = vmatpush3.msra.mxu1 %v117_v0  ;;  %290 = vmatprep.mubr.f32.mxu1 %v84_v1  ;;  %v305_v14 = vrot.slane %v297_v10, 4  ;;  %v393_v32 = vld [vmem:[%s5854_s8 + $0x18] sm:$0xff]  ;;  %v392_v33 = vld [vmem:[%s5854_s8 + $0x10] sm:$0xff]  ;;  %v391_v34 = vld [vmem:[%s5854_s8 + $0x8] sm:$0xff]  ;;  %s5856_s3 = sld [smem:[#allocation11_spill]] }
  0x35   :  { %221 = vmatmul.mubr.f32.vlgmr.msra.gmra.mxu0 %v81_v2  ;;  %291 = vmatmul.mubr.f32.vlgmr.msra.gmra.mxu1 %v83_v3  ;;  %v390_v35 = vld [vmem:[%s5854_s8] sm:$0xff] }
  0x36   :  { %4361 = vmatprep.subr.mxu0 %v393_v32  ;;  %v3955_v46 = vld [vmem:[%s5857_s27] ss:$0 sm:$0xff] }
  0x37   :  { %4362 = vmatpush3.msra.mxu0 %v393_v32  ;;  %v568_v59 = vld [vmem:[%s5814_s11] sm:$0xff] }
  0x38   :  { %4363 = vmatprep.subr.mxu0 %v392_v33  ;;  %v3956_v61 = vld [vmem:[%s5858_s0] ss:$0 sm:$0xff] }
  0x39   :  { %4364 = vmatpush3.msra.mxu0 %v392_v33  ;;  %v485_v36 = vld [vmem:[%s5855_s2 + $0x18] sm:$0xff]  ;;  %v484_v53 = vld [vmem:[%s5855_s2 + $0x10] sm:$0xff]  ;;  %v483_v54 = vld [vmem:[%s5855_s2 + $0x8] sm:$0xff] }
  0x3a   :  { %4365 = vmatprep.subr.mxu0 %v391_v34  ;;  %v3954_v44 = vld [vmem:[%s5856_s3] ss:$0 sm:$0xff] }
  0x3b   :  { %4366 = vmatpush3.msra.mxu0 %v391_v34  ;;  %v482_v55 = vld [vmem:[%s5855_s2] sm:$0xff] }
  0x3c   :  { %4367 = vmatprep.subr.mxu0 %v390_v35  ;;  %v3959_v0 = vld [vmem:[%s5813_s10] ss:$0 sm:$0xff] }
  0x3d   :  { %4368 = vmatpush3.msra.mxu0 %v390_v35 }
  0x3e   :  { %4372 = vmatprep.subr.mxu0 %v485_v36 }
  0xf5   :  { %v4145_v5 = vpop.f32.mrf.mxu0  ;;  %v4180_v6 = vpop.f32.mrf.mxu1 }
  0xf7   :  { %v4146_v8 = vpop.f32.mrf.mxu0  ;;  %v4181_v9 = vpop.f32.mrf.mxu1 }
  0xf8   :  { %v4147_v11 = vadd.f32 %v4146_v8, %v4145_v5  ;;  %v4182_v13 = vadd.f32 %v4181_v9, %v4180_v6  ;;  %v3962_v5 = vld [vmem:[%s5815_s12] ss:$0 sm:$0xff] }
  0xfa   :  { %v223_v12 = vadd.f32 %v4147_v11, %v3953_v7 }
  0xfc   :  { %v293_v15 = vadd.f32 %v4182_v13, %v223_v12 }
  0xfe   :  { %v300_v16 = vadd.f32 %v297_v10, %v293_v15  ;;  %v307_v17 = vadd.f32 %v305_v14, %v293_v15  ;;  %v312_v15 = vlaneseq }
 0x100   :  { %302 = vst.msk [vmem:[#allocation2 + $0x1] sm:$0xf] %vm301_vm1, %v300_v16  ;;  %v313_v16 = vshrl.u32 %v312_v15, 7 }
 0x101   :  { %309 = vst.msk [vmem:[#allocation2 + $0x2] sm:$0xf0] %vm308_vm2, %v307_v17  ;;  %v316_v17 = vand.u32 127, %v312_v15  ;;  %vm754_vm2 = vcmask 74752  }
 0x102   :  { %vm319_vm9 = vcmp.lt.s32.totalorder %v313_v16, 5  ;;  %vm328_vm12 = vcmp.ge.s32.totalorder %v313_v16, 5 }
 0x103   :  { %vm334_vm7 = vcmp.ge.s32.totalorder %v316_v17, 5  ;;  %vm335_vm8 = vcmp.lt.s32.totalorder %v316_v17, 10  ;;  %vm324_vm10 = vcmp.lt.s32.totalorder %v316_v17, 5 }
 0x104   :  { %vm336_vm11 = vmand %vm334_vm7, %vm335_vm8  ;;  %vm5859_vm7 = vcmask 261120  }
 0x105   :  { %vm326_vm14 = vmand %vm319_vm9, %vm324_vm10 }
 0x106   :  { %vm337_vm15 = vmand %vm328_vm12, %vm336_vm11 }
 0x107   :  { %vm339_vm1 = vmor %vm326_vm14, %vm337_vm15 }
 0x108   :  { %v5149_v18 = vld [vmem:[#allocation2] sm:$0xff]  ;;  %v5153_v20 = vld [vmem:[#allocation2 + $0x8] sm:$0x3]  ;;  %vm5860_vm8 = vmmov %vm5859_vm7 }
 0x109   :  { %v346_v19 = vsel %vm5836_vm3, %v5149_v18, 0.0  ;;  %v350_v21 = vsel %vm349_vm4, %v5153_v20, 0.0  ;;  %vm5861_vm9 = vmmov %vm5859_vm7 }
 0x10a   :  { %347 = vadd.xlane.f32.xlu0 %v346_v19  ;;  %v314_v19 = vadd.s32 8, %v313_v16  ;;  %vm5862_vm10 = vmmov %vm5859_vm7 }
 0x10b   :  { %vm5864_vm12 = vmmov %vm5859_vm7 }
 0x10c   :  { %vm331_vm13 = vcmp.lt.s32.totalorder %v314_v19, 10  ;;  %vm5866_vm14 = vmmov %vm5859_vm7 }
 0x10d   :  { %vm338_vm0 = vmand %vm331_vm13, %vm336_vm11 }
 0x10e   :  { %351 = vadd.xlane.f32.xlu0 %v350_v21  ;;  %vm5863_vm11 = vmmov %vm5859_vm7 }
 0x10f   :  { %vm5865_vm13 = vmmov %vm5859_vm7 }
 0x110   :  { %vm5867_vm15 = vmmov %vm5859_vm7 }
 0x193   :  { %v348_v22 = vpop.xlane.xlu0 %347 }
 0x194   :  { %v354_v23 = vmul.f32 0.03125, %v348_v22  ;;  %v4802_v22 = vmov -1e+30  }
 0x196   :  { %v356_v24 = vsub.f32 %v5149_v18, %v354_v23  ;;  %v5262_v23 = vsel %vm338_vm0, 0.0, %v4802_v22  ;;  %vm5868_vm0 = vmmov %vm5859_vm7 }
 0x197   :  { %v352_v25 = vpop.xlane.xlu0 %351 }
 0x198   :  { %v355_v26 = vmul.f32 0.03125, %v352_v25  ;;  %v358_v27 = vmul.f32 %v356_v24, %v356_v24 }
 0x19a   :  { %v357_v28 = vsub.f32 %v5153_v20, %v355_v26  ;;  %v360_v29 = vsel %vm5836_vm3, %v358_v27, 0.0  ;;  %v5264_v26 = vsel %vm339_vm1, 0.0, %v4802_v22  ;;  %vm5869_vm1 = vmmov %vm5868_vm0 }
 0x19b   :  { %361 = vadd.xlane.f32.xlu1 %v360_v29 }
 0x19c   :  { %v359_v30 = vmul.f32 %v357_v28, %v357_v28 }
 0x19e   :  { %v363_v31 = vsel %vm349_vm4, %v359_v30, 0.0 }
 0x19f   :  { %364 = vadd.xlane.f32.xlu1 %v363_v31 }
 0x224   :  { %v362_v37 = vpop.xlane.xlu1 %361 }
 0x225   :  { %v366_v38 = vmul.f32 0.03125, %v362_v37 }
 0x227   :  { %v368_v39 = vadd.f32 1e-06, %v366_v38 }
 0x228   :  { %v365_v40 = vpop.xlane.xlu1 %364 }
 0x229   :  { %4687 = vrsqrt.f32 %v368_v39  ;;  %v367_v41 = vmul.f32 0.03125, %v365_v40 }
 0x22b   :  { %v369_v42 = vadd.f32 1e-06, %v367_v41 }
 0x22d   :  { %4689 = vrsqrt.f32 %v369_v42 }
 0x236   :  { %v4688_v43 = vpop.eup %4687 }
 0x237   :  { %v372_v45 = vmul.f32 %v4688_v43, %v356_v24 }
 0x239   :  { %v380_v47 = vmul.f32 %v3954_v44, %v372_v45 }
 0x23a   :  { %v4690_v48 = vpop.eup %4689 }
 0x23b   :  { %v373_v49 = vmul.f32 %v4690_v48, %v357_v28  ;;  %v388_v50 = vadd.f32 %v3955_v46, %v380_v47 }
 0x23d   :  { %v381_v51 = vmul.f32 %v3954_v44, %v373_v49  ;;  %4369 = vmatprep.mubr.msk.f32.mxu0 %vm5836_vm3, %v388_v50 }
 0x23f   :  { %v389_v52 = vadd.f32 %v3955_v46, %v381_v51 }
 0x241   :  { %4370 = vmatmul.mubr.msk.f32.vlgmr.msra.gmra.mxu0 %vm5836_vm3, %v389_v52 }
 0x242   :  { %4373 = vmatpush3.msra.mxu0 %v485_v36  ;;  %4380 = vmatprep.mubr.msk.f32.mxu0 %vm5836_vm3, %v388_v50 }
 0x243   :  { %4374 = vmatprep.subr.mxu0 %v484_v53 }
 0x244   :  { %4375 = vmatpush3.msra.mxu0 %v484_v53 }
 0x245   :  { %4376 = vmatprep.subr.mxu0 %v483_v54 }
 0x246   :  { %4377 = vmatpush3.msra.mxu0 %v483_v54 }
 0x247   :  { %4378 = vmatprep.subr.mxu0 %v482_v55 }
 0x248   :  { %4379 = vmatpush3.msra.mxu0 %v482_v55 }
 0x249   :  { %4381 = vmatmul.mubr.msk.f32.vlgmr.msra.gmra.mxu0 %vm5836_vm3, %v389_v52  ;;  %4383 = vmatprep.subr.mxu0 %v571_v56 }
 0x24a   :  { %4384 = vmatpush3.msra.mxu0 %v571_v56  ;;  %4391 = vmatprep.mubr.msk.f32.mxu0 %vm5836_vm3, %v388_v50 }
 0x24b   :  { %4385 = vmatprep.subr.mxu0 %v570_v57 }
 0x24c   :  { %4386 = vmatpush3.msra.mxu0 %v570_v57 }
 0x24d   :  { %4387 = vmatprep.subr.mxu0 %v569_v58 }
 0x24e   :  { %4388 = vmatpush3.msra.mxu0 %v569_v58 }
 0x24f   :  { %4389 = vmatprep.subr.mxu0 %v568_v59 }
 0x250   :  { %4390 = vmatpush3.msra.mxu0 %v568_v59 }
 0x251   :  { %4392 = vmatmul.mubr.msk.f32.vlgmr.msra.gmra.mxu0 %vm5836_vm3, %v389_v52  ;;  %vm750_vm3 = vcmask 80896  }
 0x301   :  { %v4371_v60 = vpop.f32.mrf.mxu0 }
 0x302   :  { %v5238_v6 = vadd.f32 %v4371_v60, %v3956_v61 }
 0x303   :  { %v473_v62 = vpop.f32.mrf.mxu0 }
 0x304   :  { %v5212_v63 = vadd.f32 %v3956_v61, %v473_v62 }
 0x306   :  { %859 = vrot.lane.b32.xlu1 %v5212_v63, %s4801_s29  ;;  %4398 = vmatprep.mubr.msk.f32.mxu1 %vm658_vm5, %v5212_v63 }
 0x309   :  { %v4382_v1 = vpop.f32.mrf.mxu0 }
 0x30a   :  { %v5221_v2 = vadd.f32 %v4382_v1, %v3959_v0 }
 0x30b   :  { %v559_v3 = vpop.f32.mrf.mxu0 }
 0x30c   :  { %v5223_v4 = vadd.f32 %v3959_v0, %v559_v3  ;;  %865 = vrot.lane.b32.xlu0 %v5221_v2, %s4801_s29  ;;  %4394 = vmatprep.subr.msk.mxu1 %vm658_vm5, %v5221_v2 }
 0x30d   :  { %4395 = vmatpush3.xpose.msk.msra.mxu1 %vm658_vm5, %v5221_v2 }
 0x30e   :  { %4396 = vmatprep.subr.msk.mxu1 %vm658_vm5, %v5223_v4  ;;  %863 = vrot.lane.b32.xlu1 %v5223_v4, %s4801_s29 }
 0x311   :  { %v4393_v7 = vpop.f32.mrf.mxu0  ;;  %4397 = vmatpush3.xpose.msk.msra.mxu1 %vm658_vm5, %v5223_v4 }
 0x312   :  { %v5242_v8 = vadd.f32 %v4393_v7, %v3962_v5  ;;  %861 = vrot.lane.b32.xlu1 %v5238_v6, %s4801_s29 }
 0x313   :  { %v645_v9 = vpop.f32.mrf.mxu0 }
 0x314   :  { %v5246_v10 = vadd.f32 %v3962_v5, %v645_v9  ;;  %4399 = vmatmul.mubr.msk.f32.vlgmr.msra.gmra.mxu1 %vm658_vm5, %v5238_v6  ;;  %4401 = vmatprep.subr.msk.mxu0 %vm780_vm6, %v5242_v8 }
 0x315   :  { %4402 = vmatpush3.msk.msra.mxu0 %vm780_vm6, %v5242_v8 }
 0x316   :  { %4403 = vmatprep.subr.mxu0 %v5246_v10 }
 0x317   :  { %4404 = vmatpush3.msra.mxu0 %v5246_v10 }
 0x378   :  { %v860_v11 = vpop.permute.xlu1 %859 }
 0x379   :  { %4412 = vmatprep.mubr.msk.f32.mxu1 %vm658_vm5, %v860_v11 }
 0x37e   :  { %v866_v12 = vpop.permute.xlu0 %865 }
 0x37f   :  { %4408 = vmatprep.subr.msk.mxu1 %vm658_vm5, %v866_v12 }
 0x380   :  { %v864_v13 = vpop.permute.xlu1 %863  ;;  %4409 = vmatpush3.xpose.msk.msra.mxu1 %vm658_vm5, %v866_v12 }
 0x381   :  { %4410 = vmatprep.subr.msk.mxu1 %vm658_vm5, %v864_v13 }
 0x384   :  { %4411 = vmatpush3.xpose.msk.msra.mxu1 %vm658_vm5, %v864_v13  ;;  %v862_v14 = vpop.permute.xlu1 %861 }
 0x387   :  { %4413 = vmatmul.mubr.msk.f32.vlgmr.msra.gmra.mxu1 %vm658_vm5, %v862_v14 }
 0x3d4   :  { %v4400_v21 = vpop.f32.mrf.mxu1 }
 0x3d5   :  { %v747_v24 = vmul.f32 0.35355338, %v4400_v21 }
 0x3d6   :  { %v737_v25 = vpop.f32.mrf.mxu1 }
 0x3d7   :  { %v746_v27 = vmul.f32 0.35355338, %v737_v25  ;;  %v749_v28 = vadd.f32 %v747_v24, %v5262_v23 }
 0x3d9   :  { %v755_v29 = vsel %vm754_vm2, %v749_v28, -inf  ;;  %v748_v30 = vadd.f32 %v746_v27, %v5264_v26 }
 0x3da   :  { %756 = vmax.xlane.f32.xlu1 %v755_v29 }
 0x3db   :  { %v751_v31 = vsel %vm750_vm3, %v748_v30, -inf }
 0x3dc   :  { %752 = vmax.xlane.f32.xlu0 %v751_v31 }
 0x447   :  { %v4414_v32 = vpop.f32.mrf.mxu1 }
 0x448   :  { %v951_v34 = vmul.f32 0.35355338, %v4414_v32 }
 0x449   :  { %v941_v33 = vpop.f32.mrf.mxu1 }
 0x44a   :  { %v950_v35 = vmul.f32 0.35355338, %v941_v33  ;;  %v953_v38 = vadd.f32 %v951_v34, %v5262_v23 }
 0x44c   :  { %v952_v36 = vadd.f32 %v950_v35, %v5264_v26  ;;  %v957_v39 = vsel %vm754_vm2, %v953_v38, -inf }
 0x44e   :  { %v954_v37 = vsel %vm750_vm3, %v952_v36, -inf }
 0x44f   :  { %955 = vmax.xlane.f32.xlu0 %v954_v37 }
 0x453   :  { %958 = vmax.xlane.f32.xlu0 %v957_v39 }
 0x463   :  { %v757_v40 = vpop.xlane.xlu1 %756 }
 0x464   :  { %v759_v41 = vsub.f32 %v749_v28, %v757_v40 }
 0x465   :  { %v753_v42 = vpop.xlane.xlu0 %752 }
 0x466   :  { %v762_v43 = vmul.f32 1.442695, %v759_v41  ;;  %v758_v44 = vsub.f32 %v748_v30, %v753_v42 }
 0x468   :  { %4691 = vpow2.f32 %v762_v43  ;;  %v760_v45 = vmul.f32 1.442695, %v758_v44 }
 0x46a   :  { %4693 = vpow2.f32 %v760_v45 }
 0x475   :  { %v4692_v46 = vpop.eup %4691 }
 0x476   :  { %v767_v47 = vsel %vm754_vm2, %v4692_v46, 0.0 }
 0x477   :  { %v4694_v48 = vpop.eup %4693  ;;  %768 = vadd.xlane.f32.xlu1 %v767_v47 }
 0x478   :  { %v764_v49 = vsel %vm750_vm3, %v4694_v48, 0.0 }
 0x479   :  { %765 = vadd.xlane.f32.xlu0 %v764_v49 }
 0x4d8   :  { %v956_v50 = vpop.xlane.xlu0 %955 }
 0x4d9   :  { %v960_v51 = vsub.f32 %v952_v36, %v956_v50 }
 0x4db   :  { %v962_v52 = vmul.f32 1.442695, %v960_v51 }
 0x4dc   :  { %v959_v53 = vpop.xlane.xlu0 %958 }
 0x4dd   :  { %4695 = vpow2.f32 %v962_v52  ;;  %v961_v54 = vsub.f32 %v953_v38, %v959_v53 }
 0x4df   :  { %v964_v55 = vmul.f32 1.442695, %v961_v54 }
 0x4e1   :  { %4697 = vpow2.f32 %v964_v55 }
 0x4ea   :  { %v4696_v56 = vpop.eup %4695 }
 0x4eb   :  { %v966_v57 = vsel %vm750_vm3, %v4696_v56, 0.0 }
 0x4ec   :  { %967 = vadd.xlane.f32.xlu0 %v966_v57 }
 0x4ee   :  { %v4698_v58 = vpop.eup %4697 }
 0x4ef   :  { %v969_v59 = vsel %vm754_vm2, %v4698_v58, 0.0 }
 0x4f0   :  { %970 = vadd.xlane.f32.xlu1 %v969_v59 }
 0x500   :  { %v769_v60 = vpop.xlane.xlu1 %768 }
 0x501   :  { %977 = vrot.lane.b32.xlu1 %v5246_v10, %s4801_s29  ;;  %4699 = vrcp.f32 %v769_v60 }
 0x502   :  { %979 = vrot.lane.b32.xlu0 %v5242_v8, %s4801_s29  ;;  %v766_v61 = vpop.xlane.xlu0 %765 }
 0x503   :  { %4701 = vrcp.f32 %v766_v61 }
 0x505   :  { %1233 = vrot.lane.b32.xlu1 %v5221_v2, %s4803_s4 }
 0x506   :  { %1227 = vrot.lane.b32.xlu0 %v5212_v63, %s4803_s4 }
 0x509   :  { %1231 = vrot.lane.b32.xlu1 %v5223_v4, %s4803_s4 }
 0x50a   :  { %1521 = vrot.lane.b32.xlu0 %v5221_v2, %s5837_s28  ;;  %v654_v2 = vld [vmem:[%s5816_s13] sm:$0xff] }
 0x50b   :  { %4427 = vmatprep.subr.mxu1 %v654_v2 }
 0x50c   :  { %4428 = vmatpush3.msra.mxu1 %v654_v2 }
 0x50d   :  { %1229 = vrot.lane.b32.xlu1 %v5238_v6, %s4803_s4 }
 0x50e   :  { %1515 = vrot.lane.b32.xlu0 %v5212_v63, %s5837_s28  ;;  %v4700_v62 = vpop.eup %4699 }
 0x50f   :  { %v773_v3 = vmul.f32 %v4700_v62, %v4692_v46 }
 0x510   :  { %v4702_v0 = vpop.eup %4701 }
 0x511   :  { %1519 = vrot.lane.b32.xlu1 %v5223_v4, %s5837_s28  ;;  %v772_v1 = vmul.f32 %v4702_v0, %v4694_v48 }
 0x513   :  { %4405 = vmatprep.mubr.msk.f32.mxu0 %vm750_vm3, %v772_v1 }
 0x514   :  { %4406 = vmatmul.mubr.msk.f32.vlgmr.msra.gmra.mxu0 %vm750_vm3, %v773_v3 }
 0x515   :  { %1517 = vrot.lane.b32.xlu1 %v5238_v6, %s5837_s28  ;;  %v655_v6 = vld [vmem:[%s5816_s13 + $0x8] sm:$0xff] }
 0x575   :  { %v968_v63 = vpop.xlane.xlu0 %967 }
 0x576   :  { %4703 = vrcp.f32 %v968_v63  ;;  %v656_v63 = vld [vmem:[%s5816_s13 + $0x10] sm:$0xff] }
 0x579   :  { %v971_v5 = vpop.xlane.xlu1 %970  ;;  %v980_v7 = vpop.permute.xlu0 %979 }
 0x57a   :  { %4705 = vrcp.f32 %v971_v5  ;;  %4415 = vmatprep.subr.msk.mxu0 %vm780_vm6, %v980_v7 }
 0x57b   :  { %4416 = vmatpush3.msk.msra.mxu0 %vm780_vm6, %v980_v7 }
 0x57d   :  { %v978_v4 = vpop.permute.xlu1 %977  ;;  %v1228_v17 = vpop.permute.xlu0 %1227 }
 0x57e   :  { %4417 = vmatprep.subr.mxu0 %v978_v4 }
 0x57f   :  { %4418 = vmatpush3.msra.mxu0 %v978_v4 }
 0x580   :  { %4422 = vmatprep.subr.mxu0 %v655_v6 }
 0x581   :  { %v1234_v14 = vpop.permute.xlu1 %1233  ;;  %v1522_v24 = vpop.permute.xlu0 %1521 }
 0x583   :  { %v4704_v9 = vpop.eup %4703 }
 0x584   :  { %v974_v11 = vmul.f32 %v4704_v9, %v4696_v56 }
 0x585   :  { %v1232_v21 = vpop.permute.xlu1 %1231  ;;  %v1516_v27 = vpop.permute.xlu0 %1515 }
 0x586   :  { %4419 = vmatprep.mubr.msk.f32.mxu0 %vm750_vm3, %v974_v11 }
 0x587   :  { %v4706_v12 = vpop.eup %4705 }
 0x588   :  { %v975_v13 = vmul.f32 %v4706_v12, %v4698_v58 }
 0x589   :  { %v1230_v25 = vpop.permute.xlu1 %1229 }
 0x58a   :  { %4420 = vmatmul.mubr.msk.f32.vlgmr.msra.gmra.mxu0 %vm750_vm3, %v975_v13 }
 0x58b   :  { %4423 = vmatpush3.msra.mxu0 %v655_v6 }
 0x58c   :  { %4432 = vmatprep.subr.msk.mxu0 %vm658_vm5, %v1234_v14 }
 0x58d   :  { %v1520_v28 = vpop.permute.xlu1 %1519 }
 0x591   :  { %v1518_v29 = vpop.permute.xlu1 %1517 }
 0x5d4   :  { %v4407_v15 = vpop.f32.mrf.mxu0 }
 0x5d6   :  { %v850_v16 = vpop.f32.mrf.mxu0 }
 0x5d7   :  { %4429 = vmatprep.mubr.msk.f32.mxu1 %vm658_vm5, %v850_v16 }
 0x5d8   :  { %4430 = vmatmul.mubr.msk.f32.vlgmr.msra.gmra.mxu1 %vm658_vm5, %v4407_v15 }
 0x64a   :  { %v4421_v19 = vpop.f32.mrf.mxu0 }
 0x64c   :  { %v1056_v22 = vpop.f32.mrf.mxu0 }
 0x64d   :  { %4424 = vmatprep.mubr.msk.f32.mxu0 %vm658_vm5, %v1056_v22 }
 0x64e   :  { %4425 = vmatmul.mubr.msk.f32.vlgmr.msra.gmra.mxu0 %vm658_vm5, %v4421_v19 }
 0x64f   :  { %4433 = vmatpush3.xpose.msk.msra.mxu0 %vm658_vm5, %v1234_v14  ;;  %4436 = vmatprep.mubr.msk.f32.mxu0 %vm658_vm5, %v1228_v17 }
 0x650   :  { %4434 = vmatprep.subr.msk.mxu0 %vm658_vm5, %v1232_v21 }
 0x653   :  { %4435 = vmatpush3.xpose.msk.msra.mxu0 %vm658_vm5, %v1232_v21 }
 0x654   :  { %4451 = vmatprep.subr.msk.mxu0 %vm658_vm5, %v1522_v24 }
 0x656   :  { %4437 = vmatmul.mubr.msk.f32.vlgmr.msra.gmra.mxu0 %vm658_vm5, %v1230_v25 }
 0x657   :  { %4452 = vmatpush3.xpose.msk.msra.mxu0 %vm658_vm5, %v1522_v24  ;;  %4455 = vmatprep.mubr.msk.f32.mxu0 %vm658_vm5, %v1516_v27 }
 0x658   :  { %4453 = vmatprep.subr.msk.mxu0 %vm658_vm5, %v1520_v28 }
 0x65b   :  { %4454 = vmatpush3.xpose.msk.msra.mxu0 %vm658_vm5, %v1520_v28 }
 0x65e   :  { %4456 = vmatmul.mubr.msk.f32.vlgmr.msra.gmra.mxu0 %vm658_vm5, %v1518_v29  ;;  %v657_v29 = vld [vmem:[%s5816_s13 + $0x18] sm:$0xff] }
 0x698   :  { %v4431_v16 = vpop.f32.mrf.mxu1 }
 0x69a   :  { %v1218_v17 = vpop.f32.mrf.mxu1 }
 0x70e   :  { %v5326_v30 = vpop.f32.mrf.mxu0 }
 0x710   :  { %v5328_v31 = vpop.f32.mrf.mxu0 }
 0x716   :  { %v4438_v32 = vpop.f32.mrf.mxu0 }
 0x717   :  { %v1319_v33 = vmul.f32 0.35355338, %v4438_v32  ;;  %v1224_v32 = vadd.f32 %v4431_v16, %v5326_v30  ;;  %v1981_v16 = vld [vmem:[%s5822_s19 + $0x68] sm:$0xff] }
 0x718   :  { %v1309_v34 = vpop.f32.mrf.mxu0 }
 0x719   :  { %v1318_v35 = vmul.f32 0.35355338, %v1309_v34  ;;  %v1321_v36 = vadd.f32 %v1319_v33, %v5262_v23  ;;  %v1219_v34 = vadd.f32 %v1218_v17, %v5328_v31  ;;  %v1980_v17 = vld [vmem:[%s5822_s19 + $0x60] sm:$0xff] }
 0x71b   :  { %v1325_v37 = vsel %vm754_vm2, %v1321_v36, -inf  ;;  %v1320_v38 = vadd.f32 %v1318_v35, %v5264_v26 }
 0x71c   :  { %1326 = vmax.xlane.f32.xlu1 %v1325_v37 }
 0x71d   :  { %v1322_v39 = vsel %vm750_vm3, %v1320_v38, -inf }
 0x71e   :  { %1323 = vmax.xlane.f32.xlu0 %v1322_v39  ;;  %v4457_v40 = vpop.f32.mrf.mxu0 }
 0x71f   :  { %v1607_v59 = vmul.f32 0.35355338, %v4457_v40 }
 0x720   :  { %v1597_v41 = vpop.f32.mrf.mxu0 }
 0x721   :  { %v1606_v42 = vmul.f32 0.35355338, %v1597_v41  ;;  %v1609_v60 = vadd.f32 %v1607_v59, %v5262_v23  ;;  %v1859_v59 = vld [vmem:[%s5820_s17 + $0x8] sm:$0xff] }
 0x723   :  { %v1608_v43 = vadd.f32 %v1606_v42, %v5264_v26  ;;  %v1613_v61 = vsel %vm754_vm2, %v1609_v60, -inf  ;;  %v4001_v42 = vld [vmem:[%s5817_s14] ss:$0 sm:$0xff] }
 0x725   :  { %v1610_v44 = vsel %vm750_vm3, %v1608_v43, -inf }
 0x72d   :  { %1344 = vrot.lane.b32.xlu1 %v5246_v10, %s4803_s4 }
 0x751   :  { %1611 = vmax.xlane.f32.xlu1 %v1610_v44 }
 0x7a5   :  { %v1327_v45 = vpop.xlane.xlu1 %1326 }
 0x7a6   :  { %v1329_v46 = vsub.f32 %v1321_v36, %v1327_v45 }
 0x7a7   :  { %v1324_v47 = vpop.xlane.xlu0 %1323 }
 0x7a8   :  { %v1332_v48 = vmul.f32 1.442695, %v1329_v46  ;;  %v1328_v49 = vsub.f32 %v1320_v38, %v1324_v47 }
 0x7a9   :  { %v1345_v55 = vpop.permute.xlu1 %1344 }
 0x7aa   :  { %4707 = vpow2.f32 %v1332_v48  ;;  %v1330_v50 = vmul.f32 1.442695, %v1328_v49 }
 0x7ac   :  { %4709 = vpow2.f32 %v1330_v50 }
 0x7b7   :  { %v4708_v51 = vpop.eup %4707 }
 0x7b8   :  { %v1337_v52 = vsel %vm754_vm2, %v4708_v51, 0.0 }
 0x7b9   :  { %v4710_v53 = vpop.eup %4709  ;;  %1338 = vadd.xlane.f32.xlu0 %v1337_v52 }
 0x7ba   :  { %v1334_v54 = vsel %vm750_vm3, %v4710_v53, 0.0 }
 0x7bd   :  { %1335 = vadd.xlane.f32.xlu0 %v1334_v54 }
 0x7d3   :  { %1346 = vrot.lane.b32.xlu0 %v5242_v8, %s4803_s4 }
 0x7da   :  { %v1612_v56 = vpop.xlane.xlu1 %1611 }
 0x7db   :  { %v1616_v57 = vsub.f32 %v1608_v43, %v1612_v56 }
 0x7dd   :  { %v1618_v58 = vmul.f32 1.442695, %v1616_v57  ;;  %v1861_v57 = vld [vmem:[%s5820_s17 + $0x18] sm:$0xff] }
 0x7de   :  { %4470 = vmatprep.subr.mxu0 %v1861_v57 }
 0x7df   :  { %4711 = vpow2.f32 %v1618_v58  ;;  %v1860_v58 = vld [vmem:[%s5820_s17 + $0x10] sm:$0xff]  ;;  %4471 = vmatpush3.msra.mxu0 %v1861_v57 }
 0x7e0   :  { %4472 = vmatprep.subr.mxu0 %v1860_v58 }
 0x7e1   :  { %4473 = vmatpush3.msra.mxu0 %v1860_v58 }
 0x7e2   :  { %4474 = vmatprep.subr.mxu0 %v1859_v59 }
 0x7e3   :  { %4475 = vmatpush3.msra.mxu0 %v1859_v59 }
 0x7ec   :  { %v4712_v62 = vpop.eup %4711 }
 0x7ed   :  { %v1622_v0 = vsel %vm750_vm3, %v4712_v62, 0.0 }
 0x7f2   :  { %1614 = vmax.xlane.f32.xlu0 %v1613_v61 }
 0x7f6   :  { %1623 = vadd.xlane.f32.xlu0 %v1622_v0 }
 0x80c   :  { %1634 = vrot.lane.b32.xlu0 %v5242_v8, %s5837_s28 }
 0x842   :  { %v1339_v1 = vpop.xlane.xlu0 %1338 }
 0x843   :  { %4713 = vrcp.f32 %v1339_v1 }
 0x846   :  { %v1336_v3 = vpop.xlane.xlu0 %1335 }
 0x847   :  { %4715 = vrcp.f32 %v1336_v3 }
 0x84a   :  { %v1347_v2 = vpop.permute.xlu0 %1346 }
 0x84b   :  { %4439 = vmatprep.subr.msk.mxu1 %vm780_vm6, %v1347_v2 }
 0x84c   :  { %4440 = vmatpush3.msk.msra.mxu1 %vm780_vm6, %v1347_v2 }
 0x84d   :  { %4441 = vmatprep.subr.mxu1 %v1345_v55 }
 0x84e   :  { %4442 = vmatpush3.msra.mxu1 %v1345_v55 }
 0x84f   :  { %4446 = vmatprep.subr.mxu1 %v656_v63 }
 0x850   :  { %v4714_v5 = vpop.eup %4713 }
 0x851   :  { %v1343_v8 = vmul.f32 %v4714_v5, %v4708_v51  ;;  %v4002_v5 = vld [vmem:[%s5818_s15] ss:$0 sm:$0xff] }
 0x854   :  { %v4716_v7 = vpop.eup %4715 }
 0x855   :  { %v1342_v4 = vmul.f32 %v4716_v7, %v4710_v53 }
 0x857   :  { %4443 = vmatprep.mubr.msk.f32.mxu1 %vm750_vm3, %v1342_v4 }
 0x858   :  { %4444 = vmatmul.mubr.msk.f32.vlgmr.msra.gmra.mxu1 %vm750_vm3, %v1343_v8 }
 0x859   :  { %4447 = vmatpush3.msra.mxu1 %v656_v63 }
 0x87b   :  { %v1615_v6 = vpop.xlane.xlu0 %1614 }
 0x87c   :  { %v1617_v9 = vsub.f32 %v1609_v60, %v1615_v6  ;;  %v1858_v60 = vld [vmem:[%s5820_s17] sm:$0xff] }
 0x87d   :  { %4476 = vmatprep.subr.mxu0 %v1858_v60 }
 0x87e   :  { %v1620_v11 = vmul.f32 1.442695, %v1617_v9  ;;  %4477 = vmatpush3.msra.mxu0 %v1858_v60  ;;  %v4003_v9 = vld [vmem:[%s5819_s16] ss:$0 sm:$0xff] }
 0x87f   :  { %v1624_v12 = vpop.xlane.xlu0 %1623 }
 0x880   :  { %4717 = vpow2.f32 %v1620_v11 }
 0x881   :  { %4719 = vrcp.f32 %v1624_v12 }
 0x883   :  { %v1635_v13 = vpop.permute.xlu0 %1634 }
 0x884   :  { %4458 = vmatprep.subr.msk.mxu1 %vm780_vm6, %v1635_v13 }
 0x88d   :  { %v4718_v14 = vpop.eup %4717 }
 0x88e   :  { %v1625_v15 = vsel %vm754_vm2, %v4718_v14, 0.0  ;;  %v4720_v19 = vpop.eup %4719 }
 0x88f   :  { %1626 = vadd.xlane.f32.xlu1 %v1625_v15  ;;  %v1630_v25 = vmul.f32 %v4720_v19, %v4712_v62  ;;  %v1982_v15 = vld [vmem:[%s5822_s19 + $0x70] sm:$0xff]  ;;  %v1979_v19 = vld [vmem:[%s5822_s19 + $0x58] sm:$0xff] }
 0x8a0   :  { %1632 = vrot.lane.b32.xlu1 %v5246_v10, %s5837_s28 }
 0x918   :  { %v4445_v21 = vpop.f32.mrf.mxu1  ;;  %v1627_v22 = vpop.xlane.xlu1 %1626 }
 0x919   :  { %4721 = vrcp.f32 %v1627_v22  ;;  %v1977_v22 = vld [vmem:[%s5822_s19 + $0x48] sm:$0xff] }
 0x91a   :  { %v1423_v24 = vpop.f32.mrf.mxu1 }
 0x91b   :  { %4448 = vmatprep.mubr.msk.f32.mxu1 %vm658_vm5, %v1423_v24  ;;  %v1976_v24 = vld [vmem:[%s5822_s19 + $0x40] sm:$0xff] }
 0x91c   :  { %4449 = vmatmul.mubr.msk.f32.vlgmr.msra.gmra.mxu1 %vm658_vm5, %v4445_v21  ;;  %v1633_v27 = vpop.permute.xlu1 %1632  ;;  %v1978_v21 = vld [vmem:[%s5822_s19 + $0x50] sm:$0xff] }
 0x91d   :  { %4459 = vmatpush3.msk.msra.mxu1 %vm780_vm6, %v1635_v13  ;;  %4462 = vmatprep.mubr.msk.f32.mxu1 %vm750_vm3, %v1630_v25  ;;  %v1975_v25 = vld [vmem:[%s5822_s19 + $0x38] sm:$0xff] }
 0x91e   :  { %4460 = vmatprep.subr.mxu1 %v1633_v27 }
 0x91f   :  { %4461 = vmatpush3.msra.mxu1 %v1633_v27  ;;  %v1974_v27 = vld [vmem:[%s5822_s19 + $0x30] sm:$0xff] }
 0x920   :  { %4465 = vmatprep.subr.mxu1 %v657_v29 }
 0x926   :  { %v4722_v10 = vpop.eup %4721 }
 0x927   :  { %v1631_v28 = vmul.f32 %v4722_v10, %v4718_v14  ;;  %v1983_v14 = vld [vmem:[%s5822_s19 + $0x78] sm:$0xff]  ;;  %v1973_v10 = vld [vmem:[%s5822_s19 + $0x28] sm:$0xff] }
 0x929   :  { %4463 = vmatmul.mubr.msk.f32.vlgmr.msra.gmra.mxu1 %vm750_vm3, %v1631_v28  ;;  %v1972_v28 = vld [vmem:[%s5822_s19 + $0x20] sm:$0xff] }
 0x92a   :  { %4466 = vmatpush3.msra.mxu1 %v657_v29  ;;  %v1971_v29 = vld [vmem:[%s5822_s19 + $0x18] sm:$0xff] }
 0x92b   :  { %4481 = vmatprep.subr.mxu1 %v1983_v14 }
 0x9dc   :  { %v4450_v33 = vpop.f32.mrf.mxu1 }
 0x9dd   :  { %v1514_v35 = vadd.f32 %v4450_v33, %v1224_v32  ;;  %v1970_v32 = vld [vmem:[%s5822_s19 + $0x10] sm:$0xff]  ;;  %v1969_v33 = vld [vmem:[%s5822_s19 + $0x8] sm:$0xff] }
 0x9de   :  { %v1504_v36 = vpop.f32.mrf.mxu1 }
 0x9df   :  { %v1513_v37 = vadd.f32 %v1504_v36, %v1219_v34  ;;  %v1968_v34 = vld [vmem:[%s5822_s19] sm:$0xff] }
 0x9e9   :  { %v4464_v38 = vpop.f32.mrf.mxu1 }
 0x9eb   :  { %v1711_v39 = vpop.f32.mrf.mxu1 }
 0x9ec   :  { %4467 = vmatprep.mubr.msk.f32.mxu1 %vm658_vm5, %v1711_v39 }
 0x9ed   :  { %4468 = vmatmul.mubr.msk.f32.vlgmr.msra.gmra.mxu1 %vm658_vm5, %v4464_v38 }
 0x9ee   :  { %4482 = vmatpush3.msra.mxu1 %v1983_v14  ;;  %v4023_v14 = vld [vmem:[%s5855_s2 + $0x38] sm:$0xff] }
 0x9ef   :  { %4483 = vmatprep.subr.mxu1 %v1982_v15 }
 0x9f0   :  { %4484 = vmatpush3.msra.mxu1 %v1982_v15 }
 0x9f1   :  { %4485 = vmatprep.subr.mxu1 %v1981_v16 }
 0x9f2   :  { %4486 = vmatpush3.msra.mxu1 %v1981_v16 }
 0x9f3   :  { %4487 = vmatprep.subr.mxu1 %v1980_v17 }
 0x9f4   :  { %4488 = vmatpush3.msra.mxu1 %v1980_v17 }
 0x9f5   :  { %4489 = vmatprep.subr.mxu1 %v1979_v19 }
 0x9f6   :  { %4490 = vmatpush3.msra.mxu1 %v1979_v19 }
 0x9f7   :  { %4491 = vmatprep.subr.mxu1 %v1978_v21 }
 0x9f8   :  { %4492 = vmatpush3.msra.mxu1 %v1978_v21 }
 0x9f9   :  { %4493 = vmatprep.subr.mxu1 %v1977_v22 }
 0x9fa   :  { %4494 = vmatpush3.msra.mxu1 %v1977_v22 }
 0x9fb   :  { %4495 = vmatprep.subr.mxu1 %v1976_v24 }
 0x9fc   :  { %4496 = vmatpush3.msra.mxu1 %v1976_v24 }
 0x9fd   :  { %4497 = vmatprep.subr.mxu1 %v1975_v25 }
 0x9fe   :  { %4498 = vmatpush3.msra.mxu1 %v1975_v25  ;;  %v4010_v25 = vld [vmem:[%s5856_s3 + $0x1] ss:$0 sm:$0xff] }
 0x9ff   :  { %4499 = vmatprep.subr.mxu1 %v1974_v27 }
 0xa00   :  { %4500 = vmatpush3.msra.mxu1 %v1974_v27 }
 0xa01   :  { %4501 = vmatprep.subr.mxu1 %v1973_v10 }
 0xa02   :  { %4502 = vmatpush3.msra.mxu1 %v1973_v10 }
 0xa03   :  { %4503 = vmatprep.subr.mxu1 %v1972_v28 }
 0xa04   :  { %4504 = vmatpush3.msra.mxu1 %v1972_v28 }
 0xa05   :  { %4505 = vmatprep.subr.mxu1 %v1971_v29 }
 0xa06   :  { %4506 = vmatpush3.msra.mxu1 %v1971_v29 }
 0xa07   :  { %4507 = vmatprep.subr.mxu1 %v1970_v32 }
 0xa08   :  { %4508 = vmatpush3.msra.mxu1 %v1970_v32  ;;  %v4011_v32 = vld [vmem:[%s5857_s27 + $0x1] ss:$0 sm:$0xff] }
 0xa09   :  { %4509 = vmatprep.subr.mxu1 %v1969_v33 }
 0xa0a   :  { %4510 = vmatpush3.msra.mxu1 %v1969_v33 }
 0xa0b   :  { %4511 = vmatprep.subr.mxu1 %v1968_v34 }
 0xa0c   :  { %4512 = vmatpush3.msra.mxu1 %v1968_v34 }
 0xaad   :  { %v4469_v40 = vpop.f32.mrf.mxu1 }
 0xaae   :  { %v1802_v41 = vadd.f32 %v4469_v40, %v1514_v35  ;;  %v4004_v35 = vld [vmem:[%s5821_s18] ss:$0 sm:$0xff] }
 0xaaf   :  { %v1792_v43 = vpop.f32.mrf.mxu1 }
 0xab0   :  { %v1804_v30 = vadd.f32 %v1802_v41, %v5153_v20  ;;  %v1801_v44 = vadd.f32 %v1792_v43, %v1513_v37 }
 0xab2   :  { %v5374_v31 = vadd.f32 %v4001_v42, %v1804_v30  ;;  %v1803_v45 = vadd.f32 %v1801_v44, %v5149_v18 }
 0xab4   :  { %v5377_v46 = vadd.f32 %v4001_v42, %v1803_v45  ;;  %v1819_v47 = vsel %vm349_vm4, %v5374_v31, 0.0 }
 0xab5   :  { %1820 = vadd.xlane.f32.xlu0 %v1819_v47 }
 0xab6   :  { %v1816_v48 = vsel %vm5859_vm7, %v5377_v46, 0.0  ;;  %vm5870_vm7 = vmmov %vm5868_vm0 }
 0xab7   :  { %1817 = vadd.xlane.f32.xlu1 %v1816_v48 }
 0xb3e   :  { %v1821_v49 = vpop.xlane.xlu0 %1820 }
 0xb3f   :  { %v1823_v50 = vmul.f32 0.03125, %v1821_v49 }
 0xb40   :  { %v1818_v51 = vpop.xlane.xlu1 %1817 }
 0xb41   :  { %v1825_v20 = vsub.f32 %v5374_v31, %v1823_v50  ;;  %v1822_v52 = vmul.f32 0.03125, %v1818_v51 }
 0xb43   :  { %v1824_v53 = vsub.f32 %v5377_v46, %v1822_v52  ;;  %v1827_v54 = vmul.f32 %v1825_v20, %v1825_v20 }
 0xb45   :  { %v1831_v18 = vsel %vm349_vm4, %v1827_v54, 0.0  ;;  %v1826_v55 = vmul.f32 %v1824_v53, %v1824_v53 }
 0xb46   :  { %1832 = vadd.xlane.f32.xlu1 %v1831_v18 }
 0xb47   :  { %v1828_v56 = vsel %vm5860_vm8, %v1826_v55, 0.0  ;;  %vm5876_vm8 = vmmov %vm5868_vm0 }
 0xb48   :  { %1829 = vadd.xlane.f32.xlu0 %v1828_v56  ;;  %v4007_v56 = vld [vmem:[%s5823_s20] ss:$0 sm:$0xff] }
 0xbcf   :  { %v1833_v61 = vpop.xlane.xlu1 %1832 }
 0xbd0   :  { %v1835_v62 = vmul.f32 0.03125, %v1833_v61 }
 0xbd1   :  { %v1830_v0 = vpop.xlane.xlu0 %1829 }
 0xbd2   :  { %v1837_v1 = vadd.f32 1e-06, %v1835_v62  ;;  %v1834_v3 = vmul.f32 0.03125, %v1830_v0 }
 0xbd4   :  { %4723 = vrsqrt.f32 %v1837_v1  ;;  %v1836_v2 = vadd.f32 1e-06, %v1834_v3 }
 0xbd6   :  { %4725 = vrsqrt.f32 %v1836_v2 }
 0xbe1   :  { %v4724_v63 = vpop.eup %4723 }
 0xbe2   :  { %v1841_v7 = vmul.f32 %v4724_v63, %v1825_v20 }
 0xbe3   :  { %v4726_v4 = vpop.eup %4725 }
 0xbe4   :  { %v1840_v8 = vmul.f32 %v4726_v4, %v1824_v53  ;;  %v1849_v6 = vmul.f32 %v4002_v5, %v1841_v7 }
 0xbe6   :  { %v1848_v11 = vmul.f32 %v4002_v5, %v1840_v8  ;;  %v1857_v13 = vadd.f32 %v4003_v9, %v1849_v6 }
 0xbe8   :  { %v1856_v12 = vadd.f32 %v4003_v9, %v1848_v11  ;;  %v4015_v9 = vld [vmem:[%s5854_s8 + $0x38] sm:$0xff]  ;;  %v4014_v11 = vld [vmem:[%s5854_s8 + $0x30] sm:$0xff] }
 0xbe9   :  { %4516 = vmatprep.subr.mxu0 %v4015_v9 }
 0xbea   :  { %4478 = vmatprep.mubr.msk.f32.mxu0 %vm5861_vm9, %v1856_v12  ;;  %v4013_v12 = vld [vmem:[%s5854_s8 + $0x28] sm:$0xff]  ;;  %vm5877_vm9 = vmmov %vm5868_vm0 }
 0xbeb   :  { %4479 = vmatmul.mubr.msk.f32.vlgmr.msra.gmra.mxu0 %vm5862_vm10, %v1857_v13  ;;  %v4012_v13 = vld [vmem:[%s5854_s8 + $0x20] sm:$0xff]  ;;  %vm5879_vm10 = vmmov %vm5868_vm0 }
 0xbec   :  { %4517 = vmatpush3.msra.mxu0 %v4015_v9 }
 0xbed   :  { %4518 = vmatprep.subr.mxu0 %v4014_v11 }
 0xbee   :  { %4519 = vmatpush3.msra.mxu0 %v4014_v11 }
 0xbef   :  { %4520 = vmatprep.subr.mxu0 %v4013_v12 }
 0xbf0   :  { %4521 = vmatpush3.msra.mxu0 %v4013_v12 }
 0xbf1   :  { %4522 = vmatprep.subr.mxu0 %v4012_v13 }
 0xbf2   :  { %4523 = vmatpush3.msra.mxu0 %v4012_v13 }
 0xbf3   :  { %4527 = vmatprep.subr.mxu0 %v4023_v14 }
 0xcab   :  { %v4480_v36 = vpop.f32.mrf.mxu0 }
 0xcac   :  { %v1947_v37 = vadd.f32 %v4480_v36, %v4004_v35  ;;  %v4022_v36 = vld [vmem:[%s5855_s2 + $0x30] sm:$0xff] }
 0xcad   :  { %v1941_v38 = vpop.f32.mrf.mxu0 }
 0xcae   :  { %v1953_v39 = vmul.f32 0.044715, %v1947_v37  ;;  %v1942_v40 = vadd.f32 %v4004_v35, %v1941_v38  ;;  %v1951_v54 = vmul.f32 0.5, %v1947_v37  ;;  %v4020_v38 = vld [vmem:[%s5855_s2 + $0x20] sm:$0xff] }
 0xcb0   :  { %v1955_v41 = vmul.f32 %v1953_v39, %v1947_v37  ;;  %v1952_v42 = vmul.f32 0.044715, %v1942_v40  ;;  %v1950_v52 = vmul.f32 0.5, %v1942_v40  ;;  %v4031_v39 = vld [vmem:[%s5814_s11 + $0x38] sm:$0xff] }
 0xcb2   :  { %v1957_v43 = vmul.f32 %v1955_v41, %v1947_v37  ;;  %v1954_v30 = vmul.f32 %v1952_v42, %v1942_v40  ;;  %v4029_v41 = vld [vmem:[%s5814_s11 + $0x28] sm:$0xff]  ;;  %v4028_v42 = vld [vmem:[%s5814_s11 + $0x20] sm:$0xff] }
 0xcb4   :  { %v1959_v44 = vadd.f32 %v1957_v43, %v1947_v37  ;;  %v1956_v45 = vmul.f32 %v1954_v30, %v1942_v40  ;;  %v4021_v37 = vld [vmem:[%s5855_s2 + $0x28] sm:$0xff]  ;;  %v4017_v30 = vld [vmem:[%s5858_s0 + $0x1] ss:$0 sm:$0xff] }
 0xcb6   :  { %v1958_v47 = vadd.f32 %v1956_v45, %v1942_v40  ;;  %v1961_v48 = vmul.f32 0.7978846, %v1959_v44  ;;  %v4030_v40 = vld [vmem:[%s5814_s11 + $0x30] sm:$0xff] }
 0xcb8   :  { %v1960_v49 = vmul.f32 0.7978846, %v1958_v47  ;;  %4727 = vtanh.f32 %v1961_v48  ;;  %v4025_v47 = vld [vmem:[%s5813_s10 + $0x1] ss:$0 sm:$0xff] }
 0xcba   :  { %4729 = vtanh.f32 %v1960_v49 }
 0xcc5   :  { %v4728_v50 = vpop.eup %4727 }
 0xcc6   :  { %v1965_v20 = vadd.f32 1.0, %v4728_v50 }
 0xcc7   :  { %v4730_v51 = vpop.eup %4729 }
 0xcc8   :  { %v1964_v53 = vadd.f32 1.0, %v4730_v51  ;;  %v1967_v55 = vmul.f32 %v1965_v20, %v1951_v54  ;;  %v4033_v20 = vld [vmem:[%s5815_s12 + $0x1] ss:$0 sm:$0xff] }
 0xcca   :  { %v1966_v18 = vmul.f32 %v1964_v53, %v1950_v52 }
 0xccc   :  { %4513 = vmatprep.mubr.f32.mxu1 %v1966_v18 }
 0xccd   :  { %4514 = vmatmul.mubr.f32.vlgmr.msra.gmra.mxu1 %v1967_v55 }
 0xd8d   :  { %v4515_v57 = vpop.f32.mrf.mxu1 }
 0xd8e   :  { %v2063_v58 = vadd.f32 %v4515_v57, %v4007_v56 }
 0xd8f   :  { %v2057_v59 = vpop.f32.mrf.mxu1 }
 0xd90   :  { %v5462_v60 = vadd.f32 %v2063_v58, %v5374_v31  ;;  %v2058_v61 = vadd.f32 %v4007_v56, %v2057_v59 }
 0xd92   :  { %v5465_v62 = vadd.f32 %v2058_v61, %v5377_v46  ;;  %v2075_v0 = vsel %vm349_vm4, %v5462_v60, 0.0 }
 0xd93   :  { %2076 = vadd.xlane.f32.xlu1 %v2075_v0 }
 0xd94   :  { %v2072_v1 = vsel %vm5863_vm11, %v5465_v62, 0.0 }
 0xd95   :  { %2073 = vadd.xlane.f32.xlu0 %v2072_v1 }
 0xe1c   :  { %v2077_v3 = vpop.xlane.xlu1 %2076 }
 0xe1d   :  { %v2079_v2 = vmul.f32 0.03125, %v2077_v3 }
 0xe1e   :  { %v2074_v63 = vpop.xlane.xlu0 %2073 }
 0xe1f   :  { %v2081_v5 = vsub.f32 %v5462_v60, %v2079_v2  ;;  %v2078_v7 = vmul.f32 0.03125, %v2074_v63 }
 0xe21   :  { %v2080_v31 = vsub.f32 %v5465_v62, %v2078_v7  ;;  %v2083_v4 = vmul.f32 %v2081_v5, %v2081_v5 }
 0xe23   :  { %v2087_v46 = vsel %vm349_vm4, %v2083_v4, 0.0  ;;  %v2082_v8 = vmul.f32 %v2080_v31, %v2080_v31 }
 0xe24   :  { %2088 = vadd.xlane.f32.xlu1 %v2087_v46 }
 0xe25   :  { %v2084_v6 = vsel %vm5864_vm12, %v2082_v8, 0.0 }
 0xe26   :  { %2085 = vadd.xlane.f32.xlu0 %v2084_v6 }
 0xead   :  { %v2089_v15 = vpop.xlane.xlu1 %2088 }
 0xeae   :  { %v2091_v16 = vmul.f32 0.03125, %v2089_v15 }
 0xeaf   :  { %v2086_v17 = vpop.xlane.xlu0 %2085 }
 0xeb0   :  { %v2093_v19 = vadd.f32 1e-06, %v2091_v16  ;;  %v2090_v21 = vmul.f32 0.03125, %v2086_v17 }
 0xeb2   :  { %4731 = vrsqrt.f32 %v2093_v19  ;;  %v2092_v22 = vadd.f32 1e-06, %v2090_v21 }
 0xeb4   :  { %4733 = vrsqrt.f32 %v2092_v22 }
 0xebf   :  { %v4732_v24 = vpop.eup %4731 }
 0xec0   :  { %v2097_v27 = vmul.f32 %v4732_v24, %v2081_v5  ;;  %v4036_v24 = vld [vmem:[%s5816_s13 + $0x20] sm:$0xff] }
 0xec1   :  { %v4734_v10 = vpop.eup %4733 }
 0xec2   :  { %v2096_v28 = vmul.f32 %v4734_v10, %v2080_v31  ;;  %v2105_v29 = vmul.f32 %v4010_v25, %v2097_v27 }
 0xec4   :  { %v2104_v33 = vmul.f32 %v4010_v25, %v2096_v28  ;;  %v2113_v35 = vadd.f32 %v4011_v32, %v2105_v29 }
 0xec6   :  { %v2112_v34 = vadd.f32 %v4011_v32, %v2104_v33 }
 0xec8   :  { %4524 = vmatprep.mubr.msk.f32.mxu0 %vm5865_vm13, %v2112_v34 }
 0xec9   :  { %4525 = vmatmul.mubr.msk.f32.vlgmr.msra.gmra.mxu0 %vm5866_vm14, %v2113_v35 }
 0xeca   :  { %4528 = vmatpush3.msra.mxu0 %v4023_v14  ;;  %4535 = vmatprep.mubr.msk.f32.mxu0 %vm5867_vm15, %v2112_v34 }
 0xecb   :  { %4529 = vmatprep.subr.mxu0 %v4022_v36 }
 0xecc   :  { %4530 = vmatpush3.msra.mxu0 %v4022_v36 }
 0xecd   :  { %4531 = vmatprep.subr.mxu0 %v4021_v37 }
 0xece   :  { %4532 = vmatpush3.msra.mxu0 %v4021_v37 }
 0xecf   :  { %4533 = vmatprep.subr.mxu0 %v4020_v38 }
 0xed0   :  { %4534 = vmatpush3.msra.mxu0 %v4020_v38 }
 0xed1   :  { %4536 = vmatmul.mubr.msk.f32.vlgmr.msra.gmra.mxu0 %vm5868_vm0, %v2113_v35  ;;  %4538 = vmatprep.subr.mxu0 %v4031_v39 }
 0xed2   :  { %4539 = vmatpush3.msra.mxu0 %v4031_v39  ;;  %4546 = vmatprep.mubr.msk.f32.mxu0 %vm5869_vm1, %v2112_v34 }
 0xed3   :  { %4540 = vmatprep.subr.mxu0 %v4030_v40 }
 0xed4   :  { %4541 = vmatpush3.msra.mxu0 %v4030_v40 }
 0xed5   :  { %4542 = vmatprep.subr.mxu0 %v4029_v41 }
 0xed6   :  { %4543 = vmatpush3.msra.mxu0 %v4029_v41 }
 0xed7   :  { %4544 = vmatprep.subr.mxu0 %v4028_v42 }
 0xed8   :  { %4545 = vmatpush3.msra.mxu0 %v4028_v42 }
 0xed9   :  { %4547 = vmatmul.mubr.msk.f32.vlgmr.msra.gmra.mxu0 %vm5870_vm7, %v2113_v35 }
 0xf89   :  { %v4526_v43 = vpop.f32.mrf.mxu0 }
 0xf8a   :  { %v5548_v53 = vadd.f32 %v4526_v43, %v4017_v30 }
 0xf8b   :  { %v2199_v44 = vpop.f32.mrf.mxu0 }
 0xf8c   :  { %v5526_v45 = vadd.f32 %v4017_v30, %v2199_v44 }
 0xf8e   :  { %4553 = vmatprep.mubr.msk.f32.mxu0 %vm658_vm5, %v5526_v45 }
 0xf91   :  { %v4537_v48 = vpop.f32.mrf.mxu0 }
 0xf92   :  { %v5533_v49 = vadd.f32 %v4537_v48, %v4025_v47 }
 0xf93   :  { %v2287_v50 = vpop.f32.mrf.mxu0 }
 0xf94   :  { %v5535_v51 = vadd.f32 %v4025_v47, %v2287_v50  ;;  %4549 = vmatprep.subr.msk.mxu0 %vm658_vm5, %v5533_v49 }
 0xf95   :  { %4550 = vmatpush3.xpose.msk.msra.mxu0 %vm658_vm5, %v5533_v49 }
 0xf96   :  { %4551 = vmatprep.subr.msk.mxu0 %vm658_vm5, %v5535_v51 }
 0xf99   :  { %v4548_v52 = vpop.f32.mrf.mxu0  ;;  %4552 = vmatpush3.xpose.msk.msra.mxu0 %vm658_vm5, %v5535_v51 }
 0xf9a   :  { %v5550_v54 = vadd.f32 %v4548_v52, %v4033_v20  ;;  %v4037_v52 = vld [vmem:[%s5816_s13 + $0x28] sm:$0xff] }
 0xf9b   :  { %v2375_v18 = vpop.f32.mrf.mxu0 }
 0xf9c   :  { %v5552_v55 = vadd.f32 %v4033_v20, %v2375_v18  ;;  %4554 = vmatmul.mubr.msk.f32.vlgmr.msra.gmra.mxu0 %vm658_vm5, %v5548_v53  ;;  %4556 = vmatprep.subr.msk.mxu1 %vm780_vm6, %v5550_v54 }
 0xf9d   :  { %4557 = vmatpush3.msk.msra.mxu1 %vm780_vm6, %v5550_v54 }
 0xf9e   :  { %4558 = vmatprep.subr.mxu1 %v5552_v55 }
 0xf9f   :  { %4559 = vmatpush3.msra.mxu1 %v5552_v55 }
0x105c   :  { %v4555_v56 = vpop.f32.mrf.mxu0 }
0x105d   :  { %v2477_v57 = vmul.f32 0.35355338, %v4555_v56 }
0x105e   :  { %v2467_v58 = vpop.f32.mrf.mxu0 }
0x105f   :  { %v2476_v59 = vmul.f32 0.35355338, %v2467_v58  ;;  %v2479_v61 = vadd.f32 %v2477_v57, %v5262_v23 }
0x1061   :  { %v2483_v0 = vsel %vm754_vm2, %v2479_v61, -inf  ;;  %v2478_v1 = vadd.f32 %v2476_v59, %v5264_v26 }
0x1062   :  { %2484 = vmax.xlane.f32.xlu1 %v2483_v0 }
0x1063   :  { %v2480_v3 = vsel %vm750_vm3, %v2478_v1, -inf }
0x1064   :  { %2481 = vmax.xlane.f32.xlu0 %v2480_v3 }
0x10eb   :  { %v2485_v2 = vpop.xlane.xlu1 %2484 }
0x10ec   :  { %v2487_v63 = vsub.f32 %v2479_v61, %v2485_v2 }
0x10ed   :  { %v2482_v5 = vpop.xlane.xlu0 %2481 }
0x10ee   :  { %v2490_v7 = vmul.f32 1.442695, %v2487_v63  ;;  %v2486_v31 = vsub.f32 %v2478_v1, %v2482_v5 }
0x10f0   :  { %4735 = vpow2.f32 %v2490_v7  ;;  %v2488_v4 = vmul.f32 1.442695, %v2486_v31 }
0x10f2   :  { %4737 = vpow2.f32 %v2488_v4 }
0x10fd   :  { %v4736_v46 = vpop.eup %4735 }
0x10fe   :  { %v2495_v8 = vsel %vm754_vm2, %v4736_v46, 0.0 }
0x10ff   :  { %v4738_v6 = vpop.eup %4737  ;;  %2496 = vadd.xlane.f32.xlu1 %v2495_v8 }
0x1100   :  { %v2492_v9 = vsel %vm750_vm3, %v4738_v6, 0.0 }
0x1101   :  { %2493 = vadd.xlane.f32.xlu0 %v2492_v9 }
0x1110   :  { %2590 = vrot.lane.b32.xlu1 %v5535_v51, %s4801_s29 }
0x1114   :  { %2586 = vrot.lane.b32.xlu1 %v5526_v45, %s4801_s29 }
0x1117   :  { %2592 = vrot.lane.b32.xlu0 %v5533_v49, %s4801_s29 }
0x1118   :  { %2588 = vrot.lane.b32.xlu1 %v5548_v53, %s4801_s29 }
0x1188   :  { %v2497_v11 = vpop.xlane.xlu1 %2496 }
0x1189   :  { %4739 = vrcp.f32 %v2497_v11 }
0x118a   :  { %v2494_v12 = vpop.xlane.xlu0 %2493 }
0x118b   :  { %4741 = vrcp.f32 %v2494_v12 }
0x118c   :  { %v2591_v14 = vpop.permute.xlu1 %2590 }
0x118e   :  { %v2593_v13 = vpop.permute.xlu0 %2592 }
0x118f   :  { %4563 = vmatprep.subr.msk.mxu1 %vm658_vm5, %v2593_v13 }
0x1190   :  { %v2587_v21 = vpop.permute.xlu1 %2586 }
0x1194   :  { %v2589_v22 = vpop.permute.xlu1 %2588 }
0x1196   :  { %v4740_v15 = vpop.eup %4739 }
0x1197   :  { %v2501_v19 = vmul.f32 %v4740_v15, %v4736_v46 }
0x1198   :  { %v4742_v16 = vpop.eup %4741 }
0x1199   :  { %v2500_v17 = vmul.f32 %v4742_v16, %v4738_v6 }
0x119b   :  { %4560 = vmatprep.mubr.msk.f32.mxu1 %vm750_vm3, %v2500_v17 }
0x119c   :  { %4561 = vmatmul.mubr.msk.f32.vlgmr.msra.gmra.mxu1 %vm750_vm3, %v2501_v19 }
0x119d   :  { %4564 = vmatpush3.xpose.msk.msra.mxu1 %vm658_vm5, %v2593_v13  ;;  %4567 = vmatprep.mubr.msk.f32.mxu1 %vm658_vm5, %v2587_v21 }
0x119e   :  { %4565 = vmatprep.subr.msk.mxu1 %vm658_vm5, %v2591_v14 }
0x11a1   :  { %4566 = vmatpush3.xpose.msk.msra.mxu1 %vm658_vm5, %v2591_v14 }
0x11a2   :  { %4582 = vmatprep.subr.mxu1 %v4036_v24 }
0x11a4   :  { %4568 = vmatmul.mubr.msk.f32.vlgmr.msra.gmra.mxu1 %vm658_vm5, %v2589_v22 }
0x11a5   :  { %4583 = vmatpush3.msra.mxu1 %v4036_v24 }
0x125c   :  { %v4562_v25 = vpop.f32.mrf.mxu1 }
0x125e   :  { %v2577_v27 = vpop.f32.mrf.mxu1 }
0x125f   :  { %4584 = vmatprep.mubr.msk.f32.mxu1 %vm658_vm5, %v2577_v27 }
0x1260   :  { %4585 = vmatmul.mubr.msk.f32.vlgmr.msra.gmra.mxu1 %vm658_vm5, %v4562_v25 }
0x1264   :  { %v4569_v10 = vpop.f32.mrf.mxu1 }
0x1265   :  { %v2678_v28 = vmul.f32 0.35355338, %v4569_v10 }
0x1266   :  { %v2668_v29 = vpop.f32.mrf.mxu1 }
0x1267   :  { %v2677_v32 = vmul.f32 0.35355338, %v2668_v29  ;;  %v2680_v33 = vadd.f32 %v2678_v28, %v5262_v23 }
0x1269   :  { %v2684_v34 = vsel %vm754_vm2, %v2680_v33, -inf  ;;  %v2679_v35 = vadd.f32 %v2677_v32, %v5264_v26 }
0x126a   :  { %2685 = vmax.xlane.f32.xlu1 %v2684_v34 }
0x126b   :  { %v2681_v36 = vsel %vm750_vm3, %v2679_v35, -inf }
0x126c   :  { %2682 = vmax.xlane.f32.xlu0 %v2681_v36 }
0x127b   :  { %2704 = vrot.lane.b32.xlu1 %v5552_v55, %s4801_s29 }
0x127f   :  { %2960 = vrot.lane.b32.xlu1 %v5533_v49, %s4803_s4 }
0x1283   :  { %2958 = vrot.lane.b32.xlu1 %v5535_v51, %s4803_s4 }
0x1287   :  { %2956 = vrot.lane.b32.xlu1 %v5548_v53, %s4803_s4 }
0x128b   :  { %3246 = vrot.lane.b32.xlu1 %v5535_v51, %s5871_s7 }
0x128f   :  { %3244 = vrot.lane.b32.xlu1 %v5548_v53, %s5871_s7 }
0x12f3   :  { %v2686_v37 = vpop.xlane.xlu1 %2685 }
0x12f4   :  { %v2688_v38 = vsub.f32 %v2680_v33, %v2686_v37 }
0x12f5   :  { %v2683_v39 = vpop.xlane.xlu0 %2682 }
0x12f6   :  { %v2691_v40 = vmul.f32 1.442695, %v2688_v38  ;;  %v2687_v41 = vsub.f32 %v2679_v35, %v2683_v39 }
0x12f7   :  { %v2705_v20 = vpop.permute.xlu1 %2704 }
0x12f8   :  { %4743 = vpow2.f32 %v2691_v40  ;;  %v2689_v42 = vmul.f32 1.442695, %v2687_v41 }
0x12fa   :  { %4745 = vpow2.f32 %v2689_v42 }
0x12fb   :  { %v2961_v56 = vpop.permute.xlu1 %2960 }
0x12ff   :  { %v2959_v59 = vpop.permute.xlu1 %2958 }
0x1303   :  { %v2957_v1 = vpop.permute.xlu1 %2956 }
0x1305   :  { %v4744_v43 = vpop.eup %4743 }
0x1306   :  { %v2696_v30 = vsel %vm754_vm2, %v4744_v43, 0.0 }
0x1307   :  { %v4746_v44 = vpop.eup %4745  ;;  %2697 = vadd.xlane.f32.xlu0 %v2696_v30  ;;  %v3247_v2 = vpop.permute.xlu1 %3246 }
0x1308   :  { %v2693_v47 = vsel %vm750_vm3, %v4746_v44, 0.0 }
0x130b   :  { %2694 = vadd.xlane.f32.xlu0 %v2693_v47  ;;  %v3245_v63 = vpop.permute.xlu1 %3244 }
0x1321   :  { %2706 = vrot.lane.b32.xlu0 %v5550_v54, %s4801_s29 }
0x1325   :  { %2954 = vrot.lane.b32.xlu0 %v5526_v45, %s4803_s4 }
0x1329   :  { %3248 = vrot.lane.b32.xlu0 %v5533_v49, %s5871_s7 }
0x132d   :  { %3242 = vrot.lane.b32.xlu0 %v5526_v45, %s5871_s7 }
0x1390   :  { %v2698_v48 = vpop.xlane.xlu0 %2697 }
0x1391   :  { %4747 = vrcp.f32 %v2698_v48 }
0x1394   :  { %v2695_v50 = vpop.xlane.xlu0 %2694 }
0x1395   :  { %4749 = vrcp.f32 %v2695_v50 }
0x1398   :  { %v2707_v51 = vpop.permute.xlu0 %2706 }
0x1399   :  { %4570 = vmatprep.subr.msk.mxu0 %vm780_vm6, %v2707_v51 }
0x139a   :  { %4571 = vmatpush3.msk.msra.mxu0 %vm780_vm6, %v2707_v51 }
0x139b   :  { %4572 = vmatprep.subr.mxu0 %v2705_v20 }
0x139c   :  { %4573 = vmatpush3.msra.mxu0 %v2705_v20  ;;  %v2955_v57 = vpop.permute.xlu0 %2954 }
0x139d   :  { %4577 = vmatprep.subr.mxu0 %v4037_v52 }
0x139e   :  { %v4748_v49 = vpop.eup %4747 }
0x139f   :  { %v2702_v18 = vmul.f32 %v4748_v49, %v4744_v43 }
0x13a0   :  { %v3249_v0 = vpop.permute.xlu0 %3248 }
0x13a2   :  { %v4750_v53 = vpop.eup %4749 }
0x13a3   :  { %v2701_v45 = vmul.f32 %v4750_v53, %v4746_v44 }
0x13a4   :  { %v3243_v3 = vpop.permute.xlu0 %3242 }
0x13a5   :  { %4574 = vmatprep.mubr.msk.f32.mxu0 %vm750_vm3, %v2701_v45  ;;  %v4586_v45 = vpop.f32.mrf.mxu1 }
0x13a6   :  { %4575 = vmatmul.mubr.msk.f32.vlgmr.msra.gmra.mxu0 %vm750_vm3, %v2702_v18 }
0x13a7   :  { %4578 = vmatpush3.msra.mxu0 %v4037_v52  ;;  %v2945_v18 = vpop.f32.mrf.mxu1 }
0x13a8   :  { %4587 = vmatprep.subr.msk.mxu0 %vm658_vm5, %v2961_v56 }
0x1466   :  { %v4576_v58 = vpop.f32.mrf.mxu0 }
0x1468   :  { %v2783_v61 = vpop.f32.mrf.mxu0 }
0x1469   :  { %4579 = vmatprep.mubr.msk.f32.mxu0 %vm658_vm5, %v2783_v61 }
0x146a   :  { %4580 = vmatmul.mubr.msk.f32.vlgmr.msra.gmra.mxu0 %vm658_vm5, %v4576_v58 }
0x146b   :  { %4588 = vmatpush3.xpose.msk.msra.mxu0 %vm658_vm5, %v2961_v56  ;;  %4591 = vmatprep.mubr.msk.f32.mxu0 %vm658_vm5, %v2955_v57 }
0x146c   :  { %4589 = vmatprep.subr.msk.mxu0 %vm658_vm5, %v2959_v59 }
0x146f   :  { %4590 = vmatpush3.xpose.msk.msra.mxu0 %vm658_vm5, %v2959_v59 }
0x1470   :  { %4606 = vmatprep.subr.msk.mxu0 %vm658_vm5, %v3249_v0 }
0x1472   :  { %4592 = vmatmul.mubr.msk.f32.vlgmr.msra.gmra.mxu0 %vm658_vm5, %v2957_v1 }
0x1473   :  { %4607 = vmatpush3.xpose.msk.msra.mxu0 %vm658_vm5, %v3249_v0  ;;  %4610 = vmatprep.mubr.msk.f32.mxu0 %vm658_vm5, %v3243_v3  ;;  %v4039_v3 = vld [vmem:[%s5816_s13 + $0x38] sm:$0xff] }
0x1474   :  { %4608 = vmatprep.subr.msk.mxu0 %vm658_vm5, %v3247_v2 }
0x1477   :  { %4609 = vmatpush3.xpose.msk.msra.mxu0 %vm658_vm5, %v3247_v2 }
0x147a   :  { %4611 = vmatmul.mubr.msk.f32.vlgmr.msra.gmra.mxu0 %vm658_vm5, %v3245_v63 }
0x152a   :  { %v5636_v5 = vpop.f32.mrf.mxu0 }
0x152b   :  { %v2951_v2 = vadd.f32 %v4586_v45, %v5636_v5  ;;  %v4101_v45 = vld [vmem:[%s5822_s19 + $0xd8] sm:$0xff] }
0x152c   :  { %v5638_v7 = vpop.f32.mrf.mxu0 }
0x1532   :  { %v4593_v31 = vpop.f32.mrf.mxu0 }
0x1533   :  { %v3046_v4 = vmul.f32 0.35355338, %v4593_v31  ;;  %v2946_v31 = vadd.f32 %v2945_v18, %v5638_v7  ;;  %v4100_v18 = vld [vmem:[%s5822_s19 + $0xd0] sm:$0xff] }
0x1534   :  { %v3036_v46 = vpop.f32.mrf.mxu0 }
0x1535   :  { %v3045_v8 = vmul.f32 0.35355338, %v3036_v46  ;;  %v3048_v6 = vadd.f32 %v3046_v4, %v5262_v23 }
0x1537   :  { %v3052_v9 = vsel %vm754_vm2, %v3048_v6, -inf  ;;  %v3047_v11 = vadd.f32 %v3045_v8, %v5264_v26 }
0x1538   :  { %3053 = vmax.xlane.f32.xlu1 %v3052_v9 }
0x1539   :  { %v3049_v12 = vsel %vm750_vm3, %v3047_v11, -inf }
0x153a   :  { %3050 = vmax.xlane.f32.xlu0 %v3049_v12  ;;  %v4612_v13 = vpop.f32.mrf.mxu0 }
0x153b   :  { %v3334_v36 = vmul.f32 0.35355338, %v4612_v13  ;;  %v4077_v13 = vld [vmem:[%s5817_s14 + $0x1] ss:$0 sm:$0xff] }
0x153c   :  { %v3324_v14 = vpop.f32.mrf.mxu0 }
0x153d   :  { %v3333_v15 = vmul.f32 0.35355338, %v3324_v14  ;;  %v3336_v37 = vadd.f32 %v3334_v36, %v5262_v23  ;;  %v4038_v23 = vld [vmem:[%s5816_s13 + $0x30] sm:$0xff] }
0x153f   :  { %v3335_v16 = vadd.f32 %v3333_v15, %v5264_v26  ;;  %v3340_v38 = vsel %vm754_vm2, %v3336_v37, -inf }
0x1541   :  { %v3337_v17 = vsel %vm750_vm3, %v3335_v16, -inf }
0x1549   :  { %3071 = vrot.lane.b32.xlu1 %v5552_v55, %s4803_s4 }
0x156d   :  { %3338 = vmax.xlane.f32.xlu1 %v3337_v17 }
0x15c1   :  { %v3054_v19 = vpop.xlane.xlu1 %3053 }
0x15c2   :  { %v3056_v21 = vsub.f32 %v3048_v6, %v3054_v19 }
0x15c3   :  { %v3051_v22 = vpop.xlane.xlu0 %3050 }
0x15c4   :  { %v3059_v24 = vmul.f32 1.442695, %v3056_v21  ;;  %v3055_v25 = vsub.f32 %v3047_v11, %v3051_v22 }
0x15c5   :  { %v3072_v26 = vpop.permute.xlu1 %3071 }
0x15c6   :  { %4751 = vpow2.f32 %v3059_v24  ;;  %v3057_v27 = vmul.f32 1.442695, %v3055_v25 }
0x15c8   :  { %4753 = vpow2.f32 %v3057_v27 }
0x15d3   :  { %v4752_v10 = vpop.eup %4751 }
0x15d4   :  { %v3064_v28 = vsel %vm754_vm2, %v4752_v10, 0.0 }
0x15d5   :  { %v4754_v29 = vpop.eup %4753  ;;  %3065 = vadd.xlane.f32.xlu0 %v3064_v28 }
0x15d6   :  { %v3061_v32 = vsel %vm750_vm3, %v4754_v29, 0.0 }
0x15d9   :  { %3062 = vadd.xlane.f32.xlu0 %v3061_v32 }
0x15ef   :  { %3073 = vrot.lane.b32.xlu0 %v5550_v54, %s4803_s4 }
0x15f6   :  { %v3339_v33 = vpop.xlane.xlu1 %3338 }
0x15f7   :  { %v3343_v34 = vsub.f32 %v3335_v16, %v3339_v33  ;;  %v4084_v33 = vld [vmem:[%s5820_s17 + $0x30] sm:$0xff] }
0x15f9   :  { %v3345_v35 = vmul.f32 1.442695, %v3343_v34  ;;  %v4083_v34 = vld [vmem:[%s5820_s17 + $0x28] sm:$0xff] }
0x15fb   :  { %4755 = vpow2.f32 %v3345_v35  ;;  %v4082_v35 = vld [vmem:[%s5820_s17 + $0x20] sm:$0xff] }
0x1608   :  { %v4756_v39 = vpop.eup %4755 }
0x1609   :  { %v3349_v40 = vsel %vm750_vm3, %v4756_v39, 0.0 }
0x160e   :  { %3341 = vmax.xlane.f32.xlu0 %v3340_v38 }
0x1612   :  { %3350 = vadd.xlane.f32.xlu0 %v3349_v40 }
0x1628   :  { %3361 = vrot.lane.b32.xlu0 %v5550_v54, %s5871_s7 }
0x165e   :  { %v3066_v41 = vpop.xlane.xlu0 %3065 }
0x165f   :  { %4757 = vrcp.f32 %v3066_v41 }
0x1662   :  { %v3063_v42 = vpop.xlane.xlu0 %3062 }
0x1663   :  { %4759 = vrcp.f32 %v3063_v42 }
0x1666   :  { %v3074_v43 = vpop.permute.xlu0 %3073 }
0x1667   :  { %4594 = vmatprep.subr.msk.mxu1 %vm780_vm6, %v3074_v43 }
0x1668   :  { %4595 = vmatpush3.msk.msra.mxu1 %vm780_vm6, %v3074_v43  ;;  %v4080_v43 = vld [vmem:[%s5818_s15 + $0x1] ss:$0 sm:$0xff] }
0x1669   :  { %4596 = vmatprep.subr.mxu1 %v3072_v26 }
0x166a   :  { %4597 = vmatpush3.msra.mxu1 %v3072_v26  ;;  %v4085_v26 = vld [vmem:[%s5820_s17 + $0x38] sm:$0xff] }
0x166b   :  { %4601 = vmatprep.subr.mxu1 %v4038_v23  ;;  %4625 = vmatprep.subr.mxu0 %v4085_v26 }
0x166c   :  { %v4758_v30 = vpop.eup %4757  ;;  %4626 = vmatpush3.msra.mxu0 %v4085_v26 }
0x166d   :  { %v3070_v54 = vmul.f32 %v4758_v30, %v4752_v10  ;;  %4627 = vmatprep.subr.mxu0 %v4084_v33 }
0x166e   :  { %4628 = vmatpush3.msra.mxu0 %v4084_v33 }
0x166f   :  { %4629 = vmatprep.subr.mxu0 %v4083_v34 }
0x1670   :  { %v4760_v44 = vpop.eup %4759  ;;  %4630 = vmatpush3.msra.mxu0 %v4083_v34 }
0x1671   :  { %v3069_v47 = vmul.f32 %v4760_v44, %v4754_v29  ;;  %4631 = vmatprep.subr.mxu0 %v4082_v35 }
0x1672   :  { %4632 = vmatpush3.msra.mxu0 %v4082_v35 }
0x1673   :  { %4598 = vmatprep.mubr.msk.f32.mxu1 %vm750_vm3, %v3069_v47 }
0x1674   :  { %4599 = vmatmul.mubr.msk.f32.vlgmr.msra.gmra.mxu1 %vm750_vm3, %v3070_v54  ;;  %v4081_v54 = vld [vmem:[%s5819_s16 + $0x1] ss:$0 sm:$0xff] }
0x1675   :  { %4602 = vmatpush3.msra.mxu1 %v4038_v23 }
0x1697   :  { %v3342_v48 = vpop.xlane.xlu0 %3341 }
0x1698   :  { %v3344_v50 = vsub.f32 %v3336_v37, %v3342_v48 }
0x169a   :  { %v3347_v51 = vmul.f32 1.442695, %v3344_v50 }
0x169b   :  { %v3351_v20 = vpop.xlane.xlu0 %3350 }
0x169c   :  { %4761 = vpow2.f32 %v3347_v51 }
0x169d   :  { %4763 = vrcp.f32 %v3351_v20  ;;  %v4105_v20 = vld [vmem:[%s5822_s19 + $0xf8] sm:$0xff] }
0x169f   :  { %v3362_v52 = vpop.permute.xlu0 %3361 }
0x16a0   :  { %4613 = vmatprep.subr.msk.mxu1 %vm780_vm6, %v3362_v52 }
0x16a9   :  { %v4762_v49 = vpop.eup %4761 }
0x16aa   :  { %v3352_v53 = vsel %vm754_vm2, %v4762_v49, 0.0  ;;  %v4764_v56 = vpop.eup %4763  ;;  %vm5875_vm2 = vmmov %vm5868_vm0 }
0x16ab   :  { %3353 = vadd.xlane.f32.xlu1 %v3352_v53  ;;  %v3357_v61 = vmul.f32 %v4764_v56, %v4756_v39  ;;  %v4102_v53 = vld [vmem:[%s5822_s19 + $0xe0] sm:$0xff]  ;;  %v4099_v56 = vld [vmem:[%s5822_s19 + $0xc8] sm:$0xff] }
0x16bc   :  { %3359 = vrot.lane.b32.xlu1 %v5552_v55, %s5871_s7 }
0x1734   :  { %v4600_v57 = vpop.f32.mrf.mxu1  ;;  %v3354_v58 = vpop.xlane.xlu1 %3353 }
0x1735   :  { %4765 = vrcp.f32 %v3354_v58  ;;  %v4097_v58 = vld [vmem:[%s5822_s19 + $0xb8] sm:$0xff] }
0x1736   :  { %v3150_v59 = vpop.f32.mrf.mxu1 }
0x1737   :  { %4603 = vmatprep.mubr.msk.f32.mxu1 %vm658_vm5, %v3150_v59  ;;  %v4096_v59 = vld [vmem:[%s5822_s19 + $0xb0] sm:$0xff] }
0x1738   :  { %4604 = vmatmul.mubr.msk.f32.vlgmr.msra.gmra.mxu1 %vm658_vm5, %v4600_v57  ;;  %v3360_v0 = vpop.permute.xlu1 %3359  ;;  %v4098_v57 = vld [vmem:[%s5822_s19 + $0xc0] sm:$0xff] }
0x1739   :  { %4614 = vmatpush3.msk.msra.mxu1 %vm780_vm6, %v3362_v52  ;;  %4617 = vmatprep.mubr.msk.f32.mxu1 %vm750_vm3, %v3357_v61  ;;  %vm5874_vm6 = vmmov %vm5868_vm0  ;;  %v4104_v52 = vld [vmem:[%s5822_s19 + $0xf0] sm:$0xff]  ;;  %v4095_v61 = vld [vmem:[%s5822_s19 + $0xa8] sm:$0xff] }
0x173a   :  { %4615 = vmatprep.subr.mxu1 %v3360_v0 }
0x173b   :  { %4616 = vmatpush3.msra.mxu1 %v3360_v0  ;;  %v4094_v0 = vld [vmem:[%s5822_s19 + $0xa0] sm:$0xff] }
0x173c   :  { %4620 = vmatprep.subr.mxu1 %v4039_v3 }
0x1742   :  { %v4766_v55 = vpop.eup %4765 }
0x1743   :  { %v3358_v1 = vmul.f32 %v4766_v55, %v4762_v49  ;;  %v4103_v49 = vld [vmem:[%s5822_s19 + $0xe8] sm:$0xff]  ;;  %v4093_v55 = vld [vmem:[%s5822_s19 + $0x98] sm:$0xff] }
0x1745   :  { %4618 = vmatmul.mubr.msk.f32.vlgmr.msra.gmra.mxu1 %vm750_vm3, %v3358_v1  ;;  %vm5872_vm3 = vmmov %vm5868_vm0  ;;  %v4092_v1 = vld [vmem:[%s5822_s19 + $0x90] sm:$0xff] }
0x1746   :  { %4621 = vmatpush3.msra.mxu1 %v4039_v3  ;;  %v4091_v3 = vld [vmem:[%s5822_s19 + $0x88] sm:$0xff] }
0x1747   :  { %4636 = vmatprep.subr.mxu1 %v4105_v20 }
0x17f8   :  { %v4605_v63 = vpop.f32.mrf.mxu1 }
0x17f9   :  { %v3241_v4 = vadd.f32 %v4605_v63, %v2951_v2  ;;  %v4090_v2 = vld [vmem:[%s5822_s19 + $0x80] sm:$0xff] }
0x17fa   :  { %v3231_v46 = vpop.f32.mrf.mxu1  ;;  %v4087_v63 = vld [vmem:[%s5821_s18 + $0x1] ss:$0 sm:$0xff] }
0x17fb   :  { %v3240_v8 = vadd.f32 %v3231_v46, %v2946_v31 }
0x1805   :  { %v4619_v6 = vpop.f32.mrf.mxu1 }
0x1807   :  { %v3438_v9 = vpop.f32.mrf.mxu1 }
0x1808   :  { %4622 = vmatprep.mubr.msk.f32.mxu1 %vm658_vm5, %v3438_v9 }
0x1809   :  { %4623 = vmatmul.mubr.msk.f32.vlgmr.msra.gmra.mxu1 %vm658_vm5, %v4619_v6  ;;  %vm5873_vm5 = vmmov %vm5868_vm0 }
0x180a   :  { %4637 = vmatpush3.msra.mxu1 %v4105_v20 }
0x180b   :  { %4638 = vmatprep.subr.mxu1 %v4104_v52 }
0x180c   :  { %4639 = vmatpush3.msra.mxu1 %v4104_v52 }
0x180d   :  { %4640 = vmatprep.subr.mxu1 %v4103_v49 }
0x180e   :  { %4641 = vmatpush3.msra.mxu1 %v4103_v49 }
0x180f   :  { %4642 = vmatprep.subr.mxu1 %v4102_v53 }
0x1810   :  { %4643 = vmatpush3.msra.mxu1 %v4102_v53 }
0x1811   :  { %4644 = vmatprep.subr.mxu1 %v4101_v45 }
0x1812   :  { %4645 = vmatpush3.msra.mxu1 %v4101_v45 }
0x1813   :  { %4646 = vmatprep.subr.mxu1 %v4100_v18 }
0x1814   :  { %4647 = vmatpush3.msra.mxu1 %v4100_v18  ;;  %v4108_v18 = vld [vmem:[%s5824_s21] ss:$0 sm:$0xff]  ;;  %s4805_s21 = smov [#allocation3]  }
0x1815   :  { %4648 = vmatprep.subr.mxu1 %v4099_v56  ;;  %s3945_s7 = sshll.u32 %s4805_s21, 4  ;;  %s3946_s7 = int_to_ptr.vmem [resolvable:$true] %s3945_s7 }
0x1816   :  { %4649 = vmatpush3.msra.mxu1 %v4099_v56  ;;  %p4784_p1 = scmp.lt.s32.totalorder %s3946_s7, %s3946_s7 }
0x1817   :  { %4650 = vmatprep.subr.mxu1 %v4098_v57 }
0x1818   :  { %4651 = vmatpush3.msra.mxu1 %v4098_v57 }
0x1819   :  { %4652 = vmatprep.subr.mxu1 %v4097_v58 }
0x181a   :  { %4653 = vmatpush3.msra.mxu1 %v4097_v58 }
0x181b   :  { %4654 = vmatprep.subr.mxu1 %v4096_v59 }
0x181c   :  { %4655 = vmatpush3.msra.mxu1 %v4096_v59 }
0x181d   :  { %4656 = vmatprep.subr.mxu1 %v4095_v61 }
0x181e   :  { %4657 = vmatpush3.msra.mxu1 %v4095_v61  ;;  %v4109_v61 = vld [vmem:[%s5825_s22] ss:$0 sm:$0xff]  ;;  %s4779_s22 = scalar_lea.vmem %s3946_s7, 32 }
0x181f   :  { %4658 = vmatprep.subr.mxu1 %v4094_v0  ;;  %p4780_p0 = scmp.ne.s32.totalorder %s3946_s7, %s4779_s22  ;;  %p4785_p2 = scmp.lt.s32.totalorder %s4779_s22, %s4779_s22 }
0x1820   :  { %4659 = vmatpush3.msra.mxu1 %v4094_v0 }
0x1821   :  { %4660 = vmatprep.subr.mxu1 %v4093_v55  ;;  %p4786_p3 = por %p4785_p2, %p4784_p1 }
0x1822   :  { %4661 = vmatpush3.msra.mxu1 %v4093_v55 }
0x1823   :  { %4662 = vmatprep.subr.mxu1 %v4092_v1  ;;  %p4787_p4 = pnand %p4786_p3, %p4780_p0 }
0x1824   :  { %4663 = vmatpush3.msra.mxu1 %v4092_v1 }
0x1825   :  { %4664 = vmatprep.subr.mxu1 %v4091_v3 }
0x1826   :  { %4665 = vmatpush3.msra.mxu1 %v4091_v3 }
0x1827   :  { %4666 = vmatprep.subr.mxu1 %v4090_v2 }
0x1828   :  { %4667 = vmatpush3.msra.mxu1 %v4090_v2  ;;  %v4110_v2 = vld [vmem:[%s5827_s24] ss:$0 sm:$0xff] }
0x18c9   :  { %v4624_v11 = vpop.f32.mrf.mxu1 }
0x18ca   :  { %v3529_v12 = vadd.f32 %v4624_v11, %v3241_v4 }
0x18cb   :  { %v3519_v14 = vpop.f32.mrf.mxu1 }
0x18cc   :  { %v3531_v5 = vadd.f32 %v3529_v12, %v5462_v60  ;;  %v3528_v15 = vadd.f32 %v3519_v14, %v3240_v8 }
0x18ce   :  { %v5684_v7 = vadd.f32 %v4077_v13, %v3531_v5  ;;  %v3530_v16 = vadd.f32 %v3528_v15, %v5465_v62 }
0x18d0   :  { %v5687_v17 = vadd.f32 %v4077_v13, %v3530_v16  ;;  %v3549_v19 = vsel %vm349_vm4, %v5684_v7, 0.0 }
0x18d1   :  { %3550 = vadd.xlane.f32.xlu0 %v3549_v19 }
0x18d2   :  { %v3546_v21 = vsel %vm5872_vm3, %v5687_v17, 0.0 }
0x18d3   :  { %3547 = vadd.xlane.f32.xlu1 %v3546_v21 }
0x195a   :  { %v3551_v22 = vpop.xlane.xlu0 %3550 }
0x195b   :  { %v3553_v24 = vmul.f32 0.03125, %v3551_v22 }
0x195c   :  { %v3548_v25 = vpop.xlane.xlu1 %3547 }
0x195d   :  { %v3555_v60 = vsub.f32 %v5684_v7, %v3553_v24  ;;  %v3552_v27 = vmul.f32 0.03125, %v3548_v25 }
0x195f   :  { %v3554_v10 = vsub.f32 %v5687_v17, %v3552_v27  ;;  %v3557_v28 = vmul.f32 %v3555_v60, %v3555_v60 }
0x1961   :  { %v3561_v62 = vsel %vm349_vm4, %v3557_v28, 0.0  ;;  %v3556_v29 = vmul.f32 %v3554_v10, %v3554_v10 }
0x1962   :  { %3562 = vadd.xlane.f32.xlu1 %v3561_v62  ;;  %v4107_v62 = vld [vmem:[%s5823_s20 + $0x1] ss:$0 sm:$0xff] }
0x1963   :  { %v3558_v32 = vsel %vm5873_vm5, %v3556_v29, 0.0 }
0x1964   :  { %3559 = vadd.xlane.f32.xlu0 %v3558_v32 }
0x19eb   :  { %v3563_v36 = vpop.xlane.xlu1 %3562 }
0x19ec   :  { %v3565_v37 = vmul.f32 0.03125, %v3563_v36 }
0x19ed   :  { %v3560_v38 = vpop.xlane.xlu0 %3559 }
0x19ee   :  { %v3567_v39 = vadd.f32 1e-06, %v3565_v37  ;;  %v3564_v40 = vmul.f32 0.03125, %v3560_v38 }
0x19f0   :  { %4767 = vrsqrt.f32 %v3567_v39  ;;  %v3566_v41 = vadd.f32 1e-06, %v3564_v40 }
0x19f2   :  { %4769 = vrsqrt.f32 %v3566_v41 }
0x19fd   :  { %v4768_v42 = vpop.eup %4767 }
0x19fe   :  { %v3571_v23 = vmul.f32 %v4768_v42, %v3555_v60 }
0x19ff   :  { %v4770_v30 = vpop.eup %4769 }
0x1a00   :  { %v3570_v44 = vmul.f32 %v4770_v30, %v3554_v10  ;;  %v3579_v47 = vmul.f32 %v4080_v43, %v3571_v23 }
0x1a02   :  { %v3578_v48 = vmul.f32 %v4080_v43, %v3570_v44  ;;  %v3587_v51 = vadd.f32 %v4081_v54, %v3579_v47  ;;  %v3848_v47 = vld [vmem:[%s5826_s23 + $0x10] sm:$0xff] }
0x1a04   :  { %v3586_v50 = vadd.f32 %v4081_v54, %v3578_v48  ;;  %v3847_v54 = vld [vmem:[%s5826_s23 + $0x8] sm:$0xff]  ;;  %v3846_v48 = vld [vmem:[%s5826_s23] sm:$0xff] }
0x1a06   :  { %4633 = vmatprep.mubr.msk.f32.mxu0 %vm5874_vm6, %v3586_v50 }
0x1a07   :  { %4634 = vmatmul.mubr.msk.f32.vlgmr.msra.gmra.mxu0 %vm5875_vm2, %v3587_v51 }
0x1ac7   :  { %v4635_v31 = vpop.f32.mrf.mxu0 }
0x1ac8   :  { %v3679_v4 = vadd.f32 %v4635_v31, %v4087_v63 }
0x1ac9   :  { %v3673_v46 = vpop.f32.mrf.mxu0 }
0x1aca   :  { %v3685_v8 = vmul.f32 0.044715, %v3679_v4  ;;  %v3674_v6 = vadd.f32 %v4087_v63, %v3673_v46  ;;  %v3683_v27 = vmul.f32 0.5, %v3679_v4 }
0x1acc   :  { %v3687_v9 = vmul.f32 %v3685_v8, %v3679_v4  ;;  %v3684_v11 = vmul.f32 0.044715, %v3674_v6  ;;  %v3682_v25 = vmul.f32 0.5, %v3674_v6 }
0x1ace   :  { %v3689_v12 = vmul.f32 %v3687_v9, %v3679_v4  ;;  %v3686_v13 = vmul.f32 %v3684_v11, %v3674_v6 }
0x1ad0   :  { %v3691_v14 = vadd.f32 %v3689_v12, %v3679_v4  ;;  %v3688_v5 = vmul.f32 %v3686_v13, %v3674_v6 }
0x1ad2   :  { %v3690_v15 = vadd.f32 %v3688_v5, %v3674_v6  ;;  %v3693_v16 = vmul.f32 0.7978846, %v3691_v14 }
0x1ad4   :  { %v3692_v19 = vmul.f32 0.7978846, %v3690_v15  ;;  %4771 = vtanh.f32 %v3693_v16 }
0x1ad6   :  { %4773 = vtanh.f32 %v3692_v19 }
0x1ae1   :  { %v4772_v21 = vpop.eup %4771 }
0x1ae2   :  { %v3697_v24 = vadd.f32 1.0, %v4772_v21 }
0x1ae3   :  { %v4774_v22 = vpop.eup %4773 }
0x1ae4   :  { %v3696_v60 = vadd.f32 1.0, %v4774_v22  ;;  %v3699_v28 = vmul.f32 %v3697_v24, %v3683_v27 }
0x1ae6   :  { %v3698_v10 = vmul.f32 %v3696_v60, %v3682_v25 }
0x1ae8   :  { %4668 = vmatprep.mubr.f32.mxu1 %v3698_v10 }
0x1ae9   :  { %4669 = vmatmul.mubr.f32.vlgmr.msra.gmra.mxu1 %v3699_v28 }
0x1ba9   :  { %v4670_v29 = vpop.f32.mrf.mxu1 }
0x1baa   :  { %v3797_v32 = vadd.f32 %v4670_v29, %v4107_v62 }
0x1bab   :  { %v3791_v26 = vpop.f32.mrf.mxu1 }
0x1bac   :  { %v3792_v33 = vadd.f32 %v4107_v62, %v3791_v26  ;;  %v3801_v34 = vadd.f32 %v3797_v32, %v5684_v7 }
0x1bae   :  { %v3807_v35 = vsel %vm349_vm4, %v3801_v34, 0.0  ;;  %v3800_v36 = vadd.f32 %v3792_v33, %v5687_v17  ;;  %v3849_v17 = vld [vmem:[%s5826_s23 + $0x18] sm:$0xff] }
0x1baf   :  { %3808 = vadd.xlane.f32.xlu1 %v3807_v35  ;;  %4671 = vmatprep.subr.mxu0 %v3849_v17 }
0x1bb0   :  { %v3804_v37 = vsel %vm5876_vm8, %v3800_v36, 0.0  ;;  %4672 = vmatpush3.msra.mxu0 %v3849_v17 }
0x1bb1   :  { %3805 = vadd.xlane.f32.xlu0 %v3804_v37  ;;  %4673 = vmatprep.subr.mxu0 %v3848_v47 }
0x1bb2   :  { %4674 = vmatpush3.msra.mxu0 %v3848_v47 }
0x1bb3   :  { %4675 = vmatprep.subr.mxu0 %v3847_v54 }
0x1bb4   :  { %4676 = vmatpush3.msra.mxu0 %v3847_v54 }
0x1bb5   :  { %4677 = vmatprep.subr.mxu0 %v3846_v48 }
0x1bb6   :  { %4678 = vmatpush3.msra.mxu0 %v3846_v48 }
0x1c38   :  { %v3809_v38 = vpop.xlane.xlu1 %3808 }
0x1c39   :  { %v3811_v39 = vmul.f32 0.03125, %v3809_v38 }
0x1c3a   :  { %v3806_v40 = vpop.xlane.xlu0 %3805 }
0x1c3b   :  { %v3813_v41 = vsub.f32 %v3801_v34, %v3811_v39  ;;  %v3810_v42 = vmul.f32 0.03125, %v3806_v40 }
0x1c3d   :  { %v3812_v43 = vsub.f32 %v3800_v36, %v3810_v42  ;;  %v3815_v23 = vmul.f32 %v3813_v41, %v3813_v41 }
0x1c3f   :  { %v3819_v30 = vsel %vm349_vm4, %v3815_v23, 0.0  ;;  %v3814_v44 = vmul.f32 %v3812_v43, %v3812_v43  ;;  %vm5878_vm4 = vmmov %vm5868_vm0 }
0x1c40   :  { %3820 = vadd.xlane.f32.xlu1 %v3819_v30 }
0x1c41   :  { %v3816_v7 = vsel %vm5877_vm9, %v3814_v44, 0.0 }
0x1c42   :  { %3817 = vadd.xlane.f32.xlu0 %v3816_v7 }
0x1cc9   :  { %v3821_v50 = vpop.xlane.xlu1 %3820 }
0x1cca   :  { %v3823_v51 = vmul.f32 0.03125, %v3821_v50 }
0x1ccb   :  { %v3818_v20 = vpop.xlane.xlu0 %3817 }
0x1ccc   :  { %v3825_v52 = vadd.f32 1e-06, %v3823_v51  ;;  %v3822_v49 = vmul.f32 0.03125, %v3818_v20 }
0x1cce   :  { %4775 = vrsqrt.f32 %v3825_v52  ;;  %v3824_v53 = vadd.f32 1e-06, %v3822_v49 }
0x1cd0   :  { %4777 = vrsqrt.f32 %v3824_v53 }
0x1cdb   :  { %v4776_v45 = vpop.eup %4775 }
0x1cdc   :  { %v3829_v56 = vmul.f32 %v4776_v45, %v3813_v41 }
0x1cdd   :  { %v4778_v57 = vpop.eup %4777 }
0x1cde   :  { %v3828_v58 = vmul.f32 %v4778_v57, %v3812_v43  ;;  %v3837_v59 = vmul.f32 %v4108_v18, %v3829_v56 }
0x1ce0   :  { %v3836_v0 = vmul.f32 %v4108_v18, %v3828_v58  ;;  %v3845_v1 = vadd.f32 %v4109_v61, %v3837_v59 }
0x1ce2   :  { %v3844_v55 = vadd.f32 %v4109_v61, %v3836_v0 }
0x1ce4   :  { %4679 = vmatprep.mubr.msk.f32.mxu0 %vm5878_vm4, %v3844_v55 }
0x1ce5   :  { %4680 = vmatmul.mubr.msk.f32.vlgmr.msra.gmra.mxu0 %vm5879_vm10, %v3845_v1 }
0x1da5   :  { %v4681_v3 = vpop.f32.mrf.mxu0 }
0x1da7   :  { %v3929_v63 = vpop.f32.mrf.mxu0 }
0x1da8   :  { %v3930_v31 = vadd.f32 %v4110_v2, %v3929_v63 }
0x1daa   :  { %3937 = vst [vmem:[#allocation3] sm:$0x1] %v3930_v31  ;;  %3938 = vst [vmem:[#allocation3 - $0x4] sm:$0x20] %v3930_v31 }
0x1dab   :  { %4790 = shalt.err (!%p4787_p4)
}
0x1dac   :  { %3948 = dma.vmem_to_hbm [thread:$0]  %s3946_s7, 32, %s5828_s25, [#allocation4]  }
0x1dad   :  { %4799 = dma.done.wait [#allocation4], 32  }
0x1dae   :  { %4800 = vsyncadd [#allocation4], 4294967264 }
0x1daf   :  { %3952 = vsyncpa [#allocation4], 1 }

</bundles_post_ra>
